<compile_context>
chip_gen: v5e
topology: v5e:2x2
jax: 0.10.0
libtpu: 0.0.40
codegen_flags: <defaults>
</compile_context>

<pallas_src>
import functools

import numpy as np
import jax
import jax.numpy as jnp
from jax.experimental import pallas as pl
from jax.experimental.pallas import tpu as pltpu


_BBLK = 8  # samples per grid step; multiple of 8 keeps every row-block 8-aligned.


# ---------------------------------------------------------------------------
# Kernel
# ---------------------------------------------------------------------------
def _appearance_kernel(
    x_ref,                        # (BBLK*(H+2), (W+2)*Cin)   conv1 input slab (pre-padded)
    w1b_ref, b1b_ref,             # (K1, (W+2)*Cin, W1*O1), (1, W1*O1)
    w2b_ref, b2b_ref,             # (3,  W1*O1,     W2*O1), (1, W2*O1)
    wa1_ref, ba1_ref,             # (W2*O1, W2), (1, 1)
    plm_ref,                      # (BBLK*S3, R2)  row-pool + conv3 row-pad matrix
    w3f_ref, b3b_ref,             # (3, W2*O1, W3*O2), (1, W3*O2)   (col-pool folded in)
    w4b_ref, b4b_ref,             # (3, W3*O2, W6*O2), (1, W6*O2)
    wa2_ref, ba2_ref,             # (W6*O2, W6), (1, 1)
    m1_ref, m2_ref,               # outputs: (BBLK*H2, W2), (BBLK*H6, W6)
    a1_ref, a3_ref, a5_ref,       # VMEM scratch slabs
    *, bblk, k1, s0, s3, h2, w2, h6, w6,
):
    f32 = jnp.float32
    r1 = bblk * s0 - (k1 - 1)     # conv1 output slab rows
    r2 = r1 - 2                   # conv2 output slab rows
    r3 = bblk * s3                # pooled + row-padded slab rows
    r4 = r3 - 2                   # conv3 output slab rows
    r5 = r4 - 2                   # conv4 output slab rows

    # --- conv1 (padding=1 pre-applied) + tanh -> A1 -------------------------
    acc = jnp.dot(x_ref[pl.ds(0, r1), :], w1b_ref[0],
                  preferred_element_type=f32) + b1b_ref[...]
    for dy in range(1, k1):
        acc += jnp.dot(x_ref[pl.ds(dy, r1), :], w1b_ref[dy],
                       preferred_element_type=f32)
    a1_ref[...] = jnp.tanh(acc)

    # --- conv2 (valid) + tanh -> A2 ------------------------------------------
    acc = jnp.dot(a1_ref[pl.ds(0, r2), :], w2b_ref[0],
                  preferred_element_type=f32) + b2b_ref[...]
    for dy in range(1, 3):
        acc += jnp.dot(a1_ref[pl.ds(dy, r2), :], w2b_ref[dy],
                       preferred_element_type=f32)
    a2 = jnp.tanh(acc)

    # --- attention mask 1 (1x1 conv -> sigmoid -> per-sample L1 norm) --------
    z = jnp.dot(a2, wa1_ref[...], preferred_element_type=f32) + ba1_ref[...]
    m = pl.reciprocal(1.0 + jnp.exp(-z), approx=True)       # sigmoid via EUP recip
    for b in range(bblk):
        mb = m[b * s0: b * s0 + h2, :]                       # valid rows of sample b
        s = jnp.sum(mb, keepdims=True)                       # (1,1); m > 0 so L1 = sum
        scale = (0.5 * float(h2 * w2)) * pl.reciprocal(s, approx=True)
        m1_ref[pl.ds(b * h2, h2), :] = mb * scale

    # --- 2x2 avg-pool rows + conv3 zero row padding (one block matmul) -------
    # (column half of the pool + conv3 column padding are folded into w3f)
    a3_ref[...] = jnp.dot(plm_ref[...], a2, preferred_element_type=f32)
    # Dropout2d(p=0.25) is the identity in eval mode.

    # --- conv3 (padding=1, pool-fused weights) + tanh -> A5 -------------------
    acc = jnp.dot(a3_ref[pl.ds(0, r4), :], w3f_ref[0],
                  preferred_element_type=f32) + b3b_ref[...]
    for dy in range(1, 3):
        acc += jnp.dot(a3_ref[pl.ds(dy, r4), :], w3f_ref[dy],
                       preferred_element_type=f32)
    a5_ref[...] = jnp.tanh(acc)

    # --- conv4 (valid) + tanh -> A6 -------------------------------------------
    acc = jnp.dot(a5_ref[pl.ds(0, r5), :], w4b_ref[0],
                  preferred_element_type=f32) + b4b_ref[...]
    for dy in range(1, 3):
        acc += jnp.dot(a5_ref[pl.ds(dy, r5), :], w4b_ref[dy],
                       preferred_element_type=f32)
    a6 = jnp.tanh(acc)

    # --- attention mask 2 ------------------------------------------------------
    z = jnp.dot(a6, wa2_ref[...], preferred_element_type=f32) + ba2_ref[...]
    m = pl.reciprocal(1.0 + jnp.exp(-z), approx=True)
    for b in range(bblk):
        mb = m[b * s3: b * s3 + h6, :]
        s = jnp.sum(mb, keepdims=True)
        scale = (0.5 * float(h6 * w6)) * pl.reciprocal(s, approx=True)
        m2_ref[pl.ds(b * h6, h6), :] = mb * scale


# ---------------------------------------------------------------------------
# Host-side weight preprocessing (PyTorch layout -> banded matmul form)
# ---------------------------------------------------------------------------
def _dims(H, W, k1):
    h1, w1 = H + 3 - k1, W + 3 - k1       # conv1: padding=1
    h2, w2 = h1 - 2, w1 - 2               # conv2: k=3, valid
    h3, w3 = h2 // 2, w2 // 2             # avg pool 2x2
    h6, w6 = h3 - 2, w3 - 2               # conv4: k=3, valid (conv3 keeps h3,w3)
    return h1, w1, h2, w2, h3, w3, h6, w6


def _conv_band(w_oihw, in_cols, out_cols):
    """band[dy, (xo+dx)*Cin + ci, xo*Cout + co] = w[co, ci, dy, dx]."""
    w = np.asarray(w_oihw, np.float32)
    co, ci, k, _ = w.shape
    band = np.zeros((k, in_cols * ci, out_cols * co), np.float32)
    for dy in range(k):
        for dx in range(k):
            blk = w[:, :, dy, dx].T                     # (ci, co)
            for xo in range(out_cols):
                xi = xo + dx
                band[dy, xi * ci:(xi + 1) * ci, xo * co:(xo + 1) * co] = blk
    return band


def _bias_band(b, out_cols):
    return np.tile(np.asarray(b, np.float32), out_cols)[None, :]


def _attn_band(w_1c11, cols):
    v = np.asarray(w_1c11, np.float32).reshape(-1)      # (C,)
    c = v.shape[0]
    band = np.zeros((cols * c, cols), np.float32)
    for x in range(cols):
        band[x * c:(x + 1) * c, x] = v
    return band


def _col_pool_mat(w_in, c):
    """(w_in*c, (w_in//2)*c): sums adjacent column pairs per channel (weight 1.0)."""
    w_out = w_in // 2
    m = np.zeros((w_in * c, w_out * c), np.float32)
    for x in range(w_out):
        for dx in range(2):
            for ch in range(c):
                m[(2 * x + dx) * c + ch, x * c + ch] = 1.0
    return m


def build_kernel_params(params, in_shape):
    _, cin, H, W = in_shape
    k1 = params["w1"].shape[2]
    o1 = params["w1"].shape[0]
    h1, w1, h2, w2, h3, w3, h6, w6 = _dims(H, W, k1)

    # conv3: fold (a) the zero column padding and (b) the column half of the 2x2
    # average pool into the banded weight -> no padded A3 scratch, no prm matmul,
    # no unaligned lane-offset store in the kernel.
    w3b = _conv_band(params["w3"], w3 + 2, w3)          # (3, (w3+2)*o1, w3*o2)
    w3b = w3b[:, o1:(w3 + 1) * o1, :]                   # drop zero-pad column groups
    prm = _col_pool_mat(w2, o1)                         # (w2*o1, w3*o1)
    w3f = np.einsum("ij,djk->dik", prm, w3b)            # (3, w2*o1, w3*o2)

    kp = dict(
        w1b=_conv_band(params["w1"], W + 2, w1),
        b1b=_bias_band(params["b1"], w1),
        w2b=_conv_band(params["w2"], w1, w2),
        b2b=_bias_band(params["b2"], w2),
        wa1=_attn_band(params["wa1"], w2),
        ba1=np.asarray(params["ba1"], np.float32).reshape(1, 1),
        w3f=w3f,
        b3b=_bias_band(params["b3"], w3),
        w4b=_conv_band(params["w4"], w3, w6),
        b4b=_bias_band(params["b4"], w6),
        wa2=_attn_band(params["wa2"], w6),
        ba2=np.asarray(params["ba2"], np.float32).reshape(1, 1),
    )
    return {k: jnp.asarray(v) for k, v in kp.items()}


# ---------------------------------------------------------------------------
# Forward wrapper
# ---------------------------------------------------------------------------
@functools.partial(jax.jit, static_argnames=("k1", "o1", "o2"))
def appearance_forward(x_nchw, kp, *, k1, o1, o2):
    B, cin, H, W = x_nchw.shape
    h1, w1, h2, w2, h3, w3, h6, w6 = _dims(H, W, k1)
    bblk = _BBLK
    nblk = -(-B // bblk)
    bpad = nblk * bblk
    s0, s3 = H + 2, h3 + 2                 # per-sample slot heights (stage 0 / stage 3)

    # NCHW -> channels-last, spatially pre-padded for conv1 (padding=1), batch padded
    # to a multiple of the batch block, then samples stacked along rows so each grid
    # step feeds one tall (bblk*(H+2), (W+2)*cin) slab to the MXU.
    xp = jnp.transpose(x_nchw, (0, 2, 3, 1))
    xp = jnp.pad(xp, ((0, bpad - B), (1, 1), (1, 1), (0, 0)))
    xp = xp.reshape(bpad * s0, (W + 2) * cin)

    # Block-structured row-pool (0.25 weights) + conv3 zero-row-padding matrix.
    r2 = bblk * s0 - k1 - 1                # A2 slab rows per block
    plm_np = np.zeros((bblk * s3, r2), np.float32)
    for b in range(bblk):
        for p in range(h3):
            plm_np[b * s3 + 1 + p, b * s0 + 2 * p] = 0.25
            plm_np[b * s3 + 1 + p, b * s0 + 2 * p + 1] = 0.25
    plm = jnp.asarray(plm_np)

    consts = [kp["w1b"], kp["b1b"], kp["w2b"], kp["b2b"], kp["wa1"], kp["ba1"],
              plm, kp["w3f"], kp["b3b"], kp["w4b"], kp["b4b"], kp["wa2"], kp["ba2"]]

    def _const_spec(a):
        return pl.BlockSpec(a.shape, lambda i, _nd=a.ndim: (0,) * _nd)

    kernel = functools.partial(
        _appearance_kernel,
        bblk=bblk, k1=k1, s0=s0, s3=s3, h2=h2, w2=w2, h6=h6, w6=w6)

    m1f, m2f = pl.pallas_call(
        kernel,
        out_shape=(jax.ShapeDtypeStruct((bpad * h2, w2), jnp.float32),
                   jax.ShapeDtypeStruct((bpad * h6, w6), jnp.float32)),
        grid_spec=pltpu.PrefetchScalarGridSpec(
            num_scalar_prefetch=0,
            grid=(nblk,),
            in_specs=[pl.BlockSpec((bblk * s0, (W + 2) * cin), lambda i: (i, 0))]
                     + [_const_spec(a) for a in consts],
            out_specs=[pl.BlockSpec((bblk * h2, w2), lambda i: (i, 0)),
                       pl.BlockSpec((bblk * h6, w6), lambda i: (i, 0))],
            scratch_shapes=[
                pltpu.VMEM((bblk * s0 - (k1 - 1), w1 * o1), jnp.float32),  # A1 slab
                pltpu.VMEM((bblk * s3, w2 * o1), jnp.float32),             # pooled slab
                pltpu.VMEM((bblk * s3 - 2, w3 * o2), jnp.float32),         # A5 slab
            ],
        ),
        compiler_params=pltpu.CompilerParams(
            dimension_semantics=("parallel",)),
    )(xp, *consts)

    m1 = m1f.reshape(bpad, h2, w2)[:B, None]
    m2 = m2f.reshape(bpad, h6, w6)[:B, None]
    return m1, m2


# ---------------------------------------------------------------------------
# Parameter init (torch.nn.Conv2d style) and pure-JAX reference
# ---------------------------------------------------------------------------
def init_params(key, in_channels, out_channels, kernel_size):
    ks = jax.random.split(key, 12)

    def conv_init(kw, kb, o, i, k):
        lim = 1.0 / np.sqrt(i * k * k)
        w = jax.random.uniform(kw, (o, i, k, k), jnp.float32, -lim, lim)
        b = jax.random.uniform(kb, (o,), jnp.float32, -lim, lim)
        return w, b

    o1, o2 = out_channels, out_channels * 2
    w1, b1 = conv_init(ks[0], ks[1], o1, in_channels, kernel_size)
    w2, b2 = conv_init(ks[2], ks[3], o1, o1, 3)
    wa1, ba1 = conv_init(ks[4], ks[5], 1, o1, 1)
    w3, b3 = conv_init(ks[6], ks[7], o2, o1, 3)
    w4, b4 = conv_init(ks[8], ks[9], o2, o2, 3)
    wa2, ba2 = conv_init(ks[10], ks[11], 1, o2, 1)
    return dict(w1=w1, b1=b1, w2=w2, b2=b2, wa1=wa1, ba1=ba1,
                w3=w3, b3=b3, w4=w4, b4=b4, wa2=wa2, ba2=ba2)


def _conv_ref(x, w, b, pad):
    out = jax.lax.conv_general_dilated(
        x, w, window_strides=(1, 1),
        padding=((pad, pad), (pad, pad)),
        dimension_numbers=("NCHW", "OIHW", "NCHW"))
    return out + b.reshape(1, -1, 1, 1)


def _attention_ref(a, w, b):
    mask = jax.nn.sigmoid(_conv_ref(a, w, b, 0))
    B, _, H, W = a.shape
    norm = 2.0 * jnp.sum(jnp.abs(mask), axis=(1, 2, 3))
    return mask * H * W / norm.reshape(B, 1, 1, 1)


def appearance_ref(x, p):
    a1 = jnp.tanh(_conv_ref(x, p["w1"], p["b1"], 1))
    a2 = jnp.tanh(_conv_ref(a1, p["w2"], p["b2"], 0))
    m1 = _attention_ref(a2, p["wa1"], p["ba1"])
    B, C, H, W = a2.shape
    a3 = a2.reshape(B, C, H // 2, 2, W // 2, 2).mean(axis=(3, 5))
    a5 = jnp.tanh(_conv_ref(a3, p["w3"], p["b3"], 1))
    a6 = jnp.tanh(_conv_ref(a5, p["w4"], p["b4"], 0))
    m2 = _attention_ref(a6, p["wa2"], p["ba2"])
    return m1, m2


# ---------------------------------------------------------------------------
if __name__ == "__main__":
    key = jax.random.PRNGKey(0)
    kx, kw = jax.random.split(key)

    B, Cin, H, W = 2, 3, 16, 16
    out_channels, kernel_size = 4, 3

    x = jax.random.normal(kx, (B, Cin, H, W), jnp.float32)
    params = init_params(kw, Cin, out_channels, kernel_size)
    kparams = build_kernel_params(params, (B, Cin, H, W))

    m1, m2 = appearance_forward(
        x, kparams, k1=kernel_size, o1=out_channels, o2=2 * out_channels)
    m1, m2 = jax.block_until_ready((m1, m2))

    m1_ref, m2_ref = appearance_ref(x, params)
    assert m1.shape == m1_ref.shape and m2.shape == m2_ref.shape
    assert jnp.allclose(m1, m1_ref, atol=2e-2, rtol=2e-2), \
        float(jnp.max(jnp.abs(m1 - m1_ref)))
    assert jnp.allclose(m2, m2_ref, atol=2e-2, rtol=2e-2), \
        float(jnp.max(jnp.abs(m2 - m2_ref)))

    print("KERNEL_OK")
</pallas_src>

<mosaic_0001>
module attributes {stable_mosaic.version = 11 : i64} {
  func.func @_appearance_kernel(%arg0: i32, %arg1: memref<144x54xf32, #tpu.memory_space<vmem>>, %arg2: memref<3x54x64xf32, #tpu.memory_space<vmem>>, %arg3: memref<1x64xf32, #tpu.memory_space<vmem>>, %arg4: memref<3x64x56xf32, #tpu.memory_space<vmem>>, %arg5: memref<1x56xf32, #tpu.memory_space<vmem>>, %arg6: memref<56x14xf32, #tpu.memory_space<vmem>>, %arg7: memref<1x1xf32, #tpu.memory_space<vmem>>, %arg8: memref<72x140xf32, #tpu.memory_space<vmem>>, %arg9: memref<3x56x56xf32, #tpu.memory_space<vmem>>, %arg10: memref<1x56xf32, #tpu.memory_space<vmem>>, %arg11: memref<3x56x40xf32, #tpu.memory_space<vmem>>, %arg12: memref<1x40xf32, #tpu.memory_space<vmem>>, %arg13: memref<40x5xf32, #tpu.memory_space<vmem>>, %arg14: memref<1x1xf32, #tpu.memory_space<vmem>>, %arg15: memref<112x14xf32, #tpu.memory_space<vmem>>, %arg16: memref<40x5xf32, #tpu.memory_space<vmem>>, %arg17: memref<142x64xf32, #tpu.memory_space<vmem>>, %arg18: memref<72x56xf32, #tpu.memory_space<vmem>>, %arg19: memref<70x56xf32, #tpu.memory_space<vmem>>) attributes {dimension_semantics = [#tpu.dimension_semantics<parallel>], iteration_bounds = array<i64: 1>, scalar_prefetch = 0 : i64, scratch_operands = 3 : i64, tpu.core_type = #tpu.core_type<tc>, window_params = [{transform_indices = @transform_0, window_bounds = array<i64: 144, 54>}, {pipeline_mode = #tpu.pipeline_mode<synchronous>, transform_indices = @transform_1, window_bounds = array<i64: 3, 54, 64>}, {pipeline_mode = #tpu.pipeline_mode<synchronous>, transform_indices = @transform_2, window_bounds = array<i64: 1, 64>}, {pipeline_mode = #tpu.pipeline_mode<synchronous>, transform_indices = @transform_3, window_bounds = array<i64: 3, 64, 56>}, {pipeline_mode = #tpu.pipeline_mode<synchronous>, transform_indices = @transform_4, window_bounds = array<i64: 1, 56>}, {pipeline_mode = #tpu.pipeline_mode<synchronous>, transform_indices = @transform_5, window_bounds = array<i64: 56, 14>}, {pipeline_mode = #tpu.pipeline_mode<synchronous>, transform_indices = @transform_6, window_bounds = array<i64: 1, 1>}, {pipeline_mode = #tpu.pipeline_mode<synchronous>, transform_indices = @transform_7, window_bounds = array<i64: 72, 140>}, {pipeline_mode = #tpu.pipeline_mode<synchronous>, transform_indices = @transform_8, window_bounds = array<i64: 3, 56, 56>}, {pipeline_mode = #tpu.pipeline_mode<synchronous>, transform_indices = @transform_9, window_bounds = array<i64: 1, 56>}, {pipeline_mode = #tpu.pipeline_mode<synchronous>, transform_indices = @transform_10, window_bounds = array<i64: 3, 56, 40>}, {pipeline_mode = #tpu.pipeline_mode<synchronous>, transform_indices = @transform_11, window_bounds = array<i64: 1, 40>}, {pipeline_mode = #tpu.pipeline_mode<synchronous>, transform_indices = @transform_12, window_bounds = array<i64: 40, 5>}, {pipeline_mode = #tpu.pipeline_mode<synchronous>, transform_indices = @transform_13, window_bounds = array<i64: 1, 1>}, {transform_indices = @transform_14, window_bounds = array<i64: 112, 14>}, {transform_indices = @transform_15, window_bounds = array<i64: 40, 5>}]} {
    %c0 = arith.constant 0 : index
    %c0_0 = arith.constant 0 : index
    %0 = vector.load %arg1[%c0, %c0_0] : memref<144x54xf32, #tpu.memory_space<vmem>>, vector<142x54xf32>
    %c0_1 = arith.constant 0 : index
    %c0_2 = arith.constant 0 : index
    %c0_3 = arith.constant 0 : index
    %1 = vector.load %arg2[%c0_1, %c0_2, %c0_3] : memref<3x54x64xf32, #tpu.memory_space<vmem>>, vector<1x54x64xf32>
    %2 = vector.shape_cast %1 : vector<1x54x64xf32> to vector<54x64xf32>
    %cst = arith.constant dense<0.000000e+00> : vector<142x64xf32>
    %3 = tpu.matmul %0, %2, %cst {dimension_numbers = #tpu.dot_dimension_numbers<[1], [0], [0], [1], [0, 0, 1, 1], [], []>} : vector<142x54xf32>, vector<54x64xf32>, vector<142x64xf32> -> vector<142x64xf32>
    %c0_4 = arith.constant 0 : index
    %c0_5 = arith.constant 0 : index
    %4 = vector.load %arg3[%c0_4, %c0_5] : memref<1x64xf32, #tpu.memory_space<vmem>>, vector<1x64xf32>
    %5 = vector.broadcast %4 : vector<1x64xf32> to vector<142x64xf32>
    %6 = arith.addf %3, %5 : vector<142x64xf32>
    %c1 = arith.constant 1 : index
    %c0_6 = arith.constant 0 : index
    %7 = vector.load %arg1[%c1, %c0_6] : memref<144x54xf32, #tpu.memory_space<vmem>>, vector<142x54xf32>
    %c1_7 = arith.constant 1 : index
    %c0_8 = arith.constant 0 : index
    %c0_9 = arith.constant 0 : index
    %8 = vector.load %arg2[%c1_7, %c0_8, %c0_9] : memref<3x54x64xf32, #tpu.memory_space<vmem>>, vector<1x54x64xf32>
    %9 = vector.shape_cast %8 : vector<1x54x64xf32> to vector<54x64xf32>
    %cst_10 = arith.constant dense<0.000000e+00> : vector<142x64xf32>
    %10 = tpu.matmul %7, %9, %cst_10 {dimension_numbers = #tpu.dot_dimension_numbers<[1], [0], [0], [1], [0, 0, 1, 1], [], []>} : vector<142x54xf32>, vector<54x64xf32>, vector<142x64xf32> -> vector<142x64xf32>
    %11 = arith.addf %6, %10 : vector<142x64xf32>
    %c2 = arith.constant 2 : index
    %c0_11 = arith.constant 0 : index
    %12 = vector.load %arg1[%c2, %c0_11] : memref<144x54xf32, #tpu.memory_space<vmem>>, vector<142x54xf32>
    %c2_12 = arith.constant 2 : index
    %c0_13 = arith.constant 0 : index
    %c0_14 = arith.constant 0 : index
    %13 = vector.load %arg2[%c2_12, %c0_13, %c0_14] : memref<3x54x64xf32, #tpu.memory_space<vmem>>, vector<1x54x64xf32>
    %14 = vector.shape_cast %13 : vector<1x54x64xf32> to vector<54x64xf32>
    %cst_15 = arith.constant dense<0.000000e+00> : vector<142x64xf32>
    %15 = tpu.matmul %12, %14, %cst_15 {dimension_numbers = #tpu.dot_dimension_numbers<[1], [0], [0], [1], [0, 0, 1, 1], [], []>} : vector<142x54xf32>, vector<54x64xf32>, vector<142x64xf32> -> vector<142x64xf32>
    %16 = arith.addf %11, %15 : vector<142x64xf32>
    %17 = math.tanh %16 : vector<142x64xf32>
    %c0_16 = arith.constant 0 : index
    %c0_17 = arith.constant 0 : index
    %18 = vector.load %arg17[%c0_16, %c0_17] : memref<142x64xf32, #tpu.memory_space<vmem>>, vector<142x64xf32>
    tpu.vector_store %arg17[%c0_16, %c0_17], %17 {strides = array<i32>} : memref<142x64xf32, #tpu.memory_space<vmem>>, vector<142x64xf32>,
    %c0_18 = arith.constant 0 : index
    %c0_19 = arith.constant 0 : index
    %19 = vector.load %arg17[%c0_18, %c0_19] : memref<142x64xf32, #tpu.memory_space<vmem>>, vector<140x64xf32>
    %c0_20 = arith.constant 0 : index
    %c0_21 = arith.constant 0 : index
    %c0_22 = arith.constant 0 : index
    %20 = vector.load %arg4[%c0_20, %c0_21, %c0_22] : memref<3x64x56xf32, #tpu.memory_space<vmem>>, vector<1x64x56xf32>
    %21 = vector.shape_cast %20 : vector<1x64x56xf32> to vector<64x56xf32>
    %cst_23 = arith.constant dense<0.000000e+00> : vector<140x56xf32>
    %22 = tpu.matmul %19, %21, %cst_23 {dimension_numbers = #tpu.dot_dimension_numbers<[1], [0], [0], [1], [0, 0, 1, 1], [], []>} : vector<140x64xf32>, vector<64x56xf32>, vector<140x56xf32> -> vector<140x56xf32>
    %c0_24 = arith.constant 0 : index
    %c0_25 = arith.constant 0 : index
    %23 = vector.load %arg5[%c0_24, %c0_25] : memref<1x56xf32, #tpu.memory_space<vmem>>, vector<1x56xf32>
    %24 = vector.broadcast %23 : vector<1x56xf32> to vector<140x56xf32>
    %25 = arith.addf %22, %24 : vector<140x56xf32>
    %c1_26 = arith.constant 1 : index
    %c0_27 = arith.constant 0 : index
    %26 = vector.load %arg17[%c1_26, %c0_27] : memref<142x64xf32, #tpu.memory_space<vmem>>, vector<140x64xf32>
    %c1_28 = arith.constant 1 : index
    %c0_29 = arith.constant 0 : index
    %c0_30 = arith.constant 0 : index
    %27 = vector.load %arg4[%c1_28, %c0_29, %c0_30] : memref<3x64x56xf32, #tpu.memory_space<vmem>>, vector<1x64x56xf32>
    %28 = vector.shape_cast %27 : vector<1x64x56xf32> to vector<64x56xf32>
    %cst_31 = arith.constant dense<0.000000e+00> : vector<140x56xf32>
    %29 = tpu.matmul %26, %28, %cst_31 {dimension_numbers = #tpu.dot_dimension_numbers<[1], [0], [0], [1], [0, 0, 1, 1], [], []>} : vector<140x64xf32>, vector<64x56xf32>, vector<140x56xf32> -> vector<140x56xf32>
    %30 = arith.addf %25, %29 : vector<140x56xf32>
    %c2_32 = arith.constant 2 : index
    %c0_33 = arith.constant 0 : index
    %31 = vector.load %arg17[%c2_32, %c0_33] : memref<142x64xf32, #tpu.memory_space<vmem>>, vector<140x64xf32>
    %c2_34 = arith.constant 2 : index
    %c0_35 = arith.constant 0 : index
    %c0_36 = arith.constant 0 : index
    %32 = vector.load %arg4[%c2_34, %c0_35, %c0_36] : memref<3x64x56xf32, #tpu.memory_space<vmem>>, vector<1x64x56xf32>
    %33 = vector.shape_cast %32 : vector<1x64x56xf32> to vector<64x56xf32>
    %cst_37 = arith.constant dense<0.000000e+00> : vector<140x56xf32>
    %34 = tpu.matmul %31, %33, %cst_37 {dimension_numbers = #tpu.dot_dimension_numbers<[1], [0], [0], [1], [0, 0, 1, 1], [], []>} : vector<140x64xf32>, vector<64x56xf32>, vector<140x56xf32> -> vector<140x56xf32>
    %35 = arith.addf %30, %34 : vector<140x56xf32>
    %36 = math.tanh %35 : vector<140x56xf32>
    %c0_38 = arith.constant 0 : index
    %c0_39 = arith.constant 0 : index
    %37 = vector.load %arg6[%c0_38, %c0_39] : memref<56x14xf32, #tpu.memory_space<vmem>>, vector<56x14xf32>
    %cst_40 = arith.constant dense<0.000000e+00> : vector<140x14xf32>
    %38 = tpu.matmul %36, %37, %cst_40 {dimension_numbers = #tpu.dot_dimension_numbers<[1], [0], [0], [1], [0, 0, 1, 1], [], []>} : vector<140x56xf32>, vector<56x14xf32>, vector<140x14xf32> -> vector<140x14xf32>
    %c0_41 = arith.constant 0 : index
    %c0_42 = arith.constant 0 : index
    %39 = vector.load %arg7[%c0_41, %c0_42] : memref<1x1xf32, #tpu.memory_space<vmem>>, vector<1x1xf32>
    %40 = vector.broadcast %39 : vector<1x1xf32> to vector<140x14xf32>
    %41 = arith.addf %38, %40 : vector<140x14xf32>
    %cst_43 = arith.constant 0.000000e+00 : f32
    %42 = vector.broadcast %cst_43 : f32 to vector<140x14xf32>
    %43 = arith.subf %42, %41 : vector<140x14xf32>
    %44 = math.exp %43 : vector<140x14xf32>
    %cst_44 = arith.constant 1.000000e+00 : f32
    %45 = vector.broadcast %cst_44 : f32 to vector<140x14xf32>
    %46 = arith.addf %45, %44 : vector<140x14xf32>
    %47 = tpu.reciprocal %46 {approx = true} : vector<140x14xf32> -> vector<140x14xf32>
    %48 = vector.extract_strided_slice %47 {offsets = [0, 0], sizes = [14, 14], strides = [1, 1]} : vector<140x14xf32> to vector<14x14xf32>
    %49 = vector.shape_cast %48 : vector<14x14xf32> to vector<1x14x14xf32>
    %cst_45 = arith.constant dense<0.000000e+00> : vector<1xf32>
    %50 = vector.multi_reduction <add>, %49, %cst_45 [1, 2] : vector<1x14x14xf32> to vector<1xf32>
    %51 = vector.shape_cast %50 : vector<1xf32> to vector<1x1x1xf32>
    %52 = vector.extract %51[0, 0, 0] : f32 from vector<1x1x1xf32>
    %53 = vector.broadcast %52 : f32 to vector<1x1xf32>
    %54 = tpu.reciprocal %53 {approx = true} : vector<1x1xf32> -> vector<1x1xf32>
    %cst_46 = arith.constant 9.800000e+01 : f32
    %55 = vector.broadcast %cst_46 : f32 to vector<1x1xf32>
    %56 = arith.mulf %55, %54 : vector<1x1xf32>
    %57 = vector.broadcast %56 : vector<1x1xf32> to vector<14x14xf32>
    %58 = arith.mulf %48, %57 : vector<14x14xf32>
    %c0_47 = arith.constant 0 : index
    %c0_48 = arith.constant 0 : index
    %59 = vector.load %arg15[%c0_47, %c0_48] : memref<112x14xf32, #tpu.memory_space<vmem>>, vector<14x14xf32>
    tpu.vector_store %arg15[%c0_47, %c0_48], %58 {strides = array<i32>} : memref<112x14xf32, #tpu.memory_space<vmem>>, vector<14x14xf32>,
    %60 = vector.extract_strided_slice %47 {offsets = [18, 0], sizes = [14, 14], strides = [1, 1]} : vector<140x14xf32> to vector<14x14xf32>
    %61 = vector.shape_cast %60 : vector<14x14xf32> to vector<1x14x14xf32>
    %cst_49 = arith.constant dense<0.000000e+00> : vector<1xf32>
    %62 = vector.multi_reduction <add>, %61, %cst_49 [1, 2] : vector<1x14x14xf32> to vector<1xf32>
    %63 = vector.shape_cast %62 : vector<1xf32> to vector<1x1x1xf32>
    %64 = vector.extract %63[0, 0, 0] : f32 from vector<1x1x1xf32>
    %65 = vector.broadcast %64 : f32 to vector<1x1xf32>
    %66 = tpu.reciprocal %65 {approx = true} : vector<1x1xf32> -> vector<1x1xf32>
    %cst_50 = arith.constant 9.800000e+01 : f32
    %67 = vector.broadcast %cst_50 : f32 to vector<1x1xf32>
    %68 = arith.mulf %67, %66 : vector<1x1xf32>
    %69 = vector.broadcast %68 : vector<1x1xf32> to vector<14x14xf32>
    %70 = arith.mulf %60, %69 : vector<14x14xf32>
    %c14 = arith.constant 14 : index
    %c0_51 = arith.constant 0 : index
    %71 = vector.load %arg15[%c14, %c0_51] : memref<112x14xf32, #tpu.memory_space<vmem>>, vector<14x14xf32>
    tpu.vector_store %arg15[%c14, %c0_51], %70 {strides = array<i32>} : memref<112x14xf32, #tpu.memory_space<vmem>>, vector<14x14xf32>,
    %72 = vector.extract_strided_slice %47 {offsets = [36, 0], sizes = [14, 14], strides = [1, 1]} : vector<140x14xf32> to vector<14x14xf32>
    %73 = vector.shape_cast %72 : vector<14x14xf32> to vector<1x14x14xf32>
    %cst_52 = arith.constant dense<0.000000e+00> : vector<1xf32>
    %74 = vector.multi_reduction <add>, %73, %cst_52 [1, 2] : vector<1x14x14xf32> to vector<1xf32>
    %75 = vector.shape_cast %74 : vector<1xf32> to vector<1x1x1xf32>
    %76 = vector.extract %75[0, 0, 0] : f32 from vector<1x1x1xf32>
    %77 = vector.broadcast %76 : f32 to vector<1x1xf32>
    %78 = tpu.reciprocal %77 {approx = true} : vector<1x1xf32> -> vector<1x1xf32>
    %cst_53 = arith.constant 9.800000e+01 : f32
    %79 = vector.broadcast %cst_53 : f32 to vector<1x1xf32>
    %80 = arith.mulf %79, %78 : vector<1x1xf32>
    %81 = vector.broadcast %80 : vector<1x1xf32> to vector<14x14xf32>
    %82 = arith.mulf %72, %81 : vector<14x14xf32>
    %c28 = arith.constant 28 : index
    %c0_54 = arith.constant 0 : index
    %83 = vector.load %arg15[%c28, %c0_54] : memref<112x14xf32, #tpu.memory_space<vmem>>, vector<14x14xf32>
    tpu.vector_store %arg15[%c28, %c0_54], %82 {strides = array<i32>} : memref<112x14xf32, #tpu.memory_space<vmem>>, vector<14x14xf32>,
    %84 = vector.extract_strided_slice %47 {offsets = [54, 0], sizes = [14, 14], strides = [1, 1]} : vector<140x14xf32> to vector<14x14xf32>
    %85 = vector.shape_cast %84 : vector<14x14xf32> to vector<1x14x14xf32>
    %cst_55 = arith.constant dense<0.000000e+00> : vector<1xf32>
    %86 = vector.multi_reduction <add>, %85, %cst_55 [1, 2] : vector<1x14x14xf32> to vector<1xf32>
    %87 = vector.shape_cast %86 : vector<1xf32> to vector<1x1x1xf32>
    %88 = vector.extract %87[0, 0, 0] : f32 from vector<1x1x1xf32>
    %89 = vector.broadcast %88 : f32 to vector<1x1xf32>
    %90 = tpu.reciprocal %89 {approx = true} : vector<1x1xf32> -> vector<1x1xf32>
    %cst_56 = arith.constant 9.800000e+01 : f32
    %91 = vector.broadcast %cst_56 : f32 to vector<1x1xf32>
    %92 = arith.mulf %91, %90 : vector<1x1xf32>
    %93 = vector.broadcast %92 : vector<1x1xf32> to vector<14x14xf32>
    %94 = arith.mulf %84, %93 : vector<14x14xf32>
    %c42 = arith.constant 42 : index
    %c0_57 = arith.constant 0 : index
    %95 = vector.load %arg15[%c42, %c0_57] : memref<112x14xf32, #tpu.memory_space<vmem>>, vector<14x14xf32>
    tpu.vector_store %arg15[%c42, %c0_57], %94 {strides = array<i32>} : memref<112x14xf32, #tpu.memory_space<vmem>>, vector<14x14xf32>,
    %96 = vector.extract_strided_slice %47 {offsets = [72, 0], sizes = [14, 14], strides = [1, 1]} : vector<140x14xf32> to vector<14x14xf32>
    %97 = vector.shape_cast %96 : vector<14x14xf32> to vector<1x14x14xf32>
    %cst_58 = arith.constant dense<0.000000e+00> : vector<1xf32>
    %98 = vector.multi_reduction <add>, %97, %cst_58 [1, 2] : vector<1x14x14xf32> to vector<1xf32>
    %99 = vector.shape_cast %98 : vector<1xf32> to vector<1x1x1xf32>
    %100 = vector.extract %99[0, 0, 0] : f32 from vector<1x1x1xf32>
    %101 = vector.broadcast %100 : f32 to vector<1x1xf32>
    %102 = tpu.reciprocal %101 {approx = true} : vector<1x1xf32> -> vector<1x1xf32>
    %cst_59 = arith.constant 9.800000e+01 : f32
    %103 = vector.broadcast %cst_59 : f32 to vector<1x1xf32>
    %104 = arith.mulf %103, %102 : vector<1x1xf32>
    %105 = vector.broadcast %104 : vector<1x1xf32> to vector<14x14xf32>
    %106 = arith.mulf %96, %105 : vector<14x14xf32>
    %c56 = arith.constant 56 : index
    %c0_60 = arith.constant 0 : index
    %107 = vector.load %arg15[%c56, %c0_60] : memref<112x14xf32, #tpu.memory_space<vmem>>, vector<14x14xf32>
    tpu.vector_store %arg15[%c56, %c0_60], %106 {strides = array<i32>} : memref<112x14xf32, #tpu.memory_space<vmem>>, vector<14x14xf32>,
    %108 = vector.extract_strided_slice %47 {offsets = [90, 0], sizes = [14, 14], strides = [1, 1]} : vector<140x14xf32> to vector<14x14xf32>
    %109 = vector.shape_cast %108 : vector<14x14xf32> to vector<1x14x14xf32>
    %cst_61 = arith.constant dense<0.000000e+00> : vector<1xf32>
    %110 = vector.multi_reduction <add>, %109, %cst_61 [1, 2] : vector<1x14x14xf32> to vector<1xf32>
    %111 = vector.shape_cast %110 : vector<1xf32> to vector<1x1x1xf32>
    %112 = vector.extract %111[0, 0, 0] : f32 from vector<1x1x1xf32>
    %113 = vector.broadcast %112 : f32 to vector<1x1xf32>
    %114 = tpu.reciprocal %113 {approx = true} : vector<1x1xf32> -> vector<1x1xf32>
    %cst_62 = arith.constant 9.800000e+01 : f32
    %115 = vector.broadcast %cst_62 : f32 to vector<1x1xf32>
    %116 = arith.mulf %115, %114 : vector<1x1xf32>
    %117 = vector.broadcast %116 : vector<1x1xf32> to vector<14x14xf32>
    %118 = arith.mulf %108, %117 : vector<14x14xf32>
    %c70 = arith.constant 70 : index
    %c0_63 = arith.constant 0 : index
    %119 = vector.load %arg15[%c70, %c0_63] : memref<112x14xf32, #tpu.memory_space<vmem>>, vector<14x14xf32>
    tpu.vector_store %arg15[%c70, %c0_63], %118 {strides = array<i32>} : memref<112x14xf32, #tpu.memory_space<vmem>>, vector<14x14xf32>,
    %120 = vector.extract_strided_slice %47 {offsets = [108, 0], sizes = [14, 14], strides = [1, 1]} : vector<140x14xf32> to vector<14x14xf32>
    %121 = vector.shape_cast %120 : vector<14x14xf32> to vector<1x14x14xf32>
    %cst_64 = arith.constant dense<0.000000e+00> : vector<1xf32>
    %122 = vector.multi_reduction <add>, %121, %cst_64 [1, 2] : vector<1x14x14xf32> to vector<1xf32>
    %123 = vector.shape_cast %122 : vector<1xf32> to vector<1x1x1xf32>
    %124 = vector.extract %123[0, 0, 0] : f32 from vector<1x1x1xf32>
    %125 = vector.broadcast %124 : f32 to vector<1x1xf32>
    %126 = tpu.reciprocal %125 {approx = true} : vector<1x1xf32> -> vector<1x1xf32>
    %cst_65 = arith.constant 9.800000e+01 : f32
    %127 = vector.broadcast %cst_65 : f32 to vector<1x1xf32>
    %128 = arith.mulf %127, %126 : vector<1x1xf32>
    %129 = vector.broadcast %128 : vector<1x1xf32> to vector<14x14xf32>
    %130 = arith.mulf %120, %129 : vector<14x14xf32>
    %c84 = arith.constant 84 : index
    %c0_66 = arith.constant 0 : index
    %131 = vector.load %arg15[%c84, %c0_66] : memref<112x14xf32, #tpu.memory_space<vmem>>, vector<14x14xf32>
    tpu.vector_store %arg15[%c84, %c0_66], %130 {strides = array<i32>} : memref<112x14xf32, #tpu.memory_space<vmem>>, vector<14x14xf32>,
    %132 = vector.extract_strided_slice %47 {offsets = [126, 0], sizes = [14, 14], strides = [1, 1]} : vector<140x14xf32> to vector<14x14xf32>
    %133 = vector.shape_cast %132 : vector<14x14xf32> to vector<1x14x14xf32>
    %cst_67 = arith.constant dense<0.000000e+00> : vector<1xf32>
    %134 = vector.multi_reduction <add>, %133, %cst_67 [1, 2] : vector<1x14x14xf32> to vector<1xf32>
    %135 = vector.shape_cast %134 : vector<1xf32> to vector<1x1x1xf32>
    %136 = vector.extract %135[0, 0, 0] : f32 from vector<1x1x1xf32>
    %137 = vector.broadcast %136 : f32 to vector<1x1xf32>
    %138 = tpu.reciprocal %137 {approx = true} : vector<1x1xf32> -> vector<1x1xf32>
    %cst_68 = arith.constant 9.800000e+01 : f32
    %139 = vector.broadcast %cst_68 : f32 to vector<1x1xf32>
    %140 = arith.mulf %139, %138 : vector<1x1xf32>
    %141 = vector.broadcast %140 : vector<1x1xf32> to vector<14x14xf32>
    %142 = arith.mulf %132, %141 : vector<14x14xf32>
    %c98 = arith.constant 98 : index
    %c0_69 = arith.constant 0 : index
    %143 = vector.load %arg15[%c98, %c0_69] : memref<112x14xf32, #tpu.memory_space<vmem>>, vector<14x14xf32>
    tpu.vector_store %arg15[%c98, %c0_69], %142 {strides = array<i32>} : memref<112x14xf32, #tpu.memory_space<vmem>>, vector<14x14xf32>,
    %c0_70 = arith.constant 0 : index
    %c0_71 = arith.constant 0 : index
    %144 = vector.load %arg8[%c0_70, %c0_71] : memref<72x140xf32, #tpu.memory_space<vmem>>, vector<72x140xf32>
    %cst_72 = arith.constant dense<0.000000e+00> : vector<72x56xf32>
    %145 = tpu.matmul %144, %36, %cst_72 {dimension_numbers = #tpu.dot_dimension_numbers<[1], [0], [0], [1], [0, 0, 1, 1], [], []>} : vector<72x140xf32>, vector<140x56xf32>, vector<72x56xf32> -> vector<72x56xf32>
    %c0_73 = arith.constant 0 : index
    %c0_74 = arith.constant 0 : index
    %146 = vector.load %arg18[%c0_73, %c0_74] : memref<72x56xf32, #tpu.memory_space<vmem>>, vector<72x56xf32>
    tpu.vector_store %arg18[%c0_73, %c0_74], %145 {strides = array<i32>} : memref<72x56xf32, #tpu.memory_space<vmem>>, vector<72x56xf32>,
    %c0_75 = arith.constant 0 : index
    %c0_76 = arith.constant 0 : index
    %147 = vector.load %arg18[%c0_75, %c0_76] : memref<72x56xf32, #tpu.memory_space<vmem>>, vector<70x56xf32>
    %c0_77 = arith.constant 0 : index
    %c0_78 = arith.constant 0 : index
    %c0_79 = arith.constant 0 : index
    %148 = vector.load %arg9[%c0_77, %c0_78, %c0_79] : memref<3x56x56xf32, #tpu.memory_space<vmem>>, vector<1x56x56xf32>
    %149 = vector.shape_cast %148 : vector<1x56x56xf32> to vector<56x56xf32>
    %cst_80 = arith.constant dense<0.000000e+00> : vector<70x56xf32>
    %150 = tpu.matmul %147, %149, %cst_80 {dimension_numbers = #tpu.dot_dimension_numbers<[1], [0], [0], [1], [0, 0, 1, 1], [], []>} : vector<70x56xf32>, vector<56x56xf32>, vector<70x56xf32> -> vector<70x56xf32>
    %c0_81 = arith.constant 0 : index
    %c0_82 = arith.constant 0 : index
    %151 = vector.load %arg10[%c0_81, %c0_82] : memref<1x56xf32, #tpu.memory_space<vmem>>, vector<1x56xf32>
    %152 = vector.broadcast %151 : vector<1x56xf32> to vector<70x56xf32>
    %153 = arith.addf %150, %152 : vector<70x56xf32>
    %c1_83 = arith.constant 1 : index
    %c0_84 = arith.constant 0 : index
    %154 = vector.load %arg18[%c1_83, %c0_84] : memref<72x56xf32, #tpu.memory_space<vmem>>, vector<70x56xf32>
    %c1_85 = arith.constant 1 : index
    %c0_86 = arith.constant 0 : index
    %c0_87 = arith.constant 0 : index
    %155 = vector.load %arg9[%c1_85, %c0_86, %c0_87] : memref<3x56x56xf32, #tpu.memory_space<vmem>>, vector<1x56x56xf32>
    %156 = vector.shape_cast %155 : vector<1x56x56xf32> to vector<56x56xf32>
    %cst_88 = arith.constant dense<0.000000e+00> : vector<70x56xf32>
    %157 = tpu.matmul %154, %156, %cst_88 {dimension_numbers = #tpu.dot_dimension_numbers<[1], [0], [0], [1], [0, 0, 1, 1], [], []>} : vector<70x56xf32>, vector<56x56xf32>, vector<70x56xf32> -> vector<70x56xf32>
    %158 = arith.addf %153, %157 : vector<70x56xf32>
    %c2_89 = arith.constant 2 : index
    %c0_90 = arith.constant 0 : index
    %159 = vector.load %arg18[%c2_89, %c0_90] : memref<72x56xf32, #tpu.memory_space<vmem>>, vector<70x56xf32>
    %c2_91 = arith.constant 2 : index
    %c0_92 = arith.constant 0 : index
    %c0_93 = arith.constant 0 : index
    %160 = vector.load %arg9[%c2_91, %c0_92, %c0_93] : memref<3x56x56xf32, #tpu.memory_space<vmem>>, vector<1x56x56xf32>
    %161 = vector.shape_cast %160 : vector<1x56x56xf32> to vector<56x56xf32>
    %cst_94 = arith.constant dense<0.000000e+00> : vector<70x56xf32>
    %162 = tpu.matmul %159, %161, %cst_94 {dimension_numbers = #tpu.dot_dimension_numbers<[1], [0], [0], [1], [0, 0, 1, 1], [], []>} : vector<70x56xf32>, vector<56x56xf32>, vector<70x56xf32> -> vector<70x56xf32>
    %163 = arith.addf %158, %162 : vector<70x56xf32>
    %164 = math.tanh %163 : vector<70x56xf32>
    %c0_95 = arith.constant 0 : index
    %c0_96 = arith.constant 0 : index
    %165 = vector.load %arg19[%c0_95, %c0_96] : memref<70x56xf32, #tpu.memory_space<vmem>>, vector<70x56xf32>
    tpu.vector_store %arg19[%c0_95, %c0_96], %164 {strides = array<i32>} : memref<70x56xf32, #tpu.memory_space<vmem>>, vector<70x56xf32>,
    %c0_97 = arith.constant 0 : index
    %c0_98 = arith.constant 0 : index
    %166 = vector.load %arg19[%c0_97, %c0_98] : memref<70x56xf32, #tpu.memory_space<vmem>>, vector<68x56xf32>
    %c0_99 = arith.constant 0 : index
    %c0_100 = arith.constant 0 : index
    %c0_101 = arith.constant 0 : index
    %167 = vector.load %arg11[%c0_99, %c0_100, %c0_101] : memref<3x56x40xf32, #tpu.memory_space<vmem>>, vector<1x56x40xf32>
    %168 = vector.shape_cast %167 : vector<1x56x40xf32> to vector<56x40xf32>
    %cst_102 = arith.constant dense<0.000000e+00> : vector<68x40xf32>
    %169 = tpu.matmul %166, %168, %cst_102 {dimension_numbers = #tpu.dot_dimension_numbers<[1], [0], [0], [1], [0, 0, 1, 1], [], []>} : vector<68x56xf32>, vector<56x40xf32>, vector<68x40xf32> -> vector<68x40xf32>
    %c0_103 = arith.constant 0 : index
    %c0_104 = arith.constant 0 : index
    %170 = vector.load %arg12[%c0_103, %c0_104] : memref<1x40xf32, #tpu.memory_space<vmem>>, vector<1x40xf32>
    %171 = vector.broadcast %170 : vector<1x40xf32> to vector<68x40xf32>
    %172 = arith.addf %169, %171 : vector<68x40xf32>
    %c1_105 = arith.constant 1 : index
    %c0_106 = arith.constant 0 : index
    %173 = vector.load %arg19[%c1_105, %c0_106] : memref<70x56xf32, #tpu.memory_space<vmem>>, vector<68x56xf32>
    %c1_107 = arith.constant 1 : index
    %c0_108 = arith.constant 0 : index
    %c0_109 = arith.constant 0 : index
    %174 = vector.load %arg11[%c1_107, %c0_108, %c0_109] : memref<3x56x40xf32, #tpu.memory_space<vmem>>, vector<1x56x40xf32>
    %175 = vector.shape_cast %174 : vector<1x56x40xf32> to vector<56x40xf32>
    %cst_110 = arith.constant dense<0.000000e+00> : vector<68x40xf32>
    %176 = tpu.matmul %173, %175, %cst_110 {dimension_numbers = #tpu.dot_dimension_numbers<[1], [0], [0], [1], [0, 0, 1, 1], [], []>} : vector<68x56xf32>, vector<56x40xf32>, vector<68x40xf32> -> vector<68x40xf32>
    %177 = arith.addf %172, %176 : vector<68x40xf32>
    %c2_111 = arith.constant 2 : index
    %c0_112 = arith.constant 0 : index
    %178 = vector.load %arg19[%c2_111, %c0_112] : memref<70x56xf32, #tpu.memory_space<vmem>>, vector<68x56xf32>
    %c2_113 = arith.constant 2 : index
    %c0_114 = arith.constant 0 : index
    %c0_115 = arith.constant 0 : index
    %179 = vector.load %arg11[%c2_113, %c0_114, %c0_115] : memref<3x56x40xf32, #tpu.memory_space<vmem>>, vector<1x56x40xf32>
    %180 = vector.shape_cast %179 : vector<1x56x40xf32> to vector<56x40xf32>
    %cst_116 = arith.constant dense<0.000000e+00> : vector<68x40xf32>
    %181 = tpu.matmul %178, %180, %cst_116 {dimension_numbers = #tpu.dot_dimension_numbers<[1], [0], [0], [1], [0, 0, 1, 1], [], []>} : vector<68x56xf32>, vector<56x40xf32>, vector<68x40xf32> -> vector<68x40xf32>
    %182 = arith.addf %177, %181 : vector<68x40xf32>
    %183 = math.tanh %182 : vector<68x40xf32>
    %c0_117 = arith.constant 0 : index
    %c0_118 = arith.constant 0 : index
    %184 = vector.load %arg13[%c0_117, %c0_118] : memref<40x5xf32, #tpu.memory_space<vmem>>, vector<40x5xf32>
    %cst_119 = arith.constant dense<0.000000e+00> : vector<68x5xf32>
    %185 = tpu.matmul %183, %184, %cst_119 {dimension_numbers = #tpu.dot_dimension_numbers<[1], [0], [0], [1], [0, 0, 1, 1], [], []>} : vector<68x40xf32>, vector<40x5xf32>, vector<68x5xf32> -> vector<68x5xf32>
    %c0_120 = arith.constant 0 : index
    %c0_121 = arith.constant 0 : index
    %186 = vector.load %arg14[%c0_120, %c0_121] : memref<1x1xf32, #tpu.memory_space<vmem>>, vector<1x1xf32>
    %187 = vector.broadcast %186 : vector<1x1xf32> to vector<68x5xf32>
    %188 = arith.addf %185, %187 : vector<68x5xf32>
    %cst_122 = arith.constant 0.000000e+00 : f32
    %189 = vector.broadcast %cst_122 : f32 to vector<68x5xf32>
    %190 = arith.subf %189, %188 : vector<68x5xf32>
    %191 = math.exp %190 : vector<68x5xf32>
    %cst_123 = arith.constant 1.000000e+00 : f32
    %192 = vector.broadcast %cst_123 : f32 to vector<68x5xf32>
    %193 = arith.addf %192, %191 : vector<68x5xf32>
    %194 = tpu.reciprocal %193 {approx = true} : vector<68x5xf32> -> vector<68x5xf32>
    %195 = vector.extract_strided_slice %194 {offsets = [0, 0], sizes = [5, 5], strides = [1, 1]} : vector<68x5xf32> to vector<5x5xf32>
    %196 = vector.shape_cast %195 : vector<5x5xf32> to vector<1x5x5xf32>
    %cst_124 = arith.constant dense<0.000000e+00> : vector<1xf32>
    %197 = vector.multi_reduction <add>, %196, %cst_124 [1, 2] : vector<1x5x5xf32> to vector<1xf32>
    %198 = vector.shape_cast %197 : vector<1xf32> to vector<1x1x1xf32>
    %199 = vector.extract %198[0, 0, 0] : f32 from vector<1x1x1xf32>
    %200 = vector.broadcast %199 : f32 to vector<1x1xf32>
    %201 = tpu.reciprocal %200 {approx = true} : vector<1x1xf32> -> vector<1x1xf32>
    %cst_125 = arith.constant 1.250000e+01 : f32
    %202 = vector.broadcast %cst_125 : f32 to vector<1x1xf32>
    %203 = arith.mulf %202, %201 : vector<1x1xf32>
    %204 = vector.broadcast %203 : vector<1x1xf32> to vector<5x5xf32>
    %205 = arith.mulf %195, %204 : vector<5x5xf32>
    %c0_126 = arith.constant 0 : index
    %c0_127 = arith.constant 0 : index
    %206 = vector.load %arg16[%c0_126, %c0_127] : memref<40x5xf32, #tpu.memory_space<vmem>>, vector<5x5xf32>
    tpu.vector_store %arg16[%c0_126, %c0_127], %205 {strides = array<i32>} : memref<40x5xf32, #tpu.memory_space<vmem>>, vector<5x5xf32>,
    %207 = vector.extract_strided_slice %194 {offsets = [9, 0], sizes = [5, 5], strides = [1, 1]} : vector<68x5xf32> to vector<5x5xf32>
    %208 = vector.shape_cast %207 : vector<5x5xf32> to vector<1x5x5xf32>
    %cst_128 = arith.constant dense<0.000000e+00> : vector<1xf32>
    %209 = vector.multi_reduction <add>, %208, %cst_128 [1, 2] : vector<1x5x5xf32> to vector<1xf32>
    %210 = vector.shape_cast %209 : vector<1xf32> to vector<1x1x1xf32>
    %211 = vector.extract %210[0, 0, 0] : f32 from vector<1x1x1xf32>
    %212 = vector.broadcast %211 : f32 to vector<1x1xf32>
    %213 = tpu.reciprocal %212 {approx = true} : vector<1x1xf32> -> vector<1x1xf32>
    %cst_129 = arith.constant 1.250000e+01 : f32
    %214 = vector.broadcast %cst_129 : f32 to vector<1x1xf32>
    %215 = arith.mulf %214, %213 : vector<1x1xf32>
    %216 = vector.broadcast %215 : vector<1x1xf32> to vector<5x5xf32>
    %217 = arith.mulf %207, %216 : vector<5x5xf32>
    %c5 = arith.constant 5 : index
    %c0_130 = arith.constant 0 : index
    %218 = vector.load %arg16[%c5, %c0_130] : memref<40x5xf32, #tpu.memory_space<vmem>>, vector<5x5xf32>
    tpu.vector_store %arg16[%c5, %c0_130], %217 {strides = array<i32>} : memref<40x5xf32, #tpu.memory_space<vmem>>, vector<5x5xf32>,
    %219 = vector.extract_strided_slice %194 {offsets = [18, 0], sizes = [5, 5], strides = [1, 1]} : vector<68x5xf32> to vector<5x5xf32>
    %220 = vector.shape_cast %219 : vector<5x5xf32> to vector<1x5x5xf32>
    %cst_131 = arith.constant dense<0.000000e+00> : vector<1xf32>
    %221 = vector.multi_reduction <add>, %220, %cst_131 [1, 2] : vector<1x5x5xf32> to vector<1xf32>
    %222 = vector.shape_cast %221 : vector<1xf32> to vector<1x1x1xf32>
    %223 = vector.extract %222[0, 0, 0] : f32 from vector<1x1x1xf32>
    %224 = vector.broadcast %223 : f32 to vector<1x1xf32>
    %225 = tpu.reciprocal %224 {approx = true} : vector<1x1xf32> -> vector<1x1xf32>
    %cst_132 = arith.constant 1.250000e+01 : f32
    %226 = vector.broadcast %cst_132 : f32 to vector<1x1xf32>
    %227 = arith.mulf %226, %225 : vector<1x1xf32>
    %228 = vector.broadcast %227 : vector<1x1xf32> to vector<5x5xf32>
    %229 = arith.mulf %219, %228 : vector<5x5xf32>
    %c10 = arith.constant 10 : index
    %c0_133 = arith.constant 0 : index
    %230 = vector.load %arg16[%c10, %c0_133] : memref<40x5xf32, #tpu.memory_space<vmem>>, vector<5x5xf32>
    tpu.vector_store %arg16[%c10, %c0_133], %229 {strides = array<i32>} : memref<40x5xf32, #tpu.memory_space<vmem>>, vector<5x5xf32>,
    %231 = vector.extract_strided_slice %194 {offsets = [27, 0], sizes = [5, 5], strides = [1, 1]} : vector<68x5xf32> to vector<5x5xf32>
    %232 = vector.shape_cast %231 : vector<5x5xf32> to vector<1x5x5xf32>
    %cst_134 = arith.constant dense<0.000000e+00> : vector<1xf32>
    %233 = vector.multi_reduction <add>, %232, %cst_134 [1, 2] : vector<1x5x5xf32> to vector<1xf32>
    %234 = vector.shape_cast %233 : vector<1xf32> to vector<1x1x1xf32>
    %235 = vector.extract %234[0, 0, 0] : f32 from vector<1x1x1xf32>
    %236 = vector.broadcast %235 : f32 to vector<1x1xf32>
    %237 = tpu.reciprocal %236 {approx = true} : vector<1x1xf32> -> vector<1x1xf32>
    %cst_135 = arith.constant 1.250000e+01 : f32
    %238 = vector.broadcast %cst_135 : f32 to vector<1x1xf32>
    %239 = arith.mulf %238, %237 : vector<1x1xf32>
    %240 = vector.broadcast %239 : vector<1x1xf32> to vector<5x5xf32>
    %241 = arith.mulf %231, %240 : vector<5x5xf32>
    %c15 = arith.constant 15 : index
    %c0_136 = arith.constant 0 : index
    %242 = vector.load %arg16[%c15, %c0_136] : memref<40x5xf32, #tpu.memory_space<vmem>>, vector<5x5xf32>
    tpu.vector_store %arg16[%c15, %c0_136], %241 {strides = array<i32>} : memref<40x5xf32, #tpu.memory_space<vmem>>, vector<5x5xf32>,
    %243 = vector.extract_strided_slice %194 {offsets = [36, 0], sizes = [5, 5], strides = [1, 1]} : vector<68x5xf32> to vector<5x5xf32>
    %244 = vector.shape_cast %243 : vector<5x5xf32> to vector<1x5x5xf32>
    %cst_137 = arith.constant dense<0.000000e+00> : vector<1xf32>
    %245 = vector.multi_reduction <add>, %244, %cst_137 [1, 2] : vector<1x5x5xf32> to vector<1xf32>
    %246 = vector.shape_cast %245 : vector<1xf32> to vector<1x1x1xf32>
    %247 = vector.extract %246[0, 0, 0] : f32 from vector<1x1x1xf32>
    %248 = vector.broadcast %247 : f32 to vector<1x1xf32>
    %249 = tpu.reciprocal %248 {approx = true} : vector<1x1xf32> -> vector<1x1xf32>
    %cst_138 = arith.constant 1.250000e+01 : f32
    %250 = vector.broadcast %cst_138 : f32 to vector<1x1xf32>
    %251 = arith.mulf %250, %249 : vector<1x1xf32>
    %252 = vector.broadcast %251 : vector<1x1xf32> to vector<5x5xf32>
    %253 = arith.mulf %243, %252 : vector<5x5xf32>
    %c20 = arith.constant 20 : index
    %c0_139 = arith.constant 0 : index
    %254 = vector.load %arg16[%c20, %c0_139] : memref<40x5xf32, #tpu.memory_space<vmem>>, vector<5x5xf32>
    tpu.vector_store %arg16[%c20, %c0_139], %253 {strides = array<i32>} : memref<40x5xf32, #tpu.memory_space<vmem>>, vector<5x5xf32>,
    %255 = vector.extract_strided_slice %194 {offsets = [45, 0], sizes = [5, 5], strides = [1, 1]} : vector<68x5xf32> to vector<5x5xf32>
    %256 = vector.shape_cast %255 : vector<5x5xf32> to vector<1x5x5xf32>
    %cst_140 = arith.constant dense<0.000000e+00> : vector<1xf32>
    %257 = vector.multi_reduction <add>, %256, %cst_140 [1, 2] : vector<1x5x5xf32> to vector<1xf32>
    %258 = vector.shape_cast %257 : vector<1xf32> to vector<1x1x1xf32>
    %259 = vector.extract %258[0, 0, 0] : f32 from vector<1x1x1xf32>
    %260 = vector.broadcast %259 : f32 to vector<1x1xf32>
    %261 = tpu.reciprocal %260 {approx = true} : vector<1x1xf32> -> vector<1x1xf32>
    %cst_141 = arith.constant 1.250000e+01 : f32
    %262 = vector.broadcast %cst_141 : f32 to vector<1x1xf32>
    %263 = arith.mulf %262, %261 : vector<1x1xf32>
    %264 = vector.broadcast %263 : vector<1x1xf32> to vector<5x5xf32>
    %265 = arith.mulf %255, %264 : vector<5x5xf32>
    %c25 = arith.constant 25 : index
    %c0_142 = arith.constant 0 : index
    %266 = vector.load %arg16[%c25, %c0_142] : memref<40x5xf32, #tpu.memory_space<vmem>>, vector<5x5xf32>
    tpu.vector_store %arg16[%c25, %c0_142], %265 {strides = array<i32>} : memref<40x5xf32, #tpu.memory_space<vmem>>, vector<5x5xf32>,
    %267 = vector.extract_strided_slice %194 {offsets = [54, 0], sizes = [5, 5], strides = [1, 1]} : vector<68x5xf32> to vector<5x5xf32>
    %268 = vector.shape_cast %267 : vector<5x5xf32> to vector<1x5x5xf32>
    %cst_143 = arith.constant dense<0.000000e+00> : vector<1xf32>
    %269 = vector.multi_reduction <add>, %268, %cst_143 [1, 2] : vector<1x5x5xf32> to vector<1xf32>
    %270 = vector.shape_cast %269 : vector<1xf32> to vector<1x1x1xf32>
    %271 = vector.extract %270[0, 0, 0] : f32 from vector<1x1x1xf32>
    %272 = vector.broadcast %271 : f32 to vector<1x1xf32>
    %273 = tpu.reciprocal %272 {approx = true} : vector<1x1xf32> -> vector<1x1xf32>
    %cst_144 = arith.constant 1.250000e+01 : f32
    %274 = vector.broadcast %cst_144 : f32 to vector<1x1xf32>
    %275 = arith.mulf %274, %273 : vector<1x1xf32>
    %276 = vector.broadcast %275 : vector<1x1xf32> to vector<5x5xf32>
    %277 = arith.mulf %267, %276 : vector<5x5xf32>
    %c30 = arith.constant 30 : index
    %c0_145 = arith.constant 0 : index
    %278 = vector.load %arg16[%c30, %c0_145] : memref<40x5xf32, #tpu.memory_space<vmem>>, vector<5x5xf32>
    tpu.vector_store %arg16[%c30, %c0_145], %277 {strides = array<i32>} : memref<40x5xf32, #tpu.memory_space<vmem>>, vector<5x5xf32>,
    %279 = vector.extract_strided_slice %194 {offsets = [63, 0], sizes = [5, 5], strides = [1, 1]} : vector<68x5xf32> to vector<5x5xf32>
    %280 = vector.shape_cast %279 : vector<5x5xf32> to vector<1x5x5xf32>
    %cst_146 = arith.constant dense<0.000000e+00> : vector<1xf32>
    %281 = vector.multi_reduction <add>, %280, %cst_146 [1, 2] : vector<1x5x5xf32> to vector<1xf32>
    %282 = vector.shape_cast %281 : vector<1xf32> to vector<1x1x1xf32>
    %283 = vector.extract %282[0, 0, 0] : f32 from vector<1x1x1xf32>
    %284 = vector.broadcast %283 : f32 to vector<1x1xf32>
    %285 = tpu.reciprocal %284 {approx = true} : vector<1x1xf32> -> vector<1x1xf32>
    %cst_147 = arith.constant 1.250000e+01 : f32
    %286 = vector.broadcast %cst_147 : f32 to vector<1x1xf32>
    %287 = arith.mulf %286, %285 : vector<1x1xf32>
    %288 = vector.broadcast %287 : vector<1x1xf32> to vector<5x5xf32>
    %289 = arith.mulf %279, %288 : vector<5x5xf32>
    %c35 = arith.constant 35 : index
    %c0_148 = arith.constant 0 : index
    %290 = vector.load %arg16[%c35, %c0_148] : memref<40x5xf32, #tpu.memory_space<vmem>>, vector<5x5xf32>
    tpu.vector_store %arg16[%c35, %c0_148], %289 {strides = array<i32>} : memref<40x5xf32, #tpu.memory_space<vmem>>, vector<5x5xf32>,
    return
  }
  func.func @transform_0(%arg0: i32) -> (i32, i32) {
    %c0_i32 = arith.constant 0 : i32
    %c0_i32_0 = arith.constant 0 : i32
    return %arg0, %c0_i32 : i32, i32
  }
  func.func @transform_1(%arg0: i32) -> (i32, i32, i32) {
    %c0_i32 = arith.constant 0 : i32
    %c0_i32_0 = arith.constant 0 : i32
    %c0_i32_1 = arith.constant 0 : i32
    %c0_i32_2 = arith.constant 0 : i32
    return %c0_i32, %c0_i32_0, %c0_i32_1 : i32, i32, i32
  }
  func.func @transform_2(%arg0: i32) -> (i32, i32) {
    %c0_i32 = arith.constant 0 : i32
    %c0_i32_0 = arith.constant 0 : i32
    %c0_i32_1 = arith.constant 0 : i32
    return %c0_i32, %c0_i32_0 : i32, i32
  }
  func.func @transform_3(%arg0: i32) -> (i32, i32, i32) {
    %c0_i32 = arith.constant 0 : i32
    %c0_i32_0 = arith.constant 0 : i32
    %c0_i32_1 = arith.constant 0 : i32
    %c0_i32_2 = arith.constant 0 : i32
    return %c0_i32, %c0_i32_0, %c0_i32_1 : i32, i32, i32
  }
  func.func @transform_4(%arg0: i32) -> (i32, i32) {
    %c0_i32 = arith.constant 0 : i32
    %c0_i32_0 = arith.constant 0 : i32
    %c0_i32_1 = arith.constant 0 : i32
    return %c0_i32, %c0_i32_0 : i32, i32
  }
  func.func @transform_5(%arg0: i32) -> (i32, i32) {
    %c0_i32 = arith.constant 0 : i32
    %c0_i32_0 = arith.constant 0 : i32
    %c0_i32_1 = arith.constant 0 : i32
    return %c0_i32, %c0_i32_0 : i32, i32
  }
  func.func @transform_6(%arg0: i32) -> (i32, i32) {
    %c0_i32 = arith.constant 0 : i32
    %c0_i32_0 = arith.constant 0 : i32
    %c0_i32_1 = arith.constant 0 : i32
    return %c0_i32, %c0_i32_0 : i32, i32
  }
  func.func @transform_7(%arg0: i32) -> (i32, i32) {
    %c0_i32 = arith.constant 0 : i32
    %c0_i32_0 = arith.constant 0 : i32
    %c0_i32_1 = arith.constant 0 : i32
    return %c0_i32, %c0_i32_0 : i32, i32
  }
  func.func @transform_8(%arg0: i32) -> (i32, i32, i32) {
    %c0_i32 = arith.constant 0 : i32
    %c0_i32_0 = arith.constant 0 : i32
    %c0_i32_1 = arith.constant 0 : i32
    %c0_i32_2 = arith.constant 0 : i32
    return %c0_i32, %c0_i32_0, %c0_i32_1 : i32, i32, i32
  }
  func.func @transform_9(%arg0: i32) -> (i32, i32) {
    %c0_i32 = arith.constant 0 : i32
    %c0_i32_0 = arith.constant 0 : i32
    %c0_i32_1 = arith.constant 0 : i32
    return %c0_i32, %c0_i32_0 : i32, i32
  }
  func.func @transform_10(%arg0: i32) -> (i32, i32, i32) {
    %c0_i32 = arith.constant 0 : i32
    %c0_i32_0 = arith.constant 0 : i32
    %c0_i32_1 = arith.constant 0 : i32
    %c0_i32_2 = arith.constant 0 : i32
    return %c0_i32, %c0_i32_0, %c0_i32_1 : i32, i32, i32
  }
  func.func @transform_11(%arg0: i32) -> (i32, i32) {
    %c0_i32 = arith.constant 0 : i32
    %c0_i32_0 = arith.constant 0 : i32
    %c0_i32_1 = arith.constant 0 : i32
    return %c0_i32, %c0_i32_0 : i32, i32
  }
  func.func @transform_12(%arg0: i32) -> (i32, i32) {
    %c0_i32 = arith.constant 0 : i32
    %c0_i32_0 = arith.constant 0 : i32
    %c0_i32_1 = arith.constant 0 : i32
    return %c0_i32, %c0_i32_0 : i32, i32
  }
  func.func @transform_13(%arg0: i32) -> (i32, i32) {
    %c0_i32 = arith.constant 0 : i32
    %c0_i32_0 = arith.constant 0 : i32
    %c0_i32_1 = arith.constant 0 : i32
    return %c0_i32, %c0_i32_0 : i32, i32
  }
  func.func @transform_14(%arg0: i32) -> (i32, i32) {
    %c0_i32 = arith.constant 0 : i32
    %c0_i32_0 = arith.constant 0 : i32
    return %arg0, %c0_i32 : i32, i32
  }
  func.func @transform_15(%arg0: i32) -> (i32, i32) {
    %c0_i32 = arith.constant 0 : i32
    %c0_i32_0 = arith.constant 0 : i32
    return %arg0, %c0_i32 : i32, i32
  }
}

</mosaic_0001>

<bundles_post_ra>
// kernel: appearance_forward.1
= control target key start
LH: loop header
LB: loop body
LE: loop exit
PB: predicated region body
PF: predicated region fallthrough
CT: control target
= control target key end

     0   :  { %vm137_vm0 = vcmask 1045504   ;;  %vm82_vm1 = vcmask 441344   ;;  %vm574_vm2 = vcmask 523264   ;;  %vm592_vm3 = vcmask 521216   ;;  %s4493_s1 = inlined_call_operand.vmem [shape: f32[3,54,64], index: 1, kind: input, shape index: {}]   ;;  %s4494_s0 = inlined_call_operand.vmem [shape: f32[144,54], index: 0, kind: input, shape index: {}]   ;;  %s4495_s2 = inlined_call_operand.vmem [shape: f32[1,64], index: 2, kind: input, shape index: {}]   ;;  %s4496_s3 = inlined_call_operand.vmem [shape: f32[3,64,56], index: 3, kind: input, shape index: {}]   ;;  %s4497_s4 = inlined_call_operand.vmem [shape: f32[1,56], index: 4, kind: input, shape index: {}]   ;;  %s4498_s5 = inlined_call_operand.vmem [shape: f32[56,14], index: 5, kind: input, shape index: {}]   ;;  %s4499_s6 = inlined_call_operand.<no memory space> [shape: f32[1,1], index: 6, kind: input, shape index: {}]   ;;  %s4500_s7 = inlined_call_operand.vmem [shape: f32[72,140], index: 7, kind: input, shape index: {}]   ;;  %s4501_s13 = inlined_call_operand.<no memory space> [shape: f32[1,1], index: 13, kind: input, shape index: {}]   ;;  %s4502_s8 = inlined_call_operand.vmem [shape: f32[3,56,56], index: 8, kind: input, shape index: {}]   ;;  %s4503_s14 = inlined_call_operand.vmem [shape: f32[112,14], index: 14, kind: output, shape index: {0}]   ;;  %s4504_s9 = inlined_call_operand.vmem [shape: f32[1,56], index: 9, kind: input, shape index: {}]   ;;  %s4505_s11 = inlined_call_operand.vmem [shape: f32[1,40], index: 11, kind: input, shape index: {}]   ;;  %s4506_s10 = inlined_call_operand.vmem [shape: f32[3,56,40], index: 10, kind: input, shape index: {}]   ;;  %s4507_s12 = inlined_call_operand.vmem [shape: f32[40,5], index: 12, kind: input, shape index: {}]   ;;  %s4508_s15 = inlined_call_operand.vmem [shape: f32[40,5], index: 15, kind: output, shape index: {1}]  }
   0x1   :  { %v3263_v0 = vld [vmem:[%s4493_s1 + $0xa0] sm:$0x3f]  ;;  %v77_v1 = vld [vmem:[%s4493_s1 + $0x30] sm:$0x3f]  ;;  %v3271_v2 = vld [vmem:[%s4493_s1 + $0x98] sm:$0xff]  ;;  %vm1121_vm4 = vcmask 457728  }
   0x2   :  { %2662 = vmatpush.msk.msra.mxu2 %vm137_vm0, %v3263_v0  ;;  %2610 = vmatpush.msk.msra.mxu0 %vm137_vm0, %v77_v1  ;;  %v76_v3 = vld [vmem:[%s4493_s1 + $0x28] sm:$0xff]  ;;  %v3286_v5 = vld [vmem:[%s4493_s1 + $0x90] sm:$0xff]  ;;  %v75_v6 = vld [vmem:[%s4493_s1 + $0x20] sm:$0xff]  ;;  %vm1388_vm5 = vcmask 1043456   ;;  %vm1337_vm6 = vcmask 113664   ;;  %vm1339_vm7 = vcmask 111616  }
   0x3   :  { %v2635_v4 = vld [vmem:[%s4493_s1 + $0x68] sm:$0x3f]  ;;  %v2634_v7 = vld [vmem:[%s4493_s1 + $0x60] sm:$0xff]  ;;  %2870 = vmatpush.msk.msra.mxu3 %vm137_vm0, %v77_v1  ;;  %v2633_v8 = vld [vmem:[%s4493_s1 + $0x58] sm:$0xff]  ;;  %vm1421_vm8 = vcmask 1041408   ;;  %vm1576_vm9 = vcmask 97280  }
   0x4   :  { %2636 = vmatpush.msk.msra.mxu1 %vm137_vm0, %v2635_v4  ;;  %477 = vmatpush.msra.mxu2 %v3271_v2  ;;  %v3302_v9 = vld [vmem:[%s4493_s1 + $0x88] sm:$0xff]  ;;  %v74_v10 = vld [vmem:[%s4493_s1 + $0x18] sm:$0xff]  ;;  %v2632_v11 = vld [vmem:[%s4493_s1 + $0x50] sm:$0xff]  ;;  %vm1382_vm10 = vcmask 113666   ;;  %vm1414_vm11 = vcmask 113668   ;;  %vm1417_vm12 = vcmask 107520  }
   0x5   :  { %151 = vmatpush.msra.mxu0 %v76_v3  ;;  %2871 = vmatpush.msra.mxu3 %v76_v3  ;;  %v3314_v12 = vld [vmem:[%s4493_s1 + $0x80] sm:$0xff]  ;;  %v73_v13 = vld [vmem:[%s4493_s1 + $0x10] sm:$0xff]  ;;  %v2631_v14 = vld [vmem:[%s4493_s1 + $0x48] sm:$0xff]  ;;  %vm1447_vm13 = vcmask 113670   ;;  %vm1450_vm14 = vcmask 109568   ;;  %vm2005_vm15 = vcmask 455680  }
   0x6   :  { %305 = vmatpush.msra.mxu1 %v2634_v7  ;;  %478 = vmatpush.msra.mxu2 %v3286_v5  ;;  %v3326_v15 = vld [vmem:[%s4493_s1 + $0x78] sm:$0xff]  ;;  %v72_v16 = vld [vmem:[%s4493_s1 + $0x8] sm:$0xff]  ;;  %v2630_v17 = vld [vmem:[%s4493_s1 + $0x40] sm:$0xff] }
   0x7   :  { %152 = vmatpush.msra.mxu0 %v75_v6  ;;  %2872 = vmatpush.msra.mxu3 %v75_v6  ;;  %v3338_v18 = vld [vmem:[%s4493_s1 + $0x70] sm:$0xff]  ;;  %v71_v19 = vld [vmem:[%s4493_s1] sm:$0xff]  ;;  %v2629_v22 = vld [vmem:[%s4493_s1 + $0x38] sm:$0xff] }
   0x8   :  { %306 = vmatpush.msra.mxu1 %v2633_v8  ;;  %479 = vmatpush.msra.mxu2 %v3302_v9  ;;  %v384_v20 = vld [vmem:[%s4494_s0 + $0x2] sm:$0xff]  ;;  %v385_v24 = vld [vmem:[%s4494_s0 + $0xa] sm:$0xff]  ;;  %v386_v27 = vld [vmem:[%s4494_s0 + $0x12] sm:$0xff] }
   0x9   :  { %153 = vmatpush.msra.mxu0 %v74_v10  ;;  %2873 = vmatpush.msra.mxu3 %v74_v10  ;;  %v53_v21 = vld [vmem:[%s4494_s0] sm:$0xff]  ;;  %v54_v25 = vld [vmem:[%s4494_s0 + $0x8] sm:$0xff]  ;;  %v55_v28 = vld [vmem:[%s4494_s0 + $0x10] sm:$0xff] }
   0xa   :  { %307 = vmatpush.msra.mxu1 %v2632_v11  ;;  %480 = vmatpush.msra.mxu2 %v3314_v12  ;;  %v212_v23 = vld [vmem:[%s4494_s0 + $0x1] sm:$0xff]  ;;  %v213_v26 = vld [vmem:[%s4494_s0 + $0x9] sm:$0xff]  ;;  %v214_v29 = vld [vmem:[%s4494_s0 + $0x11] sm:$0xff] }
   0xb   :  { %154 = vmatpush.msra.mxu0 %v73_v13  ;;  %2874 = vmatpush.msra.mxu3 %v73_v13  ;;  %v387_v30 = vld [vmem:[%s4494_s0 + $0x1a] sm:$0xff]  ;;  %v388_v34 = vld [vmem:[%s4494_s0 + $0x22] sm:$0xff]  ;;  %v389_v38 = vld [vmem:[%s4494_s0 + $0x2a] sm:$0xff] }
   0xc   :  { %308 = vmatpush.msra.mxu1 %v2631_v14  ;;  %481 = vmatpush.msra.mxu2 %v3326_v15  ;;  %v56_v31 = vld [vmem:[%s4494_s0 + $0x18] sm:$0xff]  ;;  %v69_v33 = vld [vmem:[%s4494_s0 + $0x80] sm:$0xff]  ;;  %v70_v37 = vld [vmem:[%s4494_s0 + $0x88] sm:$0x3f] }
   0xd   :  { %155 = vmatpush.msra.mxu0 %v72_v16  ;;  %2875 = vmatpush.msra.mxu3 %v72_v16  ;;  %v215_v32 = vld [vmem:[%s4494_s0 + $0x19] sm:$0xff]  ;;  %v216_v36 = vld [vmem:[%s4494_s0 + $0x21] sm:$0xff]  ;;  %v217_v40 = vld [vmem:[%s4494_s0 + $0x29] sm:$0xff] }
   0xe   :  { %309 = vmatpush.msra.mxu1 %v2630_v17  ;;  %482 = vmatpush.msra.mxu2 %v3338_v18  ;;  %v57_v35 = vld [vmem:[%s4494_s0 + $0x20] sm:$0xff]  ;;  %v58_v39 = vld [vmem:[%s4494_s0 + $0x28] sm:$0xff]  ;;  %v390_v42 = vld [vmem:[%s4494_s0 + $0x32] sm:$0xff] }
   0xf   :  { %156 = vmatpush.msra.mxu0 %v71_v19  ;;  %2663 = vmatmul.msk.f32.vlgmr.msra.gmra.mxu2 %vm82_vm1, %v384_v20  ;;  %v228_v41 = vld [vmem:[%s4494_s0 + $0x81] sm:$0xff]  ;;  %v59_v43 = vld [vmem:[%s4494_s0 + $0x30] sm:$0xff]  ;;  %v229_v45 = vld [vmem:[%s4494_s0 + $0x89] sm:$0x3f] }
  0x10   :  { %2611 = vmatmul.msk.f32.vlgmr.msra.gmra.mxu0 %vm82_vm1, %v53_v21  ;;  %310 = vmatpush.msra.mxu1 %v2629_v22  ;;  %v218_v44 = vld [vmem:[%s4494_s0 + $0x31] sm:$0xff]  ;;  %v391_v46 = vld [vmem:[%s4494_s0 + $0x3a] sm:$0xff]  ;;  %v400_v49 = vld [vmem:[%s4494_s0 + $0x82] sm:$0xff] }
  0x11   :  { %2876 = vmatpush.msra.mxu3 %v71_v19  ;;  %2637 = vmatmul.msk.f32.vlgmr.msra.gmra.mxu1 %vm82_vm1, %v212_v23  ;;  %v60_v47 = vld [vmem:[%s4494_s0 + $0x38] sm:$0xff]  ;;  %v392_v50 = vld [vmem:[%s4494_s0 + $0x42] sm:$0xff]  ;;  %v401_v53 = vld [vmem:[%s4494_s0 + $0x8a] sm:$0x3f] }
  0x12   :  { %2627 = vmatmul.msk.f32.vlgmr.msra.gmra.mxu3 %vm82_vm1, %v69_v33  ;;  %v219_v48 = vld [vmem:[%s4494_s0 + $0x39] sm:$0xff]  ;;  %v220_v52 = vld [vmem:[%s4494_s0 + $0x41] sm:$0xff]  ;;  %v393_v54 = vld [vmem:[%s4494_s0 + $0x4a] sm:$0xff] }
  0x13   :  { %2877 = vmatpush.msk.msrb.mxu3 %vm137_vm0, %v2635_v4  ;;  %v61_v51 = vld [vmem:[%s4494_s0 + $0x40] sm:$0xff]  ;;  %v62_v55 = vld [vmem:[%s4494_s0 + $0x48] sm:$0xff]  ;;  %v394_v57 = vld [vmem:[%s4494_s0 + $0x52] sm:$0xff] }
  0x14   :  { %v221_v56 = vld [vmem:[%s4494_s0 + $0x49] sm:$0xff]  ;;  %v222_v59 = vld [vmem:[%s4494_s0 + $0x51] sm:$0xff]  ;;  %v395_v60 = vld [vmem:[%s4494_s0 + $0x5a] sm:$0xff] }
  0x15   :  { %2878 = vmatpush.msrb.mxu3 %v2634_v7  ;;  %v63_v58 = vld [vmem:[%s4494_s0 + $0x50] sm:$0xff]  ;;  %v64_v61 = vld [vmem:[%s4494_s0 + $0x58] sm:$0xff]  ;;  %v396_v63 = vld [vmem:[%s4494_s0 + $0x62] sm:$0xff] }
  0x16   :  { %v223_v62 = vld [vmem:[%s4494_s0 + $0x59] sm:$0xff]  ;;  %v224_v1 = vld [vmem:[%s4494_s0 + $0x61] sm:$0xff]  ;;  %v618_v6 = vld [vmem:[%s4496_s3 + $0x30] sm:$0xff] }
  0x17   :  { %2879 = vmatpush.msrb.mxu3 %v2633_v8  ;;  %2664 = vmatmul.msk.f32.gmra.mxu2 %vm82_vm1, %v385_v24  ;;  %v66_v3 = vld [vmem:[%s4494_s0 + $0x68] sm:$0xff]  ;;  %v619_v4 = vld [vmem:[%s4496_s3 + $0x38] sm:$0xff]  ;;  %v616_v8 = vld [vmem:[%s4496_s3 + $0x20] sm:$0xff] }
  0x18   :  { %2612 = vmatmul.msk.f32.gmra.mxu0 %vm82_vm1, %v54_v25  ;;  %v617_v7 = vld [vmem:[%s4496_s3 + $0x28] sm:$0xff]  ;;  %v67_v10 = vld [vmem:[%s4494_s0 + $0x70] sm:$0xff]  ;;  %v2732_v13 = vld [vmem:[%s4496_s3 + $0xb8] sm:$0xff] }
  0x19   :  { %2880 = vmatpush.msrb.mxu3 %v2632_v11  ;;  %2638 = vmatmul.msk.f32.gmra.mxu1 %vm82_vm1, %v213_v26  ;;  %v615_v11 = vld [vmem:[%s4496_s3 + $0x18] sm:$0xff]  ;;  %v2705_v16 = vld [vmem:[%s4496_s3 + $0x70] sm:$0xff]  ;;  %v2704_v19 = vld [vmem:[%s4496_s3 + $0x68] sm:$0xff] }
  0x1a   :  { %2628 = vmatmul.msk.f32.gmra.mxu3 %vm82_vm1, %v70_v37  ;;  %1008 = vmatpush.msrb.mxu1 %v2732_v13  ;;  %v2730_v20 = vld [vmem:[%s4496_s3 + $0xa8] sm:$0xff]  ;;  %v612_v21 = vld [vmem:[%s4496_s3] sm:$0xff]  ;;  %v68_v25 = vld [vmem:[%s4494_s0 + $0x78] sm:$0xff] }
  0x1b   :  { %2881 = vmatpush.msrb.mxu3 %v2631_v14  ;;  %v226_v14 = vld [vmem:[%s4494_s0 + $0x71] sm:$0xff]  ;;  %v2729_v23 = vld [vmem:[%s4496_s3 + $0xa0] sm:$0xff]  ;;  %v2726_v33 = vld [vmem:[%s4496_s3 + $0x88] sm:$0xff] }
  0x1c   :  { %v399_v24 = vld [vmem:[%s4494_s0 + $0x7a] sm:$0xff] }
  0x1d   :  { %2882 = vmatpush.msrb.mxu3 %v2630_v17  ;;  %v2731_v17 = vld [vmem:[%s4496_s3 + $0xb0] sm:$0xff]  ;;  %v2702_v26 = vld [vmem:[%s4496_s3 + $0x58] sm:$0xff] }
  0x1e   :  { %1009 = vmatpush.msrb.mxu1 %v2731_v17 }
  0x1f   :  { %2883 = vmatpush.msrb.mxu3 %v2629_v22  ;;  %2665 = vmatmul.msk.f32.gmra.mxu2 %vm82_vm1, %v386_v27  ;;  %v2703_v22 = vld [vmem:[%s4496_s3 + $0x60] sm:$0xff]  ;;  %v2728_v27 = vld [vmem:[%s4496_s3 + $0x98] sm:$0xff] }
  0x20   :  { %2613 = vmatmul.msk.f32.gmra.mxu0 %vm82_vm1, %v55_v28  ;;  %1010 = vmatpush.msrb.mxu1 %v2730_v20  ;;  %v227_v28 = vld [vmem:[%s4494_s0 + $0x79] sm:$0xff] }
  0x21   :  { %2639 = vmatmul.msk.f32.gmra.mxu1 %vm82_vm1, %v214_v29  ;;  %2884 = vmatpush.msk.msra.mxu3 %vm137_vm0, %v3263_v0  ;;  %v65_v0 = vld [vmem:[%s4494_s0 + $0x60] sm:$0xff]  ;;  %v2701_v29 = vld [vmem:[%s4496_s3 + $0x50] sm:$0xff] }
  0x22   :  { %2653 = vmatmul.msk.f32.vlgmr.msrb.gmra.mxu3 %vm82_vm1, %v228_v41  ;;  %1011 = vmatpush.msrb.mxu1 %v2729_v23 }
  0x23   :  { %2885 = vmatpush.msra.mxu3 %v3271_v2  ;;  %v397_v2 = vld [vmem:[%s4494_s0 + $0x6a] sm:$0xff] }
  0x24   :  { %1012 = vmatpush.msrb.mxu1 %v2728_v27 }
  0x25   :  { %2886 = vmatpush.msra.mxu3 %v3286_v5  ;;  %v225_v5 = vld [vmem:[%s4494_s0 + $0x69] sm:$0xff] }
  0x27   :  { %2666 = vmatmul.msk.f32.gmra.mxu2 %vm82_vm1, %v387_v30  ;;  %2887 = vmatpush.msra.mxu3 %v3302_v9  ;;  %v398_v9 = vld [vmem:[%s4494_s0 + $0x72] sm:$0xff] }
  0x28   :  { %2614 = vmatmul.msk.f32.gmra.mxu0 %vm82_vm1, %v56_v31  ;;  %v2727_v30 = vld [vmem:[%s4496_s3 + $0x90] sm:$0xff]  ;;  %v3636_v31 = vld [vmem:[%s4495_s2] ss:$0 sm:$0xff] }
  0x29   :  { %2640 = vmatmul.msk.f32.gmra.mxu1 %vm82_vm1, %v215_v32  ;;  %2888 = vmatpush.msra.mxu3 %v3314_v12  ;;  %v2706_v12 = vld [vmem:[%s4496_s3 + $0x78] sm:$0xff]  ;;  %v2700_v32 = vld [vmem:[%s4496_s3 + $0x48] sm:$0xff] }
  0x2a   :  { %2654 = vmatmul.msk.f32.gmra.mxu3 %vm82_vm1, %v229_v45  ;;  %838 = vmatpush.msrb.mxu0 %v2706_v12 }
  0x2b   :  { %2889 = vmatpush.msra.mxu3 %v3326_v15  ;;  %v614_v15 = vld [vmem:[%s4496_s3 + $0x10] sm:$0xff]  ;;  %1013 = vmatpush.msrb.mxu1 %v2727_v30 }
  0x2c   :  { %839 = vmatpush.msrb.mxu0 %v2705_v16 }
  0x2d   :  { %2890 = vmatpush.msra.mxu3 %v3338_v18  ;;  %v613_v18 = vld [vmem:[%s4496_s3 + $0x8] sm:$0xff]  ;;  %1014 = vmatpush.msrb.mxu1 %v2726_v33 }
  0x2e   :  { %840 = vmatpush.msrb.mxu0 %v2704_v19 }
  0x2f   :  { %2667 = vmatmul.msk.f32.gmra.mxu2 %vm82_vm1, %v388_v34  ;;  %686 = vmatpush.msrb.mxu3 %v619_v4  ;;  %v2699_v34 = vld [vmem:[%s4496_s3 + $0x40] sm:$0xff] }
  0x30   :  { %2615 = vmatmul.msk.f32.gmra.mxu0 %vm82_vm1, %v57_v35  ;;  %v2725_v35 = vld [vmem:[%s4496_s3 + $0x80] sm:$0xff] }
  0x31   :  { %2641 = vmatmul.msk.f32.gmra.mxu1 %vm82_vm1, %v216_v36  ;;  %687 = vmatpush.msrb.mxu3 %v618_v6 }
  0x32   :  { %2679 = vmatmul.msk.f32.vlgmr.msra.gmra.mxu3 %vm82_vm1, %v400_v49  ;;  %841 = vmatpush.msrb.mxu0 %v2703_v22 }
  0x33   :  { %688 = vmatpush.msrb.mxu3 %v617_v7  ;;  %1015 = vmatpush.msrb.mxu1 %v2725_v35 }
  0x34   :  { %842 = vmatpush.msrb.mxu0 %v2702_v26 }
  0x35   :  { %689 = vmatpush.msrb.mxu3 %v616_v8 }
  0x36   :  { %843 = vmatpush.msrb.mxu0 %v2701_v29 }
  0x37   :  { %2668 = vmatmul.msk.f32.gmra.mxu2 %vm82_vm1, %v389_v38  ;;  %690 = vmatpush.msrb.mxu3 %v615_v11 }
  0x38   :  { %2616 = vmatmul.msk.f32.gmra.mxu0 %vm82_vm1, %v58_v39 }
  0x39   :  { %2642 = vmatmul.msk.f32.gmra.mxu1 %vm82_vm1, %v217_v40  ;;  %691 = vmatpush.msrb.mxu3 %v614_v15 }
  0x3a   :  { %2680 = vmatmul.msk.f32.gmra.mxu3 %vm82_vm1, %v401_v53  ;;  %844 = vmatpush.msrb.mxu0 %v2700_v32 }
  0x3b   :  { %692 = vmatpush.msrb.mxu3 %v613_v18 }
  0x3c   :  { %845 = vmatpush.msrb.mxu0 %v2699_v34 }
  0x3d   :  { %693 = vmatpush.msrb.mxu3 %v612_v21 }
  0x3f   :  { %2669 = vmatmul.msk.f32.gmra.mxu2 %vm82_vm1, %v390_v42 }
  0x40   :  { %2617 = vmatmul.msk.f32.gmra.mxu0 %vm82_vm1, %v59_v43 }
  0x41   :  { %2643 = vmatmul.msk.f32.gmra.mxu1 %vm82_vm1, %v218_v44 }
  0x47   :  { %2670 = vmatmul.msk.f32.gmra.mxu2 %vm82_vm1, %v391_v46 }
  0x48   :  { %2618 = vmatmul.msk.f32.gmra.mxu0 %vm82_vm1, %v60_v47 }
  0x49   :  { %2644 = vmatmul.msk.f32.gmra.mxu1 %vm82_vm1, %v219_v48 }
  0x4f   :  { %2671 = vmatmul.msk.f32.gmra.mxu2 %vm82_vm1, %v392_v50 }
  0x50   :  { %2619 = vmatmul.msk.f32.gmra.mxu0 %vm82_vm1, %v61_v51 }
  0x51   :  { %2645 = vmatmul.msk.f32.gmra.mxu1 %vm82_vm1, %v220_v52 }
  0x57   :  { %2672 = vmatmul.msk.f32.gmra.mxu2 %vm82_vm1, %v393_v54 }
  0x58   :  { %2620 = vmatmul.msk.f32.gmra.mxu0 %vm82_vm1, %v62_v55 }
  0x59   :  { %2646 = vmatmul.msk.f32.gmra.mxu1 %vm82_vm1, %v221_v56 }
  0x5f   :  { %2673 = vmatmul.msk.f32.gmra.mxu2 %vm82_vm1, %v394_v57 }
  0x60   :  { %2621 = vmatmul.msk.f32.gmra.mxu0 %vm82_vm1, %v63_v58 }
  0x61   :  { %2647 = vmatmul.msk.f32.gmra.mxu1 %vm82_vm1, %v222_v59 }
  0x67   :  { %2674 = vmatmul.msk.f32.gmra.mxu2 %vm82_vm1, %v395_v60 }
  0x68   :  { %2622 = vmatmul.msk.f32.gmra.mxu0 %vm82_vm1, %v64_v61 }
  0x69   :  { %2648 = vmatmul.msk.f32.gmra.mxu1 %vm82_vm1, %v223_v62 }
  0x6f   :  { %2675 = vmatmul.msk.f32.gmra.mxu2 %vm82_vm1, %v396_v63 }
  0x70   :  { %2623 = vmatmul.msk.f32.gmra.mxu0 %vm82_vm1, %v65_v0 }
  0x71   :  { %2649 = vmatmul.msk.f32.gmra.mxu1 %vm82_vm1, %v224_v1 }
  0x77   :  { %2676 = vmatmul.msk.f32.gmra.mxu2 %vm82_vm1, %v397_v2 }
  0x78   :  { %2624 = vmatmul.msk.f32.gmra.mxu0 %vm82_vm1, %v66_v3 }
  0x79   :  { %2650 = vmatmul.msk.f32.gmra.mxu1 %vm82_vm1, %v225_v5 }
  0x7f   :  { %2677 = vmatmul.msk.f32.gmra.mxu2 %vm82_vm1, %v398_v9 }
  0x80   :  { %2625 = vmatmul.msk.f32.gmra.mxu0 %vm82_vm1, %v67_v10 }
  0x81   :  { %2651 = vmatmul.msk.f32.gmra.mxu1 %vm82_vm1, %v226_v14 }
  0x87   :  { %2678 = vmatmul.msk.f32.gmra.mxu2 %vm82_vm1, %v399_v24 }
  0x88   :  { %2626 = vmatmul.msk.f32.gmra.mxu0 %vm82_vm1, %v68_v25 }
  0x89   :  { %2652 = vmatmul.msk.f32.gmra.mxu1 %vm82_vm1, %v227_v28  ;;  %vm2430_vm1 = vcmask 36864  }
  0x8d   :  { %v158_v36 = vpop.f32.mrf.mxu0 }
  0x8e   :  { %v159_v37 = vadd.f32 %v3636_v31, %v158_v36  ;;  %v312_v38 = vpop.f32.mrf.mxu1 }
  0x90   :  { %v366_v39 = vadd.f32 %v312_v38, %v159_v37 }
  0x92   :  { %v484_v40 = vpop.f32.mrf.mxu2 }
  0x93   :  { %v538_v41 = vadd.f32 %v484_v40, %v366_v39 }
  0x95   :  { %v161_v42 = vpop.f32.mrf.mxu0  ;;  %2931 = vtanh.f32 %v538_v41  ;;  %v206_v7 = vpop.f32.mrf.mxu3 }
  0x96   :  { %v162_v43 = vadd.f32 %v3636_v31, %v161_v42  ;;  %v315_v44 = vpop.f32.mrf.mxu1 }
  0x98   :  { %v367_v45 = vadd.f32 %v315_v44, %v162_v43 }
  0x9a   :  { %v487_v46 = vpop.f32.mrf.mxu2 }
  0x9b   :  { %v2932_v47 = vpop.eup %2931  ;;  %v539_v48 = vadd.f32 %v487_v46, %v367_v45 }
  0x9c   :  { %575 = vst.msk [vmem:[#allocation2] sm:$0xff] %vm574_vm2, %v2932_v47 }
  0x9d   :  { %v164_v49 = vpop.f32.mrf.mxu0  ;;  %2933 = vtanh.f32 %v539_v48  ;;  %v209_v18 = vpop.f32.mrf.mxu3 }
  0x9e   :  { %v165_v50 = vadd.f32 %v3636_v31, %v164_v49  ;;  %v318_v51 = vpop.f32.mrf.mxu1  ;;  %v207_v49 = vadd.f32 %v3636_v31, %v206_v7 }
  0xa0   :  { %v368_v52 = vadd.f32 %v318_v51, %v165_v50 }
  0xa2   :  { %v490_v53 = vpop.f32.mrf.mxu2 }
  0xa3   :  { %v2934_v54 = vpop.eup %2933  ;;  %v540_v55 = vadd.f32 %v490_v53, %v368_v52  ;;  %v594_v56 = vld [vmem:[#allocation2] sm:$0xff] }
  0xa4   :  { %576 = vst.msk [vmem:[#allocation2 + $0x8] sm:$0xff] %vm574_vm2, %v2934_v54  ;;  %2681 = vmatmul.msk.f32.vlgmr.msrb.gmra.mxu3 %vm574_vm2, %v594_v56  ;;  %v210_v54 = vadd.f32 %v3636_v31, %v209_v18 }
  0xa5   :  { %v167_v57 = vpop.f32.mrf.mxu0  ;;  %2935 = vtanh.f32 %v540_v55  ;;  %v360_v29 = vpop.f32.mrf.mxu3 }
  0xa6   :  { %v168_v58 = vadd.f32 %v3636_v31, %v167_v57  ;;  %v321_v59 = vpop.f32.mrf.mxu1  ;;  %v382_v55 = vadd.f32 %v360_v29, %v207_v49 }
  0xa8   :  { %v369_v60 = vadd.f32 %v321_v59, %v168_v58 }
  0xaa   :  { %v493_v61 = vpop.f32.mrf.mxu2 }
  0xab   :  { %v2936_v62 = vpop.eup %2935  ;;  %v541_v63 = vadd.f32 %v493_v61, %v369_v60  ;;  %v595_v0 = vld [vmem:[#allocation2 + $0x8] sm:$0xff] }
  0xac   :  { %v749_v1 = vld [vmem:[#allocation2 + $0x1] sm:$0xff]  ;;  %577 = vst.msk [vmem:[#allocation2 + $0x10] sm:$0xff] %vm574_vm2, %v2936_v62  ;;  %2682 = vmatmul.msk.f32.gmra.mxu3 %vm574_vm2, %v595_v0 }
  0xad   :  { %v919_v2 = vld [vmem:[#allocation2 + $0x2] sm:$0xff]  ;;  %2707 = vmatmul.msk.f32.vlgmr.msrb.gmra.mxu0 %vm574_vm2, %v749_v1  ;;  %v170_v3 = vpop.f32.mrf.mxu0  ;;  %2937 = vtanh.f32 %v541_v63  ;;  %v363_v41 = vpop.f32.mrf.mxu3 }
  0xae   :  { %2733 = vmatmul.msk.f32.vlgmr.msrb.gmra.mxu1 %vm574_vm2, %v919_v2  ;;  %v171_v4 = vadd.f32 %v3636_v31, %v170_v3  ;;  %v324_v5 = vpop.f32.mrf.mxu1  ;;  %v383_v63 = vadd.f32 %v363_v41, %v210_v54 }
  0xb0   :  { %v370_v6 = vadd.f32 %v324_v5, %v171_v4 }
  0xb2   :  { %v496_v8 = vpop.f32.mrf.mxu2 }
  0xb3   :  { %v2938_v9 = vpop.eup %2937  ;;  %v542_v10 = vadd.f32 %v496_v8, %v370_v6  ;;  %v596_v11 = vld [vmem:[#allocation2 + $0x10] sm:$0xff] }
  0xb4   :  { %v750_v12 = vld [vmem:[#allocation2 + $0x9] sm:$0xff]  ;;  %578 = vst.msk [vmem:[#allocation2 + $0x18] sm:$0xff] %vm574_vm2, %v2938_v9  ;;  %2683 = vmatmul.msk.f32.gmra.mxu3 %vm574_vm2, %v596_v11 }
  0xb5   :  { %v920_v13 = vld [vmem:[#allocation2 + $0xa] sm:$0xff]  ;;  %2708 = vmatmul.msk.f32.gmra.mxu0 %vm574_vm2, %v750_v12  ;;  %v173_v14 = vpop.f32.mrf.mxu0  ;;  %2939 = vtanh.f32 %v542_v10  ;;  %v532_v53 = vpop.f32.mrf.mxu3 }
  0xb6   :  { %2734 = vmatmul.msk.f32.gmra.mxu1 %vm574_vm2, %v920_v13  ;;  %v174_v15 = vadd.f32 %v3636_v31, %v173_v14  ;;  %v327_v16 = vpop.f32.mrf.mxu1  ;;  %v554_v0 = vadd.f32 %v532_v53, %v382_v55 }
  0xb8   :  { %v371_v17 = vadd.f32 %v327_v16, %v174_v15 }
  0xba   :  { %v499_v19 = vpop.f32.mrf.mxu2 }
  0xbb   :  { %v2940_v20 = vpop.eup %2939  ;;  %v543_v21 = vadd.f32 %v499_v19, %v371_v17  ;;  %v597_v22 = vld [vmem:[#allocation2 + $0x18] sm:$0xff] }
  0xbc   :  { %v751_v23 = vld [vmem:[#allocation2 + $0x11] sm:$0xff]  ;;  %579 = vst.msk [vmem:[#allocation2 + $0x20] sm:$0xff] %vm574_vm2, %v2940_v20  ;;  %2684 = vmatmul.msk.f32.gmra.mxu3 %vm574_vm2, %v597_v22 }
  0xbd   :  { %v921_v24 = vld [vmem:[#allocation2 + $0x12] sm:$0xff]  ;;  %2709 = vmatmul.msk.f32.gmra.mxu0 %vm574_vm2, %v751_v23  ;;  %v176_v25 = vpop.f32.mrf.mxu0  ;;  %2941 = vtanh.f32 %v543_v21  ;;  %v535_v4 = vpop.f32.mrf.mxu3 }
  0xbe   :  { %2735 = vmatmul.msk.f32.gmra.mxu1 %vm574_vm2, %v921_v24  ;;  %v177_v26 = vadd.f32 %v3636_v31, %v176_v25  ;;  %v330_v27 = vpop.f32.mrf.mxu1  ;;  %v555_v5 = vadd.f32 %v535_v4, %v383_v63 }
  0xc0   :  { %v372_v28 = vadd.f32 %v330_v27, %v177_v26 }
  0xc2   :  { %v502_v30 = vpop.f32.mrf.mxu2 }
  0xc3   :  { %v2942_v32 = vpop.eup %2941  ;;  %v544_v33 = vadd.f32 %v502_v30, %v372_v28  ;;  %v598_v34 = vld [vmem:[#allocation2 + $0x20] sm:$0xff] }
  0xc4   :  { %v752_v35 = vld [vmem:[#allocation2 + $0x19] sm:$0xff]  ;;  %580 = vst.msk [vmem:[#allocation2 + $0x28] sm:$0xff] %vm574_vm2, %v2942_v32  ;;  %2685 = vmatmul.msk.f32.gmra.mxu3 %vm574_vm2, %v598_v34 }
  0xc5   :  { %v922_v36 = vld [vmem:[#allocation2 + $0x1a] sm:$0xff]  ;;  %2710 = vmatmul.msk.f32.gmra.mxu0 %vm574_vm2, %v752_v35  ;;  %v179_v37 = vpop.f32.mrf.mxu0  ;;  %2943 = vtanh.f32 %v544_v33 }
  0xc6   :  { %2736 = vmatmul.msk.f32.gmra.mxu1 %vm574_vm2, %v922_v36  ;;  %v180_v38 = vadd.f32 %v3636_v31, %v179_v37  ;;  %v333_v39 = vpop.f32.mrf.mxu1 }
  0xc8   :  { %v373_v40 = vadd.f32 %v333_v39, %v180_v38 }
  0xca   :  { %v505_v42 = vpop.f32.mrf.mxu2 }
  0xcb   :  { %v2944_v43 = vpop.eup %2943  ;;  %v545_v44 = vadd.f32 %v505_v42, %v373_v40  ;;  %v599_v45 = vld [vmem:[#allocation2 + $0x28] sm:$0xff] }
  0xcc   :  { %v753_v46 = vld [vmem:[#allocation2 + $0x21] sm:$0xff]  ;;  %581 = vst.msk [vmem:[#allocation2 + $0x30] sm:$0xff] %vm574_vm2, %v2944_v43  ;;  %2686 = vmatmul.msk.f32.gmra.mxu3 %vm574_vm2, %v599_v45 }
  0xcd   :  { %v923_v47 = vld [vmem:[#allocation2 + $0x22] sm:$0xff]  ;;  %2711 = vmatmul.msk.f32.gmra.mxu0 %vm574_vm2, %v753_v46  ;;  %v182_v48 = vpop.f32.mrf.mxu0  ;;  %2945 = vtanh.f32 %v545_v44 }
  0xce   :  { %2737 = vmatmul.msk.f32.gmra.mxu1 %vm574_vm2, %v923_v47  ;;  %v183_v50 = vadd.f32 %v3636_v31, %v182_v48  ;;  %v336_v51 = vpop.f32.mrf.mxu1 }
  0xd0   :  { %v374_v52 = vadd.f32 %v336_v51, %v183_v50 }
  0xd2   :  { %v508_v56 = vpop.f32.mrf.mxu2 }
  0xd3   :  { %v2946_v57 = vpop.eup %2945  ;;  %v546_v58 = vadd.f32 %v508_v56, %v374_v52  ;;  %v600_v59 = vld [vmem:[#allocation2 + $0x30] sm:$0xff] }
  0xd4   :  { %v754_v60 = vld [vmem:[#allocation2 + $0x29] sm:$0xff]  ;;  %582 = vst.msk [vmem:[#allocation2 + $0x38] sm:$0xff] %vm574_vm2, %v2946_v57  ;;  %2687 = vmatmul.msk.f32.gmra.mxu3 %vm574_vm2, %v600_v59 }
  0xd5   :  { %v924_v61 = vld [vmem:[#allocation2 + $0x2a] sm:$0xff]  ;;  %2712 = vmatmul.msk.f32.gmra.mxu0 %vm574_vm2, %v754_v60  ;;  %v185_v62 = vpop.f32.mrf.mxu0  ;;  %2947 = vtanh.f32 %v546_v58 }
  0xd6   :  { %2738 = vmatmul.msk.f32.gmra.mxu1 %vm574_vm2, %v924_v61  ;;  %v186_v1 = vadd.f32 %v3636_v31, %v185_v62  ;;  %v339_v2 = vpop.f32.mrf.mxu1  ;;  %2949 = vtanh.f32 %v554_v0 }
  0xd7   :  { %2951 = vtanh.f32 %v555_v5  ;;  %v1113_v5 = vld [vmem:[%s4498_s5 + $0x30] sm:$0xff] }
  0xd8   :  { %v375_v3 = vadd.f32 %v339_v2, %v186_v1  ;;  %1185 = vmatpush.msrb.mxu2 %v1113_v5 }
  0xda   :  { %v511_v6 = vpop.f32.mrf.mxu2 }
  0xdb   :  { %v2948_v7 = vpop.eup %2947  ;;  %v547_v8 = vadd.f32 %v511_v6, %v375_v3  ;;  %v601_v9 = vld [vmem:[#allocation2 + $0x38] sm:$0xff] }
  0xdc   :  { %v755_v10 = vld [vmem:[#allocation2 + $0x31] sm:$0xff]  ;;  %v2950_v12 = vpop.eup %2949  ;;  %583 = vst.msk [vmem:[#allocation2 + $0x40] sm:$0xff] %vm574_vm2, %v2948_v7  ;;  %2688 = vmatmul.msk.f32.gmra.mxu3 %vm574_vm2, %v601_v9  ;;  %v1112_v7 = vld [vmem:[%s4498_s5 + $0x28] sm:$0xff] }
  0xdd   :  { %v925_v11 = vld [vmem:[#allocation2 + $0x32] sm:$0xff]  ;;  %2713 = vmatmul.msk.f32.gmra.mxu0 %vm574_vm2, %v755_v10  ;;  %v188_v13 = vpop.f32.mrf.mxu0  ;;  %2953 = vtanh.f32 %v547_v8  ;;  %591 = vst.msk [vmem:[#allocation2 + $0x80] sm:$0xff] %vm574_vm2, %v2950_v12  ;;  %v2952_v17 = vpop.eup %2951  ;;  %1186 = vmatpush.msrb.mxu2 %v1112_v7 }
  0xde   :  { %2739 = vmatmul.msk.f32.gmra.mxu1 %vm574_vm2, %v925_v11  ;;  %v189_v14 = vadd.f32 %v3636_v31, %v188_v13  ;;  %v342_v15 = vpop.f32.mrf.mxu1  ;;  %593 = vst.msk [vmem:[#allocation2 + $0x88] sm:$0x3f] %vm592_vm3, %v2952_v17  ;;  %v1110_v13 = vld [vmem:[%s4498_s5 + $0x18] sm:$0xff]  ;;  %vm2578_vm3 = vcmask 1040384  }
  0xe0   :  { %v376_v16 = vadd.f32 %v342_v15, %v189_v14  ;;  %v1109_v14 = vld [vmem:[%s4498_s5 + $0x10] sm:$0xff]  ;;  %v1108_v15 = vld [vmem:[%s4498_s5 + $0x8] sm:$0xff] }
  0xe2   :  { %v514_v18 = vpop.f32.mrf.mxu2 }
  0xe3   :  { %v2954_v19 = vpop.eup %2953  ;;  %v548_v20 = vadd.f32 %v514_v18, %v376_v16  ;;  %v602_v21 = vld [vmem:[#allocation2 + $0x40] sm:$0xff] }
  0xe4   :  { %v756_v22 = vld [vmem:[#allocation2 + $0x39] sm:$0xff]  ;;  %584 = vst.msk [vmem:[#allocation2 + $0x48] sm:$0xff] %vm574_vm2, %v2954_v19  ;;  %2689 = vmatmul.msk.f32.gmra.mxu3 %vm574_vm2, %v602_v21 }
  0xe5   :  { %v926_v23 = vld [vmem:[#allocation2 + $0x3a] sm:$0xff]  ;;  %2714 = vmatmul.msk.f32.gmra.mxu0 %vm574_vm2, %v756_v22  ;;  %v191_v24 = vpop.f32.mrf.mxu0  ;;  %2955 = vtanh.f32 %v548_v20 }
  0xe6   :  { %2740 = vmatmul.msk.f32.gmra.mxu1 %vm574_vm2, %v926_v23  ;;  %v192_v25 = vadd.f32 %v3636_v31, %v191_v24  ;;  %v345_v26 = vpop.f32.mrf.mxu1  ;;  %v1107_v20 = vld [vmem:[%s4498_s5] sm:$0xff]  ;;  %v21_v24 = vstv %s4499_s6 }
  0xe7   :  { %22 = vst [vmem:[#allocation5] sm:$0x1] %v21_v24 }
  0xe8   :  { %v377_v27 = vadd.f32 %v345_v26, %v192_v25  ;;  %v610_v25 = vld [vmem:[#allocation2 + $0x80] sm:$0xff] }
  0xea   :  { %v517_v28 = vpop.f32.mrf.mxu2 }
  0xeb   :  { %v2956_v29 = vpop.eup %2955  ;;  %v549_v30 = vadd.f32 %v517_v28, %v377_v27  ;;  %v603_v32 = vld [vmem:[#allocation2 + $0x48] sm:$0xff]  ;;  %v3760_v28 = vld [vmem:[%s4497_s4] ss:$0 sm:$0xff] }
  0xec   :  { %v757_v33 = vld [vmem:[#allocation2 + $0x41] sm:$0xff]  ;;  %585 = vst.msk [vmem:[#allocation2 + $0x50] sm:$0xff] %vm574_vm2, %v2956_v29  ;;  %2690 = vmatmul.msk.f32.gmra.mxu3 %vm574_vm2, %v603_v32 }
  0xed   :  { %v927_v34 = vld [vmem:[#allocation2 + $0x42] sm:$0xff]  ;;  %2715 = vmatmul.msk.f32.gmra.mxu0 %vm574_vm2, %v757_v33  ;;  %v194_v35 = vpop.f32.mrf.mxu0  ;;  %2957 = vtanh.f32 %v549_v30  ;;  %v3179_v30 = vmov 0  }
  0xee   :  { %2741 = vmatmul.msk.f32.gmra.mxu1 %vm574_vm2, %v927_v34  ;;  %v195_v36 = vadd.f32 %v3636_v31, %v194_v35  ;;  %v348_v37 = vpop.f32.mrf.mxu1  ;;  %v2927_v29 = vld [vmem:[#allocation5] ss:$0 sm:$0xff]  ;;  %2924 = vset.pattern.permute.xlu0 %v3179_v30 }
  0xef   :  { %1118 = vperm.xlu0 %2924, %v2927_v29  }
  0xf0   :  { %v378_v38 = vadd.f32 %v348_v37, %v195_v36  ;;  %v611_v37 = vld [vmem:[#allocation2 + $0x88] sm:$0xf] }
  0xf2   :  { %v520_v39 = vpop.f32.mrf.mxu2 }
  0xf3   :  { %v2958_v40 = vpop.eup %2957  ;;  %v550_v41 = vadd.f32 %v520_v39, %v378_v38  ;;  %v604_v42 = vld [vmem:[#allocation2 + $0x50] sm:$0xff]  ;;  %v765_v38 = vld [vmem:[#allocation2 + $0x81] sm:$0xff] }
  0xf4   :  { %v758_v43 = vld [vmem:[#allocation2 + $0x49] sm:$0xff]  ;;  %586 = vst.msk [vmem:[#allocation2 + $0x58] sm:$0xff] %vm574_vm2, %v2958_v40  ;;  %2691 = vmatmul.msk.f32.gmra.mxu3 %vm574_vm2, %v604_v42 }
  0xf5   :  { %v928_v44 = vld [vmem:[#allocation2 + $0x4a] sm:$0xff]  ;;  %2716 = vmatmul.msk.f32.gmra.mxu0 %vm574_vm2, %v758_v43  ;;  %v197_v45 = vpop.f32.mrf.mxu0  ;;  %2959 = vtanh.f32 %v550_v41  ;;  %v935_v40 = vld [vmem:[#allocation2 + $0x82] sm:$0xff] }
  0xf6   :  { %2742 = vmatmul.msk.f32.gmra.mxu1 %vm574_vm2, %v928_v44  ;;  %v198_v46 = vadd.f32 %v3636_v31, %v197_v45  ;;  %v351_v47 = vpop.f32.mrf.mxu1 }
  0xf8   :  { %v379_v48 = vadd.f32 %v351_v47, %v198_v46  ;;  %v766_v46 = vld [vmem:[#allocation2 + $0x89] sm:$0xf] }
  0xfa   :  { %v523_v49 = vpop.f32.mrf.mxu2 }
  0xfb   :  { %v2960_v50 = vpop.eup %2959  ;;  %v551_v51 = vadd.f32 %v523_v49, %v379_v48  ;;  %v605_v52 = vld [vmem:[#allocation2 + $0x58] sm:$0xff]  ;;  %v936_v49 = vld [vmem:[#allocation2 + $0x8a] sm:$0xf] }
  0xfc   :  { %v759_v53 = vld [vmem:[#allocation2 + $0x51] sm:$0xff]  ;;  %587 = vst.msk [vmem:[#allocation2 + $0x60] sm:$0xff] %vm574_vm2, %v2960_v50  ;;  %2692 = vmatmul.msk.f32.gmra.mxu3 %vm574_vm2, %v605_v52 }
  0xfd   :  { %v929_v54 = vld [vmem:[#allocation2 + $0x52] sm:$0xff]  ;;  %2717 = vmatmul.msk.f32.gmra.mxu0 %vm574_vm2, %v759_v53  ;;  %v200_v55 = vpop.f32.mrf.mxu0  ;;  %2961 = vtanh.f32 %v551_v51 }
  0xfe   :  { %2743 = vmatmul.msk.f32.gmra.mxu1 %vm574_vm2, %v929_v54  ;;  %v201_v56 = vadd.f32 %v3636_v31, %v200_v55  ;;  %v354_v57 = vpop.f32.mrf.mxu1 }
 0x100   :  { %v380_v58 = vadd.f32 %v354_v57, %v201_v56 }
 0x102   :  { %v526_v59 = vpop.f32.mrf.mxu2 }
 0x103   :  { %v2962_v60 = vpop.eup %2961  ;;  %v552_v61 = vadd.f32 %v526_v59, %v380_v58  ;;  %v606_v62 = vld [vmem:[#allocation2 + $0x60] sm:$0xff] }
 0x104   :  { %v760_v63 = vld [vmem:[#allocation2 + $0x59] sm:$0xff]  ;;  %588 = vst.msk [vmem:[#allocation2 + $0x68] sm:$0xff] %vm574_vm2, %v2962_v60  ;;  %2693 = vmatmul.msk.f32.gmra.mxu3 %vm574_vm2, %v606_v62 }
 0x105   :  { %v930_v0 = vld [vmem:[#allocation2 + $0x5a] sm:$0xff]  ;;  %2718 = vmatmul.msk.f32.gmra.mxu0 %vm574_vm2, %v760_v63  ;;  %v203_v1 = vpop.f32.mrf.mxu0  ;;  %2963 = vtanh.f32 %v552_v61 }
 0x106   :  { %2744 = vmatmul.msk.f32.gmra.mxu1 %vm574_vm2, %v930_v0  ;;  %v204_v2 = vadd.f32 %v3636_v31, %v203_v1  ;;  %v357_v3 = vpop.f32.mrf.mxu1  ;;  %v1111_v31 = vld [vmem:[%s4498_s5 + $0x20] sm:$0xff] }
 0x107   :  { %1187 = vmatpush.msrb.mxu2 %v1111_v31 }
 0x108   :  { %v381_v4 = vadd.f32 %v357_v3, %v204_v2 }
 0x109   :  { %1188 = vmatpush.msrb.mxu2 %v1110_v13 }
 0x10a   :  { %v529_v6 = vpop.f32.mrf.mxu2 }
 0x10b   :  { %v2964_v8 = vpop.eup %2963  ;;  %v553_v9 = vadd.f32 %v529_v6, %v381_v4  ;;  %v607_v10 = vld [vmem:[#allocation2 + $0x68] sm:$0xff]  ;;  %1189 = vmatpush.msrb.mxu2 %v1109_v14 }
 0x10c   :  { %v761_v11 = vld [vmem:[#allocation2 + $0x61] sm:$0xff]  ;;  %589 = vst.msk [vmem:[#allocation2 + $0x70] sm:$0xff] %vm574_vm2, %v2964_v8  ;;  %2694 = vmatmul.msk.f32.gmra.mxu3 %vm574_vm2, %v607_v10 }
 0x10d   :  { %v931_v12 = vld [vmem:[#allocation2 + $0x62] sm:$0xff]  ;;  %2719 = vmatmul.msk.f32.gmra.mxu0 %vm574_vm2, %v761_v11  ;;  %2965 = vtanh.f32 %v553_v9  ;;  %1190 = vmatpush.msrb.mxu2 %v1108_v15 }
 0x10e   :  { %2745 = vmatmul.msk.f32.gmra.mxu1 %vm574_vm2, %v931_v12 }
 0x10f   :  { %1191 = vmatpush.msrb.mxu2 %v1107_v20 }
 0x113   :  { %v2966_v16 = vpop.eup %2965  ;;  %v608_v17 = vld [vmem:[#allocation2 + $0x70] sm:$0xff] }
 0x114   :  { %v762_v18 = vld [vmem:[#allocation2 + $0x69] sm:$0xff]  ;;  %590 = vst.msk [vmem:[#allocation2 + $0x78] sm:$0xff] %vm574_vm2, %v2966_v16  ;;  %2695 = vmatmul.msk.f32.gmra.mxu3 %vm574_vm2, %v608_v17 }
 0x115   :  { %v932_v19 = vld [vmem:[#allocation2 + $0x6a] sm:$0xff]  ;;  %2720 = vmatmul.msk.f32.gmra.mxu0 %vm574_vm2, %v762_v18 }
 0x116   :  { %2746 = vmatmul.msk.f32.gmra.mxu1 %vm574_vm2, %v932_v19 }
 0x11b   :  { %v609_v21 = vld [vmem:[#allocation2 + $0x78] sm:$0xff] }
 0x11c   :  { %v763_v22 = vld [vmem:[#allocation2 + $0x71] sm:$0xff]  ;;  %2696 = vmatmul.msk.f32.gmra.mxu3 %vm574_vm2, %v609_v21  ;;  %v764_v26 = vld [vmem:[#allocation2 + $0x79] sm:$0xff] }
 0x11d   :  { %v933_v23 = vld [vmem:[#allocation2 + $0x72] sm:$0xff]  ;;  %2721 = vmatmul.msk.f32.gmra.mxu0 %vm574_vm2, %v763_v22  ;;  %v934_v27 = vld [vmem:[#allocation2 + $0x7a] sm:$0xff] }
 0x11e   :  { %2747 = vmatmul.msk.f32.gmra.mxu1 %vm574_vm2, %v933_v23 }
 0x124   :  { %2697 = vmatmul.msk.f32.gmra.mxu3 %vm574_vm2, %v610_v25 }
 0x125   :  { %2722 = vmatmul.msk.f32.gmra.mxu0 %vm574_vm2, %v764_v26 }
 0x126   :  { %2748 = vmatmul.msk.f32.gmra.mxu1 %vm574_vm2, %v934_v27 }
 0x127   :  { %v695_v32 = vpop.f32.mrf.mxu3 }
 0x128   :  { %v696_v33 = vadd.f32 %v3760_v28, %v695_v32 }
 0x12a   :  { %v847_v34 = vpop.f32.mrf.mxu0 }
 0x12b   :  { %v901_v35 = vadd.f32 %v847_v34, %v696_v33  ;;  %v1017_v36 = vpop.f32.mrf.mxu1 }
 0x12c   :  { %2698 = vmatmul.msk.f32.gmra.mxu3 %vm574_vm2, %v611_v37 }
 0x12d   :  { %v1071_v39 = vadd.f32 %v1017_v36, %v901_v35  ;;  %2723 = vmatmul.msk.f32.gmra.mxu0 %vm574_vm2, %v765_v38 }
 0x12e   :  { %2749 = vmatmul.msk.f32.gmra.mxu1 %vm574_vm2, %v935_v40 }
 0x12f   :  { %2967 = vtanh.f32 %v1071_v39  ;;  %v698_v41 = vpop.f32.mrf.mxu3 }
 0x130   :  { %v699_v42 = vadd.f32 %v3760_v28, %v698_v41 }
 0x132   :  { %v850_v43 = vpop.f32.mrf.mxu0 }
 0x133   :  { %v902_v44 = vadd.f32 %v850_v43, %v699_v42  ;;  %v1020_v45 = vpop.f32.mrf.mxu1 }
 0x135   :  { %v3768_v47 = vpop.eup %2967  ;;  %v1072_v48 = vadd.f32 %v1020_v45, %v902_v44  ;;  %2724 = vmatmul.msk.f32.gmra.mxu0 %vm574_vm2, %v766_v46 }
 0x136   :  { %2750 = vmatmul.msk.f32.gmra.mxu1 %vm574_vm2, %v936_v49  ;;  %2751 = vmatmul.msk.f32.vlgmr.msrb.gmra.mxu2 %vm1121_vm4, %v3768_v47  ;;  %vm2529_vm2 = vcmask 1042432  }
 0x137   :  { %2969 = vtanh.f32 %v1072_v48  ;;  %v701_v50 = vpop.f32.mrf.mxu3 }
 0x138   :  { %v702_v51 = vadd.f32 %v3760_v28, %v701_v50 }
 0x13a   :  { %v853_v52 = vpop.f32.mrf.mxu0 }
 0x13b   :  { %v903_v53 = vadd.f32 %v853_v52, %v702_v51  ;;  %v1023_v54 = vpop.f32.mrf.mxu1 }
 0x13d   :  { %v3775_v55 = vpop.eup %2969  ;;  %v1073_v56 = vadd.f32 %v1023_v54, %v903_v53 }
 0x13e   :  { %2752 = vmatmul.msk.f32.gmra.mxu2 %vm1121_vm4, %v3775_v55 }
 0x13f   :  { %2971 = vtanh.f32 %v1073_v56  ;;  %v704_v57 = vpop.f32.mrf.mxu3 }
 0x140   :  { %v705_v58 = vadd.f32 %v3760_v28, %v704_v57 }
 0x142   :  { %v856_v59 = vpop.f32.mrf.mxu0 }
 0x143   :  { %v904_v60 = vadd.f32 %v856_v59, %v705_v58  ;;  %v1026_v61 = vpop.f32.mrf.mxu1 }
 0x145   :  { %v3780_v62 = vpop.eup %2971  ;;  %v1074_v63 = vadd.f32 %v1026_v61, %v904_v60 }
 0x146   :  { %2753 = vmatmul.msk.f32.gmra.mxu2 %vm1121_vm4, %v3780_v62 }
 0x147   :  { %2973 = vtanh.f32 %v1074_v63  ;;  %v707_v0 = vpop.f32.mrf.mxu3 }
 0x148   :  { %v708_v1 = vadd.f32 %v3760_v28, %v707_v0 }
 0x14a   :  { %v859_v2 = vpop.f32.mrf.mxu0 }
 0x14b   :  { %v905_v3 = vadd.f32 %v859_v2, %v708_v1  ;;  %v1029_v4 = vpop.f32.mrf.mxu1 }
 0x14d   :  { %v3785_v5 = vpop.eup %2973  ;;  %v1075_v6 = vadd.f32 %v1029_v4, %v905_v3 }
 0x14e   :  { %2754 = vmatmul.msk.f32.gmra.mxu2 %vm1121_vm4, %v3785_v5 }
 0x14f   :  { %2975 = vtanh.f32 %v1075_v6  ;;  %v710_v7 = vpop.f32.mrf.mxu3 }
 0x150   :  { %v711_v8 = vadd.f32 %v3760_v28, %v710_v7 }
 0x152   :  { %v862_v9 = vpop.f32.mrf.mxu0 }
 0x153   :  { %v906_v10 = vadd.f32 %v862_v9, %v711_v8  ;;  %v1032_v11 = vpop.f32.mrf.mxu1 }
 0x155   :  { %v3790_v12 = vpop.eup %2975  ;;  %v1076_v31 = vadd.f32 %v1032_v11, %v906_v10 }
 0x156   :  { %2755 = vmatmul.msk.f32.gmra.mxu2 %vm1121_vm4, %v3790_v12 }
 0x157   :  { %2977 = vtanh.f32 %v1076_v31  ;;  %v713_v13 = vpop.f32.mrf.mxu3 }
 0x158   :  { %v714_v14 = vadd.f32 %v3760_v28, %v713_v13 }
 0x15a   :  { %v865_v15 = vpop.f32.mrf.mxu0 }
 0x15b   :  { %v907_v16 = vadd.f32 %v865_v15, %v714_v14  ;;  %v1035_v17 = vpop.f32.mrf.mxu1 }
 0x15d   :  { %v3795_v18 = vpop.eup %2977  ;;  %v1077_v19 = vadd.f32 %v1035_v17, %v907_v16 }
 0x15e   :  { %2756 = vmatmul.msk.f32.gmra.mxu2 %vm1121_vm4, %v3795_v18 }
 0x15f   :  { %2979 = vtanh.f32 %v1077_v19  ;;  %v716_v20 = vpop.f32.mrf.mxu3 }
 0x160   :  { %v717_v21 = vadd.f32 %v3760_v28, %v716_v20 }
 0x162   :  { %v868_v22 = vpop.f32.mrf.mxu0 }
 0x163   :  { %v908_v23 = vadd.f32 %v868_v22, %v717_v21  ;;  %v1038_v24 = vpop.f32.mrf.mxu1 }
 0x165   :  { %v3800_v25 = vpop.eup %2979  ;;  %v1078_v26 = vadd.f32 %v1038_v24, %v908_v23 }
 0x166   :  { %2757 = vmatmul.msk.f32.gmra.mxu2 %vm1121_vm4, %v3800_v25 }
 0x167   :  { %2981 = vtanh.f32 %v1078_v26  ;;  %v719_v27 = vpop.f32.mrf.mxu3 }
 0x168   :  { %v720_v29 = vadd.f32 %v3760_v28, %v719_v27 }
 0x16a   :  { %v871_v30 = vpop.f32.mrf.mxu0 }
 0x16b   :  { %v909_v32 = vadd.f32 %v871_v30, %v720_v29  ;;  %v1041_v33 = vpop.f32.mrf.mxu1 }
 0x16d   :  { %v3805_v34 = vpop.eup %2981  ;;  %v1079_v35 = vadd.f32 %v1041_v33, %v909_v32 }
 0x16e   :  { %2758 = vmatmul.msk.f32.gmra.mxu2 %vm1121_vm4, %v3805_v34 }
 0x16f   :  { %2983 = vtanh.f32 %v1079_v35  ;;  %v722_v36 = vpop.f32.mrf.mxu3 }
 0x170   :  { %v723_v37 = vadd.f32 %v3760_v28, %v722_v36 }
 0x172   :  { %v874_v38 = vpop.f32.mrf.mxu0 }
 0x173   :  { %v910_v39 = vadd.f32 %v874_v38, %v723_v37  ;;  %v1044_v40 = vpop.f32.mrf.mxu1 }
 0x175   :  { %v3810_v41 = vpop.eup %2983  ;;  %v1080_v42 = vadd.f32 %v1044_v40, %v910_v39 }
 0x176   :  { %2759 = vmatmul.msk.f32.gmra.mxu2 %vm1121_vm4, %v3810_v41 }
 0x177   :  { %2985 = vtanh.f32 %v1080_v42  ;;  %v725_v43 = vpop.f32.mrf.mxu3 }
 0x178   :  { %v726_v44 = vadd.f32 %v3760_v28, %v725_v43 }
 0x17a   :  { %v877_v45 = vpop.f32.mrf.mxu0 }
 0x17b   :  { %v911_v46 = vadd.f32 %v877_v45, %v726_v44  ;;  %v1047_v48 = vpop.f32.mrf.mxu1  ;;  %v3836_v45 = vpop.permute.xlu0 %1118 }
 0x17d   :  { %v3815_v49 = vpop.eup %2985  ;;  %v1081_v50 = vadd.f32 %v1047_v48, %v911_v46 }
 0x17e   :  { %2760 = vmatmul.msk.f32.gmra.mxu2 %vm1121_vm4, %v3815_v49 }
 0x17f   :  { %2987 = vtanh.f32 %v1081_v50  ;;  %v728_v51 = vpop.f32.mrf.mxu3 }
 0x180   :  { %v729_v52 = vadd.f32 %v3760_v28, %v728_v51 }
 0x182   :  { %v880_v53 = vpop.f32.mrf.mxu0 }
 0x183   :  { %v912_v54 = vadd.f32 %v880_v53, %v729_v52  ;;  %v1050_v56 = vpop.f32.mrf.mxu1 }
 0x185   :  { %v3820_v57 = vpop.eup %2987  ;;  %v1082_v58 = vadd.f32 %v1050_v56, %v912_v54 }
 0x186   :  { %2761 = vmatmul.msk.f32.gmra.mxu2 %vm1121_vm4, %v3820_v57 }
 0x187   :  { %2989 = vtanh.f32 %v1082_v58  ;;  %v731_v59 = vpop.f32.mrf.mxu3 }
 0x188   :  { %v732_v60 = vadd.f32 %v3760_v28, %v731_v59 }
 0x18a   :  { %v883_v61 = vpop.f32.mrf.mxu0 }
 0x18b   :  { %v913_v63 = vadd.f32 %v883_v61, %v732_v60  ;;  %v1053_v0 = vpop.f32.mrf.mxu1 }
 0x18d   :  { %v2990_v1 = vpop.eup %2989  ;;  %v1083_v2 = vadd.f32 %v1053_v0, %v913_v63 }
 0x18e   :  { %2762 = vmatmul.msk.f32.gmra.mxu2 %vm1121_vm4, %v2990_v1 }
 0x18f   :  { %2991 = vtanh.f32 %v1083_v2  ;;  %v734_v3 = vpop.f32.mrf.mxu3 }
 0x190   :  { %v735_v4 = vadd.f32 %v3760_v28, %v734_v3 }
 0x192   :  { %v886_v6 = vpop.f32.mrf.mxu0 }
 0x193   :  { %v914_v7 = vadd.f32 %v886_v6, %v735_v4  ;;  %v1056_v8 = vpop.f32.mrf.mxu1 }
 0x195   :  { %v2992_v9 = vpop.eup %2991  ;;  %v1084_v10 = vadd.f32 %v1056_v8, %v914_v7  ;;  %v1562_v8 = vld [vmem:[%s4500_s7 + $0x20] sm:$0xff] }
 0x196   :  { %2763 = vmatmul.msk.f32.gmra.mxu2 %vm1121_vm4, %v2992_v9 }
 0x197   :  { %2993 = vtanh.f32 %v1084_v10  ;;  %v737_v11 = vpop.f32.mrf.mxu3 }
 0x198   :  { %v738_v31 = vadd.f32 %v3760_v28, %v737_v11 }
 0x19a   :  { %v889_v13 = vpop.f32.mrf.mxu0 }
 0x19b   :  { %v915_v14 = vadd.f32 %v889_v13, %v738_v31  ;;  %v1059_v15 = vpop.f32.mrf.mxu1 }
 0x19d   :  { %v2994_v16 = vpop.eup %2993  ;;  %v1085_v17 = vadd.f32 %v1059_v15, %v915_v14 }
 0x19e   :  { %2764 = vmatmul.msk.f32.gmra.mxu2 %vm1121_vm4, %v2994_v16 }
 0x19f   :  { %2995 = vtanh.f32 %v1085_v17  ;;  %v740_v19 = vpop.f32.mrf.mxu3 }
 0x1a0   :  { %v741_v20 = vadd.f32 %v3760_v28, %v740_v19 }
 0x1a2   :  { %v892_v21 = vpop.f32.mrf.mxu0 }
 0x1a3   :  { %v916_v22 = vadd.f32 %v892_v21, %v741_v20  ;;  %v1062_v23 = vpop.f32.mrf.mxu1 }
 0x1a5   :  { %v2996_v24 = vpop.eup %2995  ;;  %v1086_v26 = vadd.f32 %v1062_v23, %v916_v22 }
 0x1a6   :  { %2765 = vmatmul.msk.f32.gmra.mxu2 %vm1121_vm4, %v2996_v24 }
 0x1a7   :  { %2997 = vtanh.f32 %v1086_v26  ;;  %v743_v27 = vpop.f32.mrf.mxu3 }
 0x1a8   :  { %v744_v29 = vadd.f32 %v3760_v28, %v743_v27 }
 0x1aa   :  { %v895_v30 = vpop.f32.mrf.mxu0 }
 0x1ab   :  { %v917_v32 = vadd.f32 %v895_v30, %v744_v29  ;;  %v1065_v33 = vpop.f32.mrf.mxu1  ;;  %v1566_v29 = vld [vmem:[%s4500_s7 + $0x40] sm:$0xff] }
 0x1ad   :  { %v2998_v35 = vpop.eup %2997  ;;  %v1087_v36 = vadd.f32 %v1065_v33, %v917_v32 }
 0x1ae   :  { %2766 = vmatmul.msk.f32.gmra.mxu2 %vm1121_vm4, %v2998_v35  ;;  %1606 = vmatpush.msra.mxu3 %v2998_v35 }
 0x1af   :  { %2999 = vtanh.f32 %v1087_v36  ;;  %v746_v37 = vpop.f32.mrf.mxu3 }
 0x1b0   :  { %1607 = vmatpush.msra.mxu3 %v2996_v24  ;;  %v747_v38 = vadd.f32 %v3760_v28, %v746_v37 }
 0x1b2   :  { %v898_v39 = vpop.f32.mrf.mxu0  ;;  %1608 = vmatpush.msra.mxu3 %v2994_v16  ;;  %v1564_v16 = vld [vmem:[%s4500_s7 + $0x30] sm:$0xff] }
 0x1b3   :  { %v918_v40 = vadd.f32 %v898_v39, %v747_v38  ;;  %v1068_v42 = vpop.f32.mrf.mxu1 }
 0x1b4   :  { %1609 = vmatpush.msra.mxu3 %v2992_v9 }
 0x1b5   :  { %v3000_v43 = vpop.eup %2999  ;;  %v1088_v44 = vadd.f32 %v1068_v42, %v918_v40 }
 0x1b6   :  { %2767 = vmatmul.msk.f32.gmra.mxu2 %vm1121_vm4, %v3000_v43  ;;  %1610 = vmatpush.msra.mxu3 %v2990_v1 }
 0x1b7   :  { %3001 = vtanh.f32 %v1088_v44 }
 0x1b8   :  { %1611 = vmatpush.msra.mxu3 %v3820_v57 }
 0x1b9   :  { %v1193_v46 = vpop.f32.mrf.mxu2 }
 0x1ba   :  { %v1194_v48 = vadd.f32 %v1193_v46, %v3836_v45  ;;  %1612 = vmatpush.msra.mxu3 %v3815_v49  ;;  %v1568_v46 = vld [vmem:[%s4500_s7 + $0x50] sm:$0xff] }
 0x1bc   :  { %v1247_v28 = vsub.f32 0.0, %v1194_v48  ;;  %1613 = vmatpush.msra.mxu3 %v3810_v41 }
 0x1bd   :  { %v3002_v50 = vpop.eup %3001 }
 0x1be   :  { %v1265_v51 = vmul.f32 1.442695, %v1247_v28  ;;  %2768 = vmatmul.msk.f32.gmra.mxu2 %vm1121_vm4, %v3002_v50  ;;  %1614 = vmatpush.msra.mxu3 %v3805_v34 }
 0x1c0   :  { %1615 = vmatpush.msra.mxu3 %v3800_v25  ;;  %3003 = vpow2.f32 %v1265_v51  ;;  %v1558_v25 = vld [vmem:[%s4500_s7] sm:$0xff] }
 0x1c1   :  { %v1196_v52 = vpop.f32.mrf.mxu2 }
 0x1c2   :  { %v1197_v53 = vadd.f32 %v1196_v52, %v3836_v45  ;;  %1616 = vmatpush.msra.mxu3 %v3795_v18 }
 0x1c4   :  { %v1248_v54 = vsub.f32 0.0, %v1197_v53  ;;  %1617 = vmatpush.msra.mxu3 %v3790_v12 }
 0x1c6   :  { %v1267_v49 = vmul.f32 1.442695, %v1248_v54  ;;  %1618 = vmatpush.msra.mxu3 %v3785_v5  ;;  %v3004_v41 = vpop.eup %3003 }
 0x1c7   :  { %v1301_v18 = vadd.f32 1.0, %v3004_v41 }
 0x1c8   :  { %3005 = vpow2.f32 %v1267_v49  ;;  %1619 = vmatpush.msra.mxu3 %v3780_v62  ;;  %v1570_v49 = vld [vmem:[%s4500_s7 + $0x60] sm:$0xff] }
 0x1c9   :  { %v1199_v56 = vpop.f32.mrf.mxu2  ;;  %3007 = vrcp.f32 %v1301_v18 }
 0x1ca   :  { %v1200_v34 = vadd.f32 %v1199_v56, %v3836_v45  ;;  %1620 = vmatpush.msra.mxu3 %v3775_v55  ;;  %v23_v55 = vstv %s4501_s13 }
 0x1cb   :  { %24 = vst [vmem:[#allocation6] sm:$0x1] %v23_v55 }
 0x1cc   :  { %v1249_v57 = vsub.f32 0.0, %v1200_v34  ;;  %1621 = vmatpush.msra.mxu3 %v3768_v47  ;;  %v1560_v47 = vld [vmem:[%s4500_s7 + $0x10] sm:$0xff] }
 0x1cd   :  { %1622 = vmatmul.f32.vlgmr.msra.gmra.mxu3 %v1558_v25 }
 0x1ce   :  { %v3006_v5 = vpop.eup %3005  ;;  %v1269_v12 = vmul.f32 1.442695, %v1249_v57  ;;  %2769 = vmatpush.msk.msrb.mxu3 %vm1388_vm5, %v3002_v50 }
 0x1cf   :  { %v1302_v62 = vadd.f32 1.0, %v3006_v5  ;;  %v3864_v61 = vpop.eup %3007 }
 0x1d0   :  { %1665 = vmatpush.msrb.mxu3 %v3000_v43  ;;  %v1338_v2 = vsel %vm1337_vm6, %v3864_v61, 0.0 }
 0x1d1   :  { %3009 = vrcp.f32 %v1302_v62  ;;  %v1202_v58 = vpop.f32.mrf.mxu2 }
 0x1d2   :  { %3011 = vpow2.f32 %v1269_v12  ;;  %v1203_v59 = vadd.f32 %v1202_v58, %v3836_v45  ;;  %v2928_v4 = vld [vmem:[#allocation6] ss:$0 sm:$0xff] }
 0x1d3   :  { %2310 = vperm.xlu0 %2924, %v2928_v4  }
 0x1d4   :  { %v1250_v60 = vsub.f32 0.0, %v1203_v59 }
 0x1d5   :  { %1625 = vmatmul.f32.gmra.mxu3 %v1560_v47  ;;  %v1572_v47 = vld [vmem:[%s4500_s7 + $0x70] sm:$0xff] }
 0x1d6   :  { %v1271_v63 = vmul.f32 1.442695, %v1250_v60 }
 0x1d7   :  { %v3866_v0 = vpop.eup %3009 }
 0x1d8   :  { %v3012_v1 = vpop.eup %3011  ;;  %3013 = vpow2.f32 %v1271_v63  ;;  %v1340_v3 = vsel %vm1339_vm7, %v3866_v0, 0.0 }
 0x1d9   :  { %v1205_v6 = vpop.f32.mrf.mxu2  ;;  %v1341_v7 = vadd.f32 %v1340_v3, %v1338_v2  ;;  %v1303_v9 = vadd.f32 1.0, %v3012_v1 }
 0x1da   :  { %v1206_v10 = vadd.f32 %v1205_v6, %v3836_v45 }
 0x1db   :  { %1342 = vadd.xlane.f32.xlu1 %v1341_v7  ;;  %3015 = vrcp.f32 %v1303_v9 }
 0x1dc   :  { %v1251_v13 = vsub.f32 0.0, %v1206_v10 }
 0x1dd   :  { %1628 = vmatmul.f32.gmra.mxu3 %v1562_v8 }
 0x1de   :  { %v3014_v11 = vpop.eup %3013  ;;  %v1273_v17 = vmul.f32 1.442695, %v1251_v13 }
 0x1df   :  { %v1304_v31 = vadd.f32 1.0, %v3014_v11  ;;  %v1574_v11 = vld [vmem:[%s4500_s7 + $0x80] sm:$0xff] }
 0x1e1   :  { %3017 = vrcp.f32 %v1304_v31  ;;  %v1208_v14 = vpop.f32.mrf.mxu2  ;;  %v3880_v20 = vpop.eup %3015 }
 0x1e2   :  { %v1209_v15 = vadd.f32 %v1208_v14, %v3836_v45  ;;  %3019 = vpow2.f32 %v1273_v17  ;;  %v1360_v23 = vrot.slane %v3880_v20, 2 }
 0x1e4   :  { %v1252_v19 = vsub.f32 0.0, %v1209_v15 }
 0x1e5   :  { %1631 = vmatmul.f32.gmra.mxu3 %v1564_v16 }
 0x1e6   :  { %v1275_v21 = vmul.f32 1.442695, %v1252_v19 }
 0x1e7   :  { %v3882_v22 = vpop.eup %3017 }
 0x1e8   :  { %3021 = vpow2.f32 %v1275_v21  ;;  %v1361_v24 = vrot.slane %v3882_v22, 2  ;;  %v3020_v37 = vpop.eup %3019 }
 0x1e9   :  { %v1211_v26 = vpop.f32.mrf.mxu2  ;;  %v1305_v42 = vadd.f32 1.0, %v3020_v37 }
 0x1ea   :  { %v1212_v27 = vadd.f32 %v1211_v26, %v3836_v45  ;;  %v1362_v30 = vsel %vm137_vm0, %v1360_v23, %v1361_v24  ;;  %v1366_v32 = vsel %vm1339_vm7, %v1361_v24, 0.0  ;;  %v1559_v26 = vld [vmem:[%s4500_s7 + $0x8] sm:$0xff] }
 0x1eb   :  { %v1365_v33 = vsel %vm1337_vm6, %v1362_v30, 0.0 }
 0x1ec   :  { %v1253_v35 = vsub.f32 0.0, %v1212_v27  ;;  %v1367_v36 = vadd.f32 %v1366_v32, %v1365_v33 }
 0x1ed   :  { %1634 = vmatmul.f32.gmra.mxu3 %v1566_v29 }
 0x1ee   :  { %v3022_v38 = vpop.eup %3021  ;;  %v1277_v39 = vmul.f32 1.442695, %v1253_v35  ;;  %1368 = vadd.xlane.f32.xlu1 %v1367_v36 }
 0x1ef   :  { %v1306_v40 = vadd.f32 1.0, %v3022_v38 }
 0x1f0   :  { %3023 = vpow2.f32 %v1277_v39 }
 0x1f1   :  { %v1214_v43 = vpop.f32.mrf.mxu2  ;;  %3025 = vrcp.f32 %v1306_v40 }
 0x1f2   :  { %v1215_v44 = vadd.f32 %v1214_v43, %v3836_v45  ;;  %3027 = vrcp.f32 %v1305_v42  ;;  %v1561_v42 = vld [vmem:[%s4500_s7 + $0x18] sm:$0xff] }
 0x1f4   :  { %v1254_v48 = vsub.f32 0.0, %v1215_v44 }
 0x1f5   :  { %1637 = vmatmul.f32.gmra.mxu3 %v1568_v46 }
 0x1f6   :  { %v3024_v28 = vpop.eup %3023  ;;  %v1279_v50 = vmul.f32 1.442695, %v1254_v48 }
 0x1f7   :  { %v1307_v51 = vadd.f32 1.0, %v3024_v28  ;;  %v3897_v52 = vpop.eup %3025 }
 0x1f8   :  { %3029 = vpow2.f32 %v1279_v50  ;;  %v3903_v41 = vpop.eup %3027  ;;  %v1390_v34 = vrot.slane %v3897_v52, 4 }
 0x1f9   :  { %3031 = vrcp.f32 %v1307_v51  ;;  %v1217_v53 = vpop.f32.mrf.mxu2  ;;  %v1389_v57 = vrot.slane %v3903_v41, 4 }
 0x1fa   :  { %v1218_v54 = vadd.f32 %v1217_v53, %v3836_v45 }
 0x1fb   :  { %v1391_v62 = vsel %vm1388_vm5, %v1389_v57, %v1390_v34 }
 0x1fc   :  { %v1255_v56 = vsub.f32 0.0, %v1218_v54  ;;  %v1396_v63 = vsel %vm1337_vm6, %v1391_v62, 0.0 }
 0x1fd   :  { %1640 = vmatmul.f32.gmra.mxu3 %v1570_v49  ;;  %v1563_v49 = vld [vmem:[%s4500_s7 + $0x28] sm:$0xff] }
 0x1fe   :  { %v3030_v25 = vpop.eup %3029  ;;  %v1281_v18 = vmul.f32 1.442695, %v1255_v56 }
 0x1ff   :  { %v3907_v5 = vpop.eup %3031  ;;  %v1308_v12 = vadd.f32 1.0, %v3030_v25 }
 0x200   :  { %3033 = vpow2.f32 %v1281_v18  ;;  %v1392_v55 = vrot.slane %v3907_v5, 4  ;;  %v1422_v15 = vrot.slane %v3907_v5, 6 }
 0x201   :  { %v1220_v58 = vpop.f32.mrf.mxu2  ;;  %3035 = vrcp.f32 %v1308_v12 }
 0x202   :  { %v1221_v59 = vadd.f32 %v1220_v58, %v3836_v45  ;;  %v1393_v60 = vsel %vm1388_vm5, %v1390_v34, %v1392_v55  ;;  %v1565_v55 = vld [vmem:[%s4500_s7 + $0x38] sm:$0xff] }
 0x203   :  { %v1397_v1 = vsel %vm1339_vm7, %v1393_v60, 0.0 }
 0x204   :  { %v1256_v2 = vsub.f32 0.0, %v1221_v59  ;;  %v1398_v3 = vadd.f32 %v1397_v1, %v1396_v63 }
 0x205   :  { %1643 = vmatmul.f32.gmra.mxu3 %v1572_v47 }
 0x206   :  { %v3034_v4 = vpop.eup %3033  ;;  %v1283_v6 = vmul.f32 1.442695, %v1256_v2  ;;  %1399 = vadd.xlane.f32.xlu2 %v1398_v3 }
 0x207   :  { %v1309_v7 = vadd.f32 1.0, %v3034_v4  ;;  %v3918_v8 = vpop.eup %3035 }
 0x208   :  { %v1423_v13 = vrot.slane %v3918_v8, 6 }
 0x209   :  { %3037 = vrcp.f32 %v1309_v7  ;;  %v1223_v9 = vpop.f32.mrf.mxu2 }
 0x20a   :  { %3039 = vpow2.f32 %v1283_v6  ;;  %v1224_v10 = vadd.f32 %v1223_v9, %v3836_v45  ;;  %v1424_v19 = vsel %vm1421_vm8, %v1422_v15, %v1423_v13  ;;  %v1567_v6 = vld [vmem:[%s4500_s7 + $0x48] sm:$0xff] }
 0x20b   :  { %v1429_v30 = vsel %vm1337_vm6, %v1424_v19, 0.0 }
 0x20c   :  { %v1257_v31 = vsub.f32 0.0, %v1224_v10 }
 0x20d   :  { %1646 = vmatmul.f32.gmra.mxu3 %v1574_v11 }
 0x20e   :  { %v1285_v14 = vmul.f32 1.442695, %v1257_v31 }
 0x20f   :  { %v3926_v16 = vpop.eup %3037 }
 0x210   :  { %v3040_v17 = vpop.eup %3039  ;;  %3041 = vpow2.f32 %v1285_v14  ;;  %v1425_v21 = vrot.slane %v3926_v16, 6 }
 0x211   :  { %v1226_v23 = vpop.f32.mrf.mxu2  ;;  %v1310_v29 = vadd.f32 1.0, %v3040_v17 }
 0x212   :  { %v1227_v24 = vadd.f32 %v1226_v23, %v3836_v45  ;;  %v1426_v27 = vsel %vm1421_vm8, %v1423_v13, %v1425_v21 }
 0x213   :  { %v1430_v32 = vsel %vm1339_vm7, %v1426_v27, 0.0  ;;  %3043 = vrcp.f32 %v1310_v29 }
 0x214   :  { %v1258_v33 = vsub.f32 0.0, %v1227_v24  ;;  %v1431_v35 = vadd.f32 %v1430_v32, %v1429_v30  ;;  %v1569_v24 = vld [vmem:[%s4500_s7 + $0x58] sm:$0xff] }
 0x215   :  { %2770 = vmatmul.msk.f32.vlgmr.msrb.gmra.mxu3 %vm1576_vm9, %v1559_v26 }
 0x216   :  { %v3042_v36 = vpop.eup %3041  ;;  %v1287_v37 = vmul.f32 1.442695, %v1258_v33  ;;  %1432 = vadd.xlane.f32.xlu2 %v1431_v35 }
 0x217   :  { %v1311_v38 = vadd.f32 1.0, %v3042_v36  ;;  %v1571_v36 = vld [vmem:[%s4500_s7 + $0x68] sm:$0xff] }
 0x219   :  { %3045 = vrcp.f32 %v1311_v38  ;;  %v1229_v39 = vpop.f32.mrf.mxu2  ;;  %v3942_v44 = vpop.eup %3043 }
 0x21a   :  { %3047 = vpow2.f32 %v1287_v37  ;;  %v1230_v40 = vadd.f32 %v1229_v39, %v3836_v45  ;;  %v1452_v50 = vsel %vm1337_vm6, %v3942_v44, 0.0 }
 0x21c   :  { %v1259_v43 = vsub.f32 0.0, %v1230_v40 }
 0x21d   :  { %2771 = vmatmul.msk.f32.gmra.mxu3 %vm1576_vm9, %v1561_v42 }
 0x21e   :  { %v1289_v46 = vmul.f32 1.442695, %v1259_v43 }
 0x21f   :  { %v3945_v48 = vpop.eup %3045 }
 0x220   :  { %v3048_v28 = vpop.eup %3047  ;;  %3049 = vpow2.f32 %v1289_v46  ;;  %v1453_v51 = vsel %vm1339_vm7, %v3945_v48, 0.0 }
 0x221   :  { %v1232_v53 = vpop.f32.mrf.mxu2  ;;  %v1454_v54 = vadd.f32 %v1453_v51, %v1452_v50  ;;  %v1312_v56 = vadd.f32 1.0, %v3048_v28  ;;  %v1573_v51 = vld [vmem:[%s4500_s7 + $0x78] sm:$0xff] }
 0x222   :  { %v1233_v34 = vadd.f32 %v1232_v53, %v3836_v45 }
 0x223   :  { %1455 = vadd.xlane.f32.xlu0 %v1454_v54  ;;  %3051 = vrcp.f32 %v1312_v56 }
 0x224   :  { %v1260_v57 = vsub.f32 0.0, %v1233_v34 }
 0x225   :  { %2772 = vmatmul.msk.f32.gmra.mxu3 %vm1576_vm9, %v1563_v49 }
 0x226   :  { %v3050_v25 = vpop.eup %3049  ;;  %v1291_v58 = vmul.f32 1.442695, %v1260_v57 }
 0x227   :  { %v1313_v18 = vadd.f32 1.0, %v3050_v25 }
 0x229   :  { %3053 = vrcp.f32 %v1313_v18  ;;  %v1235_v12 = vpop.f32.mrf.mxu2  ;;  %v3960_v47 = vpop.eup %3051 }
 0x22a   :  { %v1236_v62 = vadd.f32 %v1235_v12, %v3836_v45  ;;  %3055 = vpow2.f32 %v1291_v58  ;;  %v1473_v1 = vrot.slane %v3960_v47, 2  ;;  %v1575_v58 = vld [vmem:[%s4500_s7 + $0x88] sm:$0xff] }
 0x22c   :  { %v1261_v59 = vsub.f32 0.0, %v1236_v62 }
 0x22d   :  { %2773 = vmatmul.msk.f32.gmra.mxu3 %vm1576_vm9, %v1565_v55 }
 0x22e   :  { %v1293_v60 = vmul.f32 1.442695, %v1261_v59 }
 0x22f   :  { %v3963_v63 = vpop.eup %3053 }
 0x230   :  { %3057 = vpow2.f32 %v1293_v60  ;;  %v1474_v2 = vrot.slane %v3963_v63, 2  ;;  %v3056_v13 = vpop.eup %3055 }
 0x231   :  { %v1238_v3 = vpop.f32.mrf.mxu2  ;;  %v1314_v19 = vadd.f32 1.0, %v3056_v13 }
 0x232   :  { %v1239_v4 = vadd.f32 %v1238_v3, %v3836_v45  ;;  %v1475_v7 = vsel %vm137_vm0, %v1473_v1, %v1474_v2  ;;  %v1479_v9 = vsel %vm1339_vm7, %v1474_v2, 0.0  ;;  %vm2313_vm0 = vcmask 326656  }
 0x233   :  { %v1478_v10 = vsel %vm1337_vm6, %v1475_v7, 0.0 }
 0x234   :  { %v1262_v11 = vsub.f32 0.0, %v1239_v4  ;;  %v1480_v31 = vadd.f32 %v1479_v9, %v1478_v10 }
 0x235   :  { %2774 = vmatmul.msk.f32.gmra.mxu3 %vm1576_vm9, %v1567_v6 }
 0x236   :  { %v3058_v14 = vpop.eup %3057  ;;  %v1295_v15 = vmul.f32 1.442695, %v1262_v11  ;;  %1481 = vadd.xlane.f32.xlu1 %v1480_v31 }
 0x237   :  { %v1315_v17 = vadd.f32 1.0, %v3058_v14 }
 0x238   :  { %3059 = vpow2.f32 %v1295_v15 }
 0x239   :  { %v1241_v21 = vpop.f32.mrf.mxu2  ;;  %3061 = vrcp.f32 %v1315_v17 }
 0x23a   :  { %v1242_v23 = vadd.f32 %v1241_v21, %v3836_v45  ;;  %3063 = vrcp.f32 %v1314_v19 }
 0x23c   :  { %v1263_v26 = vsub.f32 0.0, %v1242_v23 }
 0x23d   :  { %2775 = vmatmul.msk.f32.gmra.mxu3 %vm1576_vm9, %v1569_v24 }
 0x23e   :  { %v3060_v27 = vpop.eup %3059  ;;  %v1297_v29 = vmul.f32 1.442695, %v1263_v26 }
 0x23f   :  { %v1316_v30 = vadd.f32 1.0, %v3060_v27  ;;  %v3980_v32 = vpop.eup %3061 }
 0x240   :  { %3065 = vpow2.f32 %v1297_v29  ;;  %v3986_v37 = vpop.eup %3063  ;;  %v1501_v39 = vrot.slane %v3980_v32, 4 }
 0x241   :  { %3067 = vrcp.f32 %v1316_v30  ;;  %v1244_v33 = vpop.f32.mrf.mxu2  ;;  %v1500_v43 = vrot.slane %v3986_v37, 4 }
 0x242   :  { %v1245_v35 = vadd.f32 %v1244_v33, %v3836_v45  ;;  %v1718_v33 = vld [vmem:[%s4502_s8 + $0x30] sm:$0xff] }
 0x243   :  { %v1502_v45 = vsel %vm1388_vm5, %v1500_v43, %v1501_v39  ;;  %1759 = vmatpush.msra.mxu0 %v1718_v33  ;;  %v1716_v43 = vld [vmem:[%s4502_s8 + $0x20] sm:$0xff] }
 0x244   :  { %v1264_v38 = vsub.f32 0.0, %v1245_v35  ;;  %v1507_v54 = vsel %vm1337_vm6, %v1502_v45, 0.0  ;;  %v1715_v45 = vld [vmem:[%s4502_s8 + $0x18] sm:$0xff] }
 0x245   :  { %2776 = vmatmul.msk.f32.gmra.mxu3 %vm1576_vm9, %v1571_v36  ;;  %v1717_v36 = vld [vmem:[%s4502_s8 + $0x28] sm:$0xff] }
 0x246   :  { %v3066_v40 = vpop.eup %3065  ;;  %v1299_v42 = vmul.f32 1.442695, %v1264_v38  ;;  %1760 = vmatpush.msra.mxu0 %v1717_v36 }
 0x247   :  { %v3991_v46 = vpop.eup %3067  ;;  %v1317_v28 = vadd.f32 1.0, %v3066_v40  ;;  %v2810_v40 = vld [vmem:[%s4502_s8 + $0xa0] sm:$0xff] }
 0x248   :  { %3069 = vpow2.f32 %v1299_v42  ;;  %v1503_v50 = vrot.slane %v3991_v46, 4  ;;  %v1530_v2 = vrot.slane %v3991_v46, 6  ;;  %v2794_v42 = vld [vmem:[%s4502_s8 + $0x68] sm:$0xff]  ;;  %1944 = vmatpush.msra.mxu2 %v2810_v40  ;;  %1761 = vmatpush.msra.mxu0 %v1716_v43 }
 0x249   :  { %3071 = vrcp.f32 %v1317_v28  ;;  %1847 = vmatpush.msra.mxu1 %v2794_v42 }
 0x24a   :  { %v1504_v53 = vsel %vm1388_vm5, %v1501_v39, %v1503_v50  ;;  %1762 = vmatpush.msra.mxu0 %v1715_v45 }
 0x24b   :  { %v1508_v49 = vsel %vm1339_vm7, %v1504_v53, 0.0 }
 0x24c   :  { %v1509_v56 = vadd.f32 %v1508_v49, %v1507_v54  ;;  %v2809_v49 = vld [vmem:[%s4502_s8 + $0x98] sm:$0xff] }
 0x24d   :  { %2777 = vmatmul.msk.f32.gmra.mxu3 %vm1576_vm9, %v1573_v51  ;;  %v1714_v51 = vld [vmem:[%s4502_s8 + $0x10] sm:$0xff]  ;;  %1945 = vmatpush.msra.mxu2 %v2809_v49 }
 0x24e   :  { %v3070_v34 = vpop.eup %3069  ;;  %1510 = vadd.xlane.f32.xlu2 %v1509_v56  ;;  %v1343_v25 = vpop.xlane.xlu1 %1342  ;;  %v2793_v56 = vld [vmem:[%s4502_s8 + $0x60] sm:$0xff]  ;;  %1763 = vmatpush.msra.mxu0 %v1714_v51 }
 0x24f   :  { %v1318_v18 = vadd.f32 1.0, %v3070_v34  ;;  %v1344_v57 = vrot.slane %v1343_v25, 4  ;;  %v4004_v62 = vpop.eup %3071  ;;  %v1713_v34 = vld [vmem:[%s4502_s8 + $0x8] sm:$0xff]  ;;  %1848 = vmatpush.msra.mxu1 %v2793_v56 }
 0x250   :  { %v4002_v12 = vpop.f32.mrf.mxu3  ;;  %v1531_v60 = vrot.slane %v4004_v62, 6  ;;  %1764 = vmatpush.msra.mxu0 %v1713_v34 }
 0x251   :  { %3073 = vrcp.f32 %v1318_v18  ;;  %v1345_v55 = vadd.f32 %v1344_v57, %v1343_v25  ;;  %v2808_v18 = vld [vmem:[%s4502_s8 + $0x90] sm:$0xff]  ;;  %v2792_v57 = vld [vmem:[%s4502_s8 + $0x58] sm:$0xff] }
 0x252   :  { %v1532_v7 = vsel %vm1421_vm8, %v1530_v2, %v1531_v60  ;;  %1946 = vmatpush.msra.mxu2 %v2808_v18  ;;  %1849 = vmatpush.msra.mxu1 %v2792_v57  ;;  %v2790_v2 = vld [vmem:[%s4502_s8 + $0x48] sm:$0xff] }
 0x253   :  { %v1346_v59 = vrot.slane %v1345_v55, 2  ;;  %v1537_v31 = vsel %vm1337_vm6, %v1532_v7, 0.0  ;;  %v2805_v7 = vld [vmem:[%s4502_s8 + $0x78] sm:$0xff] }
 0x255   :  { %2778 = vmatmul.msk.f32.gmra.mxu3 %vm1576_vm9, %v1575_v58  ;;  %v1347_v1 = vadd.f32 %v1346_v59, %v1345_v55  ;;  %v1712_v55 = vld [vmem:[%s4502_s8] sm:$0xff]  ;;  %v2807_v59 = vld [vmem:[%s4502_s8 + $0x88] sm:$0xff]  ;;  %vm2549_vm9 = vcmask 39941  }
 0x256   :  { %1765 = vmatpush.msra.mxu0 %v1712_v55  ;;  %1947 = vmatpush.msra.mxu2 %v2807_v59 }
 0x257   :  { %v4012_v3 = vpop.eup %3073  ;;  %v1348_v4 = vrot.slane %v1347_v1, 1 }
 0x258   :  { %v4014_v6 = vpop.f32.mrf.mxu3  ;;  %v1533_v9 = vrot.slane %v4012_v3, 6 }
 0x259   :  { %v1349_v10 = vadd.f32 %v1348_v4, %v1347_v1  ;;  %v2806_v1 = vld [vmem:[%s4502_s8 + $0x80] sm:$0xff] }
 0x25a   :  { %v1534_v11 = vsel %vm1421_vm8, %v1531_v60, %v1533_v9  ;;  %v2791_v60 = vld [vmem:[%s4502_s8 + $0x50] sm:$0xff]  ;;  %1948 = vmatpush.msra.mxu2 %v2806_v1  ;;  %v2789_v9 = vld [vmem:[%s4502_s8 + $0x40] sm:$0xff] }
 0x25b   :  { %2891 = vpush %v1349_v10  ;;  %v1538_v13 = vsel %vm1339_vm7, %v1534_v11, 0.0  ;;  %1850 = vmatpush.msra.mxu1 %v2791_v60 }
 0x25c   :  { %v1539_v14 = vadd.f32 %v1538_v13, %v1537_v31  ;;  %1949 = vmatpush.msra.mxu2 %v2805_v7  ;;  %v2804_v31 = vld [vmem:[%s4502_s8 + $0x70] sm:$0xff]  ;;  %v2788_v13 = vld [vmem:[%s4502_s8 + $0x38] sm:$0xff] }
 0x25d   :  { %1851 = vmatpush.msra.mxu1 %v2790_v2 }
 0x25e   :  { %1540 = vadd.xlane.f32.xlu1 %v1539_v14  ;;  %1950 = vmatpush.msra.mxu2 %v2804_v31 }
 0x25f   :  { %1852 = vmatpush.msra.mxu1 %v2789_v9 }
 0x260   :  { %v4021_v15 = vpop.f32.mrf.mxu3 }
 0x261   :  { %v1369_v17 = vpop.xlane.xlu1 %1368  ;;  %1853 = vmatpush.msra.mxu1 %v2788_v13 }
 0x262   :  { %v1370_v19 = vrot.slane %v1369_v17, 4 }
 0x264   :  { %v1371_v21 = vadd.f32 %v1370_v19, %v1369_v17  ;;  %v4096_v17 = vpop.permute.xlu0 %2310 }
 0x266   :  { %v1372_v23 = vrot.slane %v1371_v21, 2 }
 0x268   :  { %v4023_v24 = vpop.f32.mrf.mxu3  ;;  %v1373_v26 = vadd.f32 %v1372_v23, %v1371_v21 }
 0x26a   :  { %v1374_v27 = vrot.slane %v1373_v26, 1 }
 0x26c   :  { %v1375_v29 = vadd.f32 %v1374_v27, %v1373_v26 }
 0x26e   :  { %2893 = vpush %v1375_v29 }
 0x270   :  { %v4025_v30 = vpop.f32.mrf.mxu3 }
 0x278   :  { %v4030_v35 = vpop.f32.mrf.mxu3 }
 0x279   :  { %v1400_v38 = vpop.xlane.xlu2 %1399 }
 0x27a   :  { %v1401_v39 = vrot.slane %v1400_v38, 4 }
 0x27c   :  { %v1402_v28 = vadd.f32 %v1401_v39, %v1400_v38 }
 0x27e   :  { %v1403_v50 = vrot.slane %v1402_v28, 2 }
 0x280   :  { %v4050_v53 = vpop.f32.mrf.mxu3  ;;  %v1404_v54 = vadd.f32 %v1403_v50, %v1402_v28 }
 0x282   :  { %v1405_v25 = vrot.slane %v1404_v54, 1 }
 0x284   :  { %v1406_v58 = vadd.f32 %v1405_v25, %v1404_v54 }
 0x286   :  { %2895 = vpush %v1406_v58 }
 0x288   :  { %v4082_v4 = vpop.f32.mrf.mxu3 }
 0x289   :  { %v1433_v10 = vpop.xlane.xlu2 %1432 }
 0x28a   :  { %v1434_v11 = vrot.slane %v1433_v10, 4 }
 0x28c   :  { %v1435_v14 = vadd.f32 %v1434_v11, %v1433_v10  ;;  %s2892_s29 = spop %2891 }
 0x28d   :  { %v1351_v19 = vstv %s2892_s29 }
 0x28e   :  { %v1436_v21 = vrot.slane %v1435_v14, 2  ;;  %3075 = vrcp.f32 %v1351_v19 }
 0x290   :  { %v4098_v23 = vpop.f32.mrf.mxu3  ;;  %v1437_v26 = vadd.f32 %v1436_v21, %v1435_v14 }
 0x292   :  { %v1438_v27 = vrot.slane %v1437_v26, 1 }
 0x294   :  { %v3076_v29 = vpop.eup %3075  ;;  %v1439_v33 = vadd.f32 %v1438_v27, %v1437_v26 }
 0x295   :  { %v1353_v36 = vmul.f32 98.0, %v3076_v29 }
 0x296   :  { %v1456_v38 = vpop.xlane.xlu0 %1455  ;;  %2897 = vpush %v1439_v33 }
 0x297   :  { %v1354_v39 = vmul.f32 %v3864_v61, %v1353_v36  ;;  %v1355_v40 = vmul.f32 %v3866_v0, %v1353_v36  ;;  %v1457_v42 = vrot.slane %v1456_v38, 4 }
 0x298   :  { %v1667_v43 = vpop.f32.mrf.mxu3 }
 0x299   :  { %1356 = vst.msk [vmem:[%s4503_s14] sm:$0xff] %vm1337_vm6, %v1354_v39  ;;  %v1458_v28 = vadd.f32 %v1457_v42, %v1456_v38  ;;  %v1668_v45 = vadd.f32 %v1667_v43, %v4002_v12 }
 0x29a   :  { %1357 = vst.msk [vmem:[%s4503_s14 + $0x8] sm:$0x3f] %vm1339_vm7, %v1355_v40 }
 0x29b   :  { %v1459_v50 = vrot.slane %v1458_v28, 2  ;;  %1694 = vst.msk [vmem:[#allocation3] sm:$0xff] %vm1121_vm4, %v1668_v45 }
 0x29d   :  { %v1460_v61 = vadd.f32 %v1459_v50, %v1458_v28 }
 0x29f   :  { %s2894_s18 = spop %2893  ;;  %v1461_v0 = vrot.slane %v1460_v61, 1 }
 0x2a0   :  { %v1377_v51 = vstv %s2894_s18  ;;  %v1670_v54 = vpop.f32.mrf.mxu3 }
 0x2a1   :  { %3077 = vrcp.f32 %v1377_v51  ;;  %v1671_v49 = vadd.f32 %v1670_v54, %v4014_v6  ;;  %v1462_v56 = vadd.f32 %v1461_v0, %v1460_v61 }
 0x2a2   :  { %v1703_v34 = vld [vmem:[#allocation3] sm:$0xff] }
 0x2a3   :  { %1695 = vst.msk [vmem:[#allocation3 + $0x8] sm:$0xff] %vm1121_vm4, %v1671_v49  ;;  %2779 = vmatmul.msk.f32.vlgmr.msra.gmra.mxu0 %vm1121_vm4, %v1703_v34 }
 0x2a4   :  { %2899 = vpush %v1462_v56 }
 0x2a7   :  { %v3078_v12 = vpop.eup %3077 }
 0x2a8   :  { %v1379_v25 = vmul.f32 98.0, %v3078_v12  ;;  %v1673_v18 = vpop.f32.mrf.mxu3 }
 0x2a9   :  { %v1674_v57 = vadd.f32 %v1673_v18, %v4021_v15  ;;  %v1482_v55 = vpop.xlane.xlu1 %1481 }
 0x2aa   :  { %v1380_v58 = vmul.f32 %v3880_v20, %v1379_v25  ;;  %v1381_v59 = vmul.f32 %v3882_v22, %v1379_v25  ;;  %v1483_v60 = vrot.slane %v1482_v55, 4  ;;  %v1891_v6 = vld [vmem:[#allocation3 + $0x2] sm:$0xff] }
 0x2ab   :  { %v1794_v1 = vld [vmem:[#allocation3 + $0x1] sm:$0xff]  ;;  %1696 = vst.msk [vmem:[#allocation3 + $0x10] sm:$0xff] %vm1121_vm4, %v1674_v57  ;;  %2811 = vmatmul.msk.f32.vlgmr.msra.gmra.mxu2 %vm1121_vm4, %v1891_v6 }
 0x2ac   :  { %v1704_v2 = vld [vmem:[#allocation3 + $0x8] sm:$0xff]  ;;  %2795 = vmatmul.msk.f32.vlgmr.msra.gmra.mxu1 %vm1121_vm4, %v1794_v1  ;;  %1383 = vst.msk [vmem:[%s4503_s14 + $0xc] sm:$0xfc] %vm1382_vm10, %v1380_v58  ;;  %v1484_v15 = vadd.f32 %v1483_v60, %v1482_v55 }
 0x2ad   :  { %2780 = vmatmul.msk.f32.gmra.mxu0 %vm1121_vm4, %v1704_v2  ;;  %1384 = vst.msk [vmem:[%s4503_s14 + $0x14] sm:$0xff] %vm1337_vm6, %v1381_v59 }
 0x2ae   :  { %v1485_v20 = vrot.slane %v1484_v15, 2 }
 0x2b0   :  { %v1676_v22 = vpop.f32.mrf.mxu3  ;;  %v1486_v7 = vadd.f32 %v1485_v20, %v1484_v15 }
 0x2b1   :  { %v1677_v9 = vadd.f32 %v1676_v22, %v4023_v24 }
 0x2b2   :  { %v1892_v10 = vld [vmem:[#allocation3 + $0xa] sm:$0xff]  ;;  %v1487_v11 = vrot.slane %v1486_v7, 1 }
 0x2b3   :  { %v1795_v31 = vld [vmem:[#allocation3 + $0x9] sm:$0xff]  ;;  %1697 = vst.msk [vmem:[#allocation3 + $0x18] sm:$0xff] %vm1121_vm4, %v1677_v9  ;;  %2812 = vmatmul.msk.f32.gmra.mxu2 %vm1121_vm4, %v1892_v10 }
 0x2b4   :  { %v1705_v13 = vld [vmem:[#allocation3 + $0x10] sm:$0xff]  ;;  %2796 = vmatmul.msk.f32.gmra.mxu1 %vm1121_vm4, %v1795_v31  ;;  %v1488_v14 = vadd.f32 %v1487_v11, %v1486_v7 }
 0x2b5   :  { %2781 = vmatmul.msk.f32.gmra.mxu0 %vm1121_vm4, %v1705_v13 }
 0x2b6   :  { %2901 = vpush %v1488_v14 }
 0x2b7   :  { %s2896_s1 = spop %2895 }
 0x2b8   :  { %v1408_v19 = vstv %s2896_s1  ;;  %v1679_v21 = vpop.f32.mrf.mxu3 }
 0x2b9   :  { %3079 = vrcp.f32 %v1408_v19  ;;  %v1680_v24 = vadd.f32 %v1679_v21, %v4025_v30 }
 0x2ba   :  { %v1893_v26 = vld [vmem:[#allocation3 + $0x12] sm:$0xff] }
 0x2bb   :  { %v1796_v27 = vld [vmem:[#allocation3 + $0x11] sm:$0xff]  ;;  %1698 = vst.msk [vmem:[#allocation3 + $0x20] sm:$0xff] %vm1121_vm4, %v1680_v24  ;;  %2813 = vmatmul.msk.f32.gmra.mxu2 %vm1121_vm4, %v1893_v26 }
 0x2bc   :  { %v1706_v29 = vld [vmem:[#allocation3 + $0x18] sm:$0xff]  ;;  %2797 = vmatmul.msk.f32.gmra.mxu1 %vm1121_vm4, %v1796_v27 }
 0x2bd   :  { %2782 = vmatmul.msk.f32.gmra.mxu0 %vm1121_vm4, %v1706_v29 }
 0x2bf   :  { %v3080_v33 = vpop.eup %3079 }
 0x2c0   :  { %v1410_v36 = vmul.f32 98.0, %v3080_v33  ;;  %v1682_v38 = vpop.f32.mrf.mxu3 }
 0x2c1   :  { %v1683_v39 = vadd.f32 %v1682_v38, %v4030_v35  ;;  %v1511_v40 = vpop.xlane.xlu2 %1510 }
 0x2c2   :  { %v1411_v30 = vmul.f32 %v3903_v41, %v1410_v36  ;;  %v1412_v42 = vmul.f32 %v3897_v52, %v1410_v36  ;;  %v1413_v43 = vmul.f32 %v3907_v5, %v1410_v36  ;;  %v1512_v28 = vrot.slane %v1511_v40, 4  ;;  %v1894_v45 = vld [vmem:[#allocation3 + $0x1a] sm:$0xff] }
 0x2c3   :  { %v1797_v50 = vld [vmem:[#allocation3 + $0x19] sm:$0xff]  ;;  %1699 = vst.msk [vmem:[#allocation3 + $0x28] sm:$0xff] %vm1121_vm4, %v1683_v39  ;;  %2814 = vmatmul.msk.f32.gmra.mxu2 %vm1121_vm4, %v1894_v45 }
 0x2c4   :  { %v1707_v61 = vld [vmem:[#allocation3 + $0x20] sm:$0xff]  ;;  %2798 = vmatmul.msk.f32.gmra.mxu1 %vm1121_vm4, %v1797_v50  ;;  %1415 = vst.msk [vmem:[%s4503_s14 + $0x18] sm:$0xf0] %vm1414_vm11, %v1411_v30  ;;  %v1513_v41 = vadd.f32 %v1512_v28, %v1511_v40  ;;  %v2021_v28 = vld [vmem:[%s4506_s10 + $0x28] sm:$0xff] }
 0x2c5   :  { %2783 = vmatmul.msk.f32.gmra.mxu0 %vm1121_vm4, %v1707_v61  ;;  %1416 = vst.msk [vmem:[%s4503_s14 + $0x20] sm:$0xff] %vm1337_vm6, %v1412_v42  ;;  %v2020_v61 = vld [vmem:[%s4506_s10 + $0x20] sm:$0xff] }
 0x2c6   :  { %1418 = vst.msk [vmem:[%s4503_s14 + $0x28] sm:$0x3] %vm1417_vm12, %v1413_v43  ;;  %v1514_v52 = vrot.slane %v1513_v41, 2 }
 0x2c7   :  { %s2898_s6 = spop %2897 }
 0x2c8   :  { %v1441_v35 = vstv %s2898_s6  ;;  %v1685_v0 = vpop.f32.mrf.mxu3  ;;  %v1515_v51 = vadd.f32 %v1514_v52, %v1513_v41 }
 0x2c9   :  { %3081 = vrcp.f32 %v1441_v35  ;;  %v1686_v54 = vadd.f32 %v1685_v0, %v4050_v53  ;;  %v2019_v0 = vld [vmem:[%s4506_s10 + $0x18] sm:$0xff] }
 0x2ca   :  { %v1895_v49 = vld [vmem:[#allocation3 + $0x22] sm:$0xff]  ;;  %v1516_v56 = vrot.slane %v1515_v51, 1 }
 0x2cb   :  { %v1798_v34 = vld [vmem:[#allocation3 + $0x21] sm:$0xff]  ;;  %1700 = vst.msk [vmem:[#allocation3 + $0x30] sm:$0xff] %vm1121_vm4, %v1686_v54  ;;  %2815 = vmatmul.msk.f32.gmra.mxu2 %vm1121_vm4, %v1895_v49  ;;  %v2834_v54 = vld [vmem:[%s4506_s10 + $0x60] sm:$0xff] }
 0x2cc   :  { %v1708_v12 = vld [vmem:[#allocation3 + $0x28] sm:$0xff]  ;;  %2799 = vmatmul.msk.f32.gmra.mxu1 %vm1121_vm4, %v1798_v34  ;;  %v1517_v25 = vadd.f32 %v1516_v56, %v1515_v51  ;;  %v2018_v51 = vld [vmem:[%s4506_s10 + $0x10] sm:$0xff]  ;;  %v2016_v34 = vld [vmem:[%s4506_s10] sm:$0xff] }
 0x2cd   :  { %2784 = vmatmul.msk.f32.gmra.mxu0 %vm1121_vm4, %v1708_v12  ;;  %v2850_v49 = vld [vmem:[%s4506_s10 + $0x98] sm:$0xff] }
 0x2ce   :  { %2903 = vpush %v1517_v25  ;;  %v2833_v12 = vld [vmem:[%s4506_s10 + $0x58] sm:$0xff]  ;;  %v2849_v25 = vld [vmem:[%s4506_s10 + $0x90] sm:$0xff] }
 0x2cf   :  { %v3082_v18 = vpop.eup %3081 }
 0x2d0   :  { %v1443_v57 = vmul.f32 98.0, %v3082_v18  ;;  %v1688_v55 = vpop.f32.mrf.mxu3  ;;  %v2832_v18 = vld [vmem:[%s4506_s10 + $0x50] sm:$0xff] }
 0x2d1   :  { %v1689_v53 = vadd.f32 %v1688_v55, %v4082_v4  ;;  %v1541_v58 = vpop.xlane.xlu1 %1540  ;;  %v2831_v55 = vld [vmem:[%s4506_s10 + $0x48] sm:$0xff] }
 0x2d2   :  { %v1444_v59 = vmul.f32 %v3907_v5, %v1443_v57  ;;  %v1445_v60 = vmul.f32 %v3918_v8, %v1443_v57  ;;  %v1446_v6 = vmul.f32 %v3926_v16, %v1443_v57  ;;  %v1542_v1 = vrot.slane %v1541_v58, 4  ;;  %v1896_v2 = vld [vmem:[#allocation3 + $0x2a] sm:$0xff]  ;;  %v2848_v57 = vld [vmem:[%s4506_s10 + $0x88] sm:$0xff] }
 0x2d3   :  { %v1799_v15 = vld [vmem:[#allocation3 + $0x29] sm:$0xff]  ;;  %1701 = vst.msk [vmem:[#allocation3 + $0x38] sm:$0xff] %vm1121_vm4, %v1689_v53  ;;  %2816 = vmatmul.msk.f32.gmra.mxu2 %vm1121_vm4, %v1896_v2  ;;  %v2845_v2 = vld [vmem:[%s4506_s10 + $0x70] sm:$0xff] }
 0x2d4   :  { %v1709_v20 = vld [vmem:[#allocation3 + $0x30] sm:$0xff]  ;;  %2800 = vmatmul.msk.f32.gmra.mxu1 %vm1121_vm4, %v1799_v15  ;;  %1448 = vst.msk [vmem:[%s4503_s14 + $0x24] sm:$0xc0] %vm1447_vm13, %v1444_v59  ;;  %v1543_v5 = vadd.f32 %v1542_v1, %v1541_v58  ;;  %v2846_v59 = vld [vmem:[%s4506_s10 + $0x78] sm:$0xff] }
 0x2d5   :  { %2785 = vmatmul.msk.f32.gmra.mxu0 %vm1121_vm4, %v1709_v20  ;;  %1449 = vst.msk [vmem:[%s4503_s14 + $0x2c] sm:$0xff] %vm1337_vm6, %v1445_v60  ;;  %s2900_s13 = spop %2899  ;;  %v2847_v53 = vld [vmem:[%s4506_s10 + $0x80] sm:$0xff]  ;;  %v2829_v1 = vld [vmem:[%s4506_s10 + $0x38] sm:$0xff] }
 0x2d6   :  { %1451 = vst.msk [vmem:[%s4503_s14 + $0x34] sm:$0xf] %vm1450_vm14, %v1446_v6  ;;  %v1544_v8 = vrot.slane %v1543_v5, 2  ;;  %v1464_v16 = vstv %s2900_s13  ;;  %v2830_v58 = vld [vmem:[%s4506_s10 + $0x40] sm:$0xff] }
 0x2d7   :  { %3083 = vrcp.f32 %v1464_v16  ;;  %v4305_v60 = vld [vmem:[%s4504_s9] ss:$0 sm:$0xff] }
 0x2d8   :  { %v1691_v4 = vpop.f32.mrf.mxu3  ;;  %v1545_v22 = vadd.f32 %v1544_v8, %v1543_v5 }
 0x2d9   :  { %v1692_v7 = vadd.f32 %v1691_v4, %v4098_v23 }
 0x2da   :  { %v1897_v9 = vld [vmem:[#allocation3 + $0x32] sm:$0xff]  ;;  %v1546_v10 = vrot.slane %v1545_v22, 1 }
 0x2db   :  { %v1800_v11 = vld [vmem:[#allocation3 + $0x31] sm:$0xff]  ;;  %1702 = vst.msk [vmem:[#allocation3 + $0x40] sm:$0xff] %vm1121_vm4, %v1692_v7  ;;  %2817 = vmatmul.msk.f32.gmra.mxu2 %vm1121_vm4, %v1897_v9 }
 0x2dc   :  { %v1710_v31 = vld [vmem:[#allocation3 + $0x38] sm:$0xff]  ;;  %2801 = vmatmul.msk.f32.gmra.mxu1 %vm1121_vm4, %v1800_v11  ;;  %v1547_v13 = vadd.f32 %v1546_v10, %v1545_v22 }
 0x2dd   :  { %2786 = vmatmul.msk.f32.gmra.mxu0 %vm1121_vm4, %v1710_v31  ;;  %v3084_v14 = vpop.eup %3083 }
 0x2de   :  { %v1466_v19 = vmul.f32 98.0, %v3084_v14  ;;  %2905 = vpush %v1547_v13 }
 0x2e0   :  { %v1467_v21 = vmul.f32 %v3942_v44, %v1466_v19  ;;  %v1468_v23 = vmul.f32 %v3945_v48, %v1466_v19 }
 0x2e2   :  { %1469 = vst.msk [vmem:[%s4503_s14 + $0x38] sm:$0xff] %vm1337_vm6, %v1467_v21  ;;  %v1898_v24 = vld [vmem:[#allocation3 + $0x3a] sm:$0xff]  ;;  %v1899_v48 = vld [vmem:[#allocation3 + $0x42] sm:$0x3f] }
 0x2e3   :  { %v1801_v26 = vld [vmem:[#allocation3 + $0x39] sm:$0xff]  ;;  %1470 = vst.msk [vmem:[%s4503_s14 + $0x40] sm:$0x3f] %vm1339_vm7, %v1468_v23  ;;  %2818 = vmatmul.msk.f32.gmra.mxu2 %vm1121_vm4, %v1898_v24  ;;  %v1802_v29 = vld [vmem:[#allocation3 + $0x41] sm:$0x3f]  ;;  %vm2524_vm7 = vcmask 39940  }
 0x2e4   :  { %2802 = vmatmul.msk.f32.gmra.mxu1 %vm1121_vm4, %v1801_v26  ;;  %v1711_v27 = vld [vmem:[#allocation3 + $0x40] sm:$0x3f] }
 0x2e5   :  { %2787 = vmatmul.msk.f32.gmra.mxu0 %vm1121_vm4, %v1711_v27 }
 0x2e7   :  { %s2902_s17 = spop %2901 }
 0x2e8   :  { %v1490_v44 = vstv %s2902_s17 }
 0x2e9   :  { %3085 = vrcp.f32 %v1490_v44 }
 0x2eb   :  { %2819 = vmatmul.msk.f32.gmra.mxu2 %vm1121_vm4, %v1899_v48 }
 0x2ec   :  { %2803 = vmatmul.msk.f32.gmra.mxu1 %vm1121_vm4, %v1802_v29 }
 0x2ef   :  { %v3086_v33 = vpop.eup %3085 }
 0x2f0   :  { %v1492_v36 = vmul.f32 98.0, %v3086_v33 }
 0x2f2   :  { %v1493_v38 = vmul.f32 %v3960_v47, %v1492_v36  ;;  %v1494_v39 = vmul.f32 %v3963_v63, %v1492_v36 }
 0x2f4   :  { %1495 = vst.msk [vmem:[%s4503_s14 + $0x44] sm:$0xfc] %vm1382_vm10, %v1493_v38  ;;  %vm2551_vm10 = vcmask 33792  }
 0x2f5   :  { %1496 = vst.msk [vmem:[%s4503_s14 + $0x4c] sm:$0xff] %vm1337_vm6, %v1494_v39 }
 0x2ff   :  { %s2904_s0 = spop %2903 }
 0x300   :  { %v1519_v40 = vstv %s2904_s0 }
 0x301   :  { %3087 = vrcp.f32 %v1519_v40 }
 0x307   :  { %v3088_v30 = vpop.eup %3087 }
 0x308   :  { %v1521_v42 = vmul.f32 98.0, %v3088_v30 }
 0x30a   :  { %v1522_v43 = vmul.f32 %v3986_v37, %v1521_v42  ;;  %v1523_v47 = vmul.f32 %v3980_v32, %v1521_v42  ;;  %v1524_v63 = vmul.f32 %v3991_v46, %v1521_v42  ;;  %v2022_v32 = vld [vmem:[%s4506_s10 + $0x30] sm:$0xff] }
 0x30b   :  { %2063 = vmatpush.msra.mxu3 %v2022_v32 }
 0x30c   :  { %1525 = vst.msk [vmem:[%s4503_s14 + $0x50] sm:$0xf0] %vm1414_vm11, %v1522_v43  ;;  %vm2573_vm11 = vcmask 39942  }
 0x30d   :  { %1526 = vst.msk [vmem:[%s4503_s14 + $0x58] sm:$0xff] %vm1337_vm6, %v1523_v47  ;;  %2064 = vmatpush.msra.mxu3 %v2021_v28 }
 0x30e   :  { %1527 = vst.msk [vmem:[%s4503_s14 + $0x60] sm:$0x3] %vm1417_vm12, %v1524_v63  ;;  %vm2575_vm12 = vcmask 34816  }
 0x30f   :  { %s2906_s4 = spop %2905  ;;  %2065 = vmatpush.msra.mxu3 %v2020_v61 }
 0x310   :  { %v1549_v37 = vstv %s2906_s4 }
 0x311   :  { %3089 = vrcp.f32 %v1549_v37  ;;  %2066 = vmatpush.msra.mxu3 %v2019_v0 }
 0x313   :  { %2067 = vmatpush.msra.mxu3 %v2018_v51 }
 0x317   :  { %v3090_v45 = vpop.eup %3089 }
 0x318   :  { %v1551_v50 = vmul.f32 98.0, %v3090_v45 }
 0x31a   :  { %v1552_v41 = vmul.f32 %v3991_v46, %v1551_v50  ;;  %v1553_v52 = vmul.f32 %v4004_v62, %v1551_v50  ;;  %v1554_v35 = vmul.f32 %v4012_v3, %v1551_v50  ;;  %v2835_v46 = vld [vmem:[%s4506_s10 + $0x68] sm:$0xff]  ;;  %v2851_v62 = vld [vmem:[%s4506_s10 + $0xa0] sm:$0xff] }
 0x31b   :  { %2151 = vmatpush.msrb.mxu0 %v2835_v46  ;;  %v2017_v3 = vld [vmem:[%s4506_s10 + $0x8] sm:$0xff]  ;;  %2248 = vmatpush.msrb.mxu1 %v2851_v62 }
 0x31c   :  { %1555 = vst.msk [vmem:[%s4503_s14 + $0x5c] sm:$0xc0] %vm1447_vm13, %v1552_v41  ;;  %2068 = vmatpush.msra.mxu3 %v2017_v3  ;;  %vm2598_vm13 = vcmask 39943  }
 0x31d   :  { %1556 = vst.msk [vmem:[%s4503_s14 + $0x64] sm:$0xff] %vm1337_vm6, %v1553_v52  ;;  %2152 = vmatpush.msrb.mxu0 %v2834_v54  ;;  %2249 = vmatpush.msrb.mxu1 %v2850_v49  ;;  %vm2501_vm6 = vcmask 39939  }
 0x31e   :  { %1557 = vst.msk [vmem:[%s4503_s14 + $0x6c] sm:$0xf] %vm1450_vm14, %v1554_v35  ;;  %2069 = vmatpush.msra.mxu3 %v2016_v34  ;;  %vm2600_vm14 = vcmask 35840  }
 0x31f   :  { %2153 = vmatpush.msrb.mxu0 %v2833_v12  ;;  %2250 = vmatpush.msrb.mxu1 %v2849_v25 }
 0x320   :  { %v1767_v56 = vpop.f32.mrf.mxu0 }
 0x321   :  { %2154 = vmatpush.msrb.mxu0 %v2832_v18  ;;  %2251 = vmatpush.msrb.mxu1 %v2848_v57  ;;  %v1768_v20 = vadd.f32 %v4305_v60, %v1767_v56 }
 0x323   :  { %2155 = vmatpush.msrb.mxu0 %v2831_v55  ;;  %2252 = vmatpush.msrb.mxu1 %v2847_v53 }
 0x325   :  { %2156 = vmatpush.msrb.mxu0 %v2830_v58  ;;  %2253 = vmatpush.msrb.mxu1 %v2846_v59 }
 0x327   :  { %2157 = vmatpush.msrb.mxu0 %v2829_v1  ;;  %2254 = vmatpush.msrb.mxu1 %v2845_v2 }
 0x329   :  { %v1855_v6 = vpop.f32.mrf.mxu1 }
 0x32a   :  { %v1770_v15 = vpop.f32.mrf.mxu0  ;;  %v1882_v5 = vadd.f32 %v1855_v6, %v1768_v20 }
 0x32b   :  { %v1771_v7 = vadd.f32 %v4305_v60, %v1770_v15 }
 0x32e   :  { %v1952_v8 = vpop.f32.mrf.mxu2 }
 0x32f   :  { %v1979_v16 = vadd.f32 %v1952_v8, %v1882_v5 }
 0x331   :  { %v1858_v4 = vpop.f32.mrf.mxu1  ;;  %3091 = vtanh.f32 %v1979_v16 }
 0x332   :  { %v1773_v22 = vpop.f32.mrf.mxu0  ;;  %v1883_v9 = vadd.f32 %v1858_v4, %v1771_v7 }
 0x333   :  { %v1774_v19 = vadd.f32 %v4305_v60, %v1773_v22 }
 0x336   :  { %v1955_v10 = vpop.f32.mrf.mxu2 }
 0x337   :  { %v3092_v11 = vpop.eup %3091  ;;  %v1980_v31 = vadd.f32 %v1955_v10, %v1883_v9 }
 0x338   :  { %1997 = vst.msk [vmem:[#allocation4] sm:$0xff] %vm1121_vm4, %v3092_v11 }
 0x339   :  { %v1861_v13 = vpop.f32.mrf.mxu1  ;;  %3093 = vtanh.f32 %v1980_v31 }
 0x33a   :  { %v1776_v14 = vpop.f32.mrf.mxu0  ;;  %v1884_v21 = vadd.f32 %v1861_v13, %v1774_v19 }
 0x33b   :  { %v1777_v29 = vadd.f32 %v4305_v60, %v1776_v14 }
 0x33e   :  { %v1958_v23 = vpop.f32.mrf.mxu2 }
 0x33f   :  { %v3094_v24 = vpop.eup %3093  ;;  %v1981_v26 = vadd.f32 %v1958_v23, %v1884_v21  ;;  %v2007_v27 = vld [vmem:[#allocation4] sm:$0xff] }
 0x340   :  { %1998 = vst.msk [vmem:[#allocation4 + $0x8] sm:$0xff] %vm1121_vm4, %v3094_v24  ;;  %2820 = vmatmul.msk.f32.vlgmr.msra.gmra.mxu3 %vm1121_vm4, %v2007_v27 }
 0x341   :  { %v1864_v44 = vpop.f32.mrf.mxu1  ;;  %3095 = vtanh.f32 %v1981_v26 }
 0x342   :  { %v1779_v48 = vpop.f32.mrf.mxu0  ;;  %v1885_v33 = vadd.f32 %v1864_v44, %v1777_v29 }
 0x343   :  { %v1780_v63 = vadd.f32 %v4305_v60, %v1779_v48 }
 0x346   :  { %v1961_v36 = vpop.f32.mrf.mxu2 }
 0x347   :  { %v3096_v38 = vpop.eup %3095  ;;  %v1982_v39 = vadd.f32 %v1961_v36, %v1885_v33  ;;  %v2008_v40 = vld [vmem:[#allocation4 + $0x8] sm:$0xff] }
 0x348   :  { %v2098_v30 = vld [vmem:[#allocation4 + $0x1] sm:$0xff]  ;;  %1999 = vst.msk [vmem:[#allocation4 + $0x10] sm:$0xff] %vm1121_vm4, %v3096_v38  ;;  %2821 = vmatmul.msk.f32.gmra.mxu3 %vm1121_vm4, %v2008_v40  ;;  %v2303_v40 = vld [vmem:[%s4507_s12 + $0x10] sm:$0xff] }
 0x349   :  { %v2195_v42 = vld [vmem:[#allocation4 + $0x2] sm:$0xff]  ;;  %2836 = vmatmul.msk.f32.vlgmr.msrb.gmra.mxu0 %vm1121_vm4, %v2098_v30  ;;  %v1867_v43 = vpop.f32.mrf.mxu1  ;;  %3097 = vtanh.f32 %v1982_v39  ;;  %v2302_v30 = vld [vmem:[%s4507_s12 + $0x8] sm:$0xff] }
 0x34a   :  { %2852 = vmatmul.msk.f32.vlgmr.msrb.gmra.mxu1 %vm1121_vm4, %v2195_v42  ;;  %v1782_v47 = vpop.f32.mrf.mxu0  ;;  %v1886_v37 = vadd.f32 %v1867_v43, %v1780_v63  ;;  %v2305_v38 = vld [vmem:[%s4507_s12 + $0x20] sm:$0xff]  ;;  %v2304_v39 = vld [vmem:[%s4507_s12 + $0x18] sm:$0xff] }
 0x34b   :  { %v1783_v35 = vadd.f32 %v4305_v60, %v1782_v47  ;;  %2352 = vmatpush.msrb.mxu2 %v2305_v38  ;;  %v2301_v42 = vld [vmem:[%s4507_s12] sm:$0xff] }
 0x34c   :  { %v4375_v43 = vld [vmem:[%s4505_s11] ss:$0 sm:$0xff] }
 0x34d   :  { %2353 = vmatpush.msrb.mxu2 %v2304_v39 }
 0x34e   :  { %v1964_v32 = vpop.f32.mrf.mxu2 }
 0x34f   :  { %v3098_v28 = vpop.eup %3097  ;;  %v1983_v45 = vadd.f32 %v1964_v32, %v1886_v37  ;;  %v2009_v50 = vld [vmem:[#allocation4 + $0x10] sm:$0xff]  ;;  %2354 = vmatpush.msrb.mxu2 %v2303_v40 }
 0x350   :  { %v2099_v61 = vld [vmem:[#allocation4 + $0x9] sm:$0xff]  ;;  %2000 = vst.msk [vmem:[#allocation4 + $0x18] sm:$0xff] %vm1121_vm4, %v3098_v28  ;;  %2822 = vmatmul.msk.f32.gmra.mxu3 %vm1121_vm4, %v2009_v50 }
 0x351   :  { %v2196_v41 = vld [vmem:[#allocation4 + $0xa] sm:$0xff]  ;;  %2837 = vmatmul.msk.f32.gmra.mxu0 %vm1121_vm4, %v2099_v61  ;;  %v1870_v52 = vpop.f32.mrf.mxu1  ;;  %3099 = vtanh.f32 %v1983_v45  ;;  %2355 = vmatpush.msrb.mxu2 %v2302_v30 }
 0x352   :  { %2853 = vmatmul.msk.f32.gmra.mxu1 %vm1121_vm4, %v2196_v41  ;;  %v1785_v0 = vpop.f32.mrf.mxu0  ;;  %v1887_v51 = vadd.f32 %v1870_v52, %v1783_v35 }
 0x353   :  { %v1786_v12 = vadd.f32 %v4305_v60, %v1785_v0  ;;  %2356 = vmatpush.msrb.mxu2 %v2301_v42 }
 0x356   :  { %v1967_v46 = vpop.f32.mrf.mxu2 }
 0x357   :  { %v3100_v62 = vpop.eup %3099  ;;  %v1984_v3 = vadd.f32 %v1967_v46, %v1887_v51  ;;  %v2010_v54 = vld [vmem:[#allocation4 + $0x18] sm:$0xff] }
 0x358   :  { %v2100_v49 = vld [vmem:[#allocation4 + $0x11] sm:$0xff]  ;;  %2001 = vst.msk [vmem:[#allocation4 + $0x20] sm:$0xff] %vm1121_vm4, %v3100_v62  ;;  %2823 = vmatmul.msk.f32.gmra.mxu3 %vm1121_vm4, %v2010_v54 }
 0x359   :  { %v2197_v56 = vld [vmem:[#allocation4 + $0x12] sm:$0xff]  ;;  %2838 = vmatmul.msk.f32.gmra.mxu0 %vm1121_vm4, %v2100_v49  ;;  %v1873_v34 = vpop.f32.mrf.mxu1  ;;  %3101 = vtanh.f32 %v1984_v3 }
 0x35a   :  { %2854 = vmatmul.msk.f32.gmra.mxu1 %vm1121_vm4, %v2197_v56  ;;  %v1888_v25 = vadd.f32 %v1873_v34, %v1786_v12  ;;  %v1788_v57 = vpop.f32.mrf.mxu0 }
 0x35b   :  { %v1789_v2 = vadd.f32 %v4305_v60, %v1788_v57 }
 0x35e   :  { %v1970_v18 = vpop.f32.mrf.mxu2 }
 0x35f   :  { %v3102_v55 = vpop.eup %3101  ;;  %v1985_v53 = vadd.f32 %v1970_v18, %v1888_v25  ;;  %v2011_v58 = vld [vmem:[#allocation4 + $0x20] sm:$0xff] }
 0x360   :  { %v2101_v59 = vld [vmem:[#allocation4 + $0x19] sm:$0xff]  ;;  %2002 = vst.msk [vmem:[#allocation4 + $0x28] sm:$0xff] %vm1121_vm4, %v3102_v55  ;;  %2824 = vmatmul.msk.f32.gmra.mxu3 %vm1121_vm4, %v2011_v58 }
 0x361   :  { %v2198_v6 = vld [vmem:[#allocation4 + $0x1a] sm:$0xff]  ;;  %2839 = vmatmul.msk.f32.gmra.mxu0 %vm1121_vm4, %v2101_v59  ;;  %v1876_v1 = vpop.f32.mrf.mxu1  ;;  %3103 = vtanh.f32 %v1985_v53 }
 0x362   :  { %2855 = vmatmul.msk.f32.gmra.mxu1 %vm1121_vm4, %v2198_v6  ;;  %v1889_v15 = vadd.f32 %v1876_v1, %v1789_v2  ;;  %v1791_v7 = vpop.f32.mrf.mxu0 }
 0x363   :  { %v1792_v10 = vadd.f32 %v4305_v60, %v1791_v7 }
 0x366   :  { %v1973_v20 = vpop.f32.mrf.mxu2 }
 0x367   :  { %v3104_v5 = vpop.eup %3103  ;;  %v1986_v8 = vadd.f32 %v1973_v20, %v1889_v15  ;;  %v2012_v16 = vld [vmem:[#allocation4 + $0x28] sm:$0xff] }
 0x368   :  { %v2102_v4 = vld [vmem:[#allocation4 + $0x21] sm:$0xff]  ;;  %2003 = vst.msk [vmem:[#allocation4 + $0x30] sm:$0xff] %vm1121_vm4, %v3104_v5  ;;  %2825 = vmatmul.msk.f32.gmra.mxu3 %vm1121_vm4, %v2012_v16 }
 0x369   :  { %v2199_v22 = vld [vmem:[#allocation4 + $0x22] sm:$0xff]  ;;  %2840 = vmatmul.msk.f32.gmra.mxu0 %vm1121_vm4, %v2102_v4  ;;  %3105 = vtanh.f32 %v1986_v8  ;;  %v1879_v9 = vpop.f32.mrf.mxu1 }
 0x36a   :  { %2856 = vmatmul.msk.f32.gmra.mxu1 %vm1121_vm4, %v2199_v22  ;;  %v1890_v11 = vadd.f32 %v1879_v9, %v1792_v10 }
 0x36e   :  { %v1976_v31 = vpop.f32.mrf.mxu2 }
 0x36f   :  { %v3106_v13 = vpop.eup %3105  ;;  %v1987_v14 = vadd.f32 %v1976_v31, %v1890_v11  ;;  %v2013_v19 = vld [vmem:[#allocation4 + $0x30] sm:$0xff] }
 0x370   :  { %v2103_v21 = vld [vmem:[#allocation4 + $0x29] sm:$0xff]  ;;  %2004 = vst.msk [vmem:[#allocation4 + $0x38] sm:$0xff] %vm1121_vm4, %v3106_v13  ;;  %2826 = vmatmul.msk.f32.gmra.mxu3 %vm1121_vm4, %v2013_v19 }
 0x371   :  { %v2200_v23 = vld [vmem:[#allocation4 + $0x2a] sm:$0xff]  ;;  %2841 = vmatmul.msk.f32.gmra.mxu0 %vm1121_vm4, %v2103_v21  ;;  %3107 = vtanh.f32 %v1987_v14 }
 0x372   :  { %2857 = vmatmul.msk.f32.gmra.mxu1 %vm1121_vm4, %v2200_v23 }
 0x377   :  { %v3108_v24 = vpop.eup %3107  ;;  %v2014_v26 = vld [vmem:[#allocation4 + $0x38] sm:$0xff] }
 0x378   :  { %v2104_v60 = vld [vmem:[#allocation4 + $0x31] sm:$0xff]  ;;  %2006 = vst.msk [vmem:[#allocation4 + $0x40] sm:$0x3f] %vm2005_vm15, %v3108_v24  ;;  %2827 = vmatmul.msk.f32.gmra.mxu3 %vm1121_vm4, %v2014_v26 }
 0x379   :  { %v2201_v27 = vld [vmem:[#allocation4 + $0x32] sm:$0xff]  ;;  %2842 = vmatmul.msk.f32.gmra.mxu0 %vm1121_vm4, %v2104_v60 }
 0x37a   :  { %2858 = vmatmul.msk.f32.gmra.mxu1 %vm1121_vm4, %v2201_v27 }
 0x37f   :  { %v2015_v44 = vld [vmem:[#allocation4 + $0x40] sm:$0xf] }
 0x380   :  { %v2105_v48 = vld [vmem:[#allocation4 + $0x39] sm:$0xff]  ;;  %2828 = vmatmul.msk.f32.gmra.mxu3 %vm1121_vm4, %v2015_v44  ;;  %v2106_v33 = vld [vmem:[#allocation4 + $0x41] sm:$0xf] }
 0x381   :  { %v2202_v29 = vld [vmem:[#allocation4 + $0x3a] sm:$0xff]  ;;  %2843 = vmatmul.msk.f32.gmra.mxu0 %vm1121_vm4, %v2105_v48  ;;  %v2203_v36 = vld [vmem:[#allocation4 + $0x42] sm:$0xf] }
 0x382   :  { %2859 = vmatmul.msk.f32.gmra.mxu1 %vm1121_vm4, %v2202_v29 }
 0x389   :  { %2844 = vmatmul.msk.f32.gmra.mxu0 %vm1121_vm4, %v2106_v33 }
 0x38a   :  { %2860 = vmatmul.msk.f32.gmra.mxu1 %vm1121_vm4, %v2203_v36  ;;  %vm2463_vm4 = vcmask 37889  }
 0x3c3   :  { %v2071_v47 = vpop.f32.mrf.mxu3 }
 0x3c4   :  { %v2072_v63 = vadd.f32 %v4375_v43, %v2071_v47 }
 0x3c6   :  { %v2159_v37 = vpop.f32.mrf.mxu0 }
 0x3c7   :  { %v2186_v32 = vadd.f32 %v2159_v37, %v2072_v63  ;;  %v2256_v28 = vpop.f32.mrf.mxu1 }
 0x3c9   :  { %v2283_v45 = vadd.f32 %v2256_v28, %v2186_v32 }
 0x3cb   :  { %3109 = vtanh.f32 %v2283_v45  ;;  %v2074_v50 = vpop.f32.mrf.mxu3 }
 0x3cc   :  { %v2075_v61 = vadd.f32 %v4375_v43, %v2074_v50 }
 0x3ce   :  { %v2162_v41 = vpop.f32.mrf.mxu0 }
 0x3cf   :  { %v2187_v52 = vadd.f32 %v2162_v41, %v2075_v61  ;;  %v2259_v35 = vpop.f32.mrf.mxu1 }
 0x3d1   :  { %v3110_v0 = vpop.eup %3109  ;;  %v2284_v51 = vadd.f32 %v2259_v35, %v2187_v52 }
 0x3d2   :  { %2861 = vmatmul.msk.f32.vlgmr.msrb.gmra.mxu2 %vm2313_vm0, %v3110_v0 }
 0x3d3   :  { %3111 = vtanh.f32 %v2284_v51  ;;  %v2077_v46 = vpop.f32.mrf.mxu3 }
 0x3d4   :  { %v2078_v62 = vadd.f32 %v4375_v43, %v2077_v46 }
 0x3d6   :  { %v2165_v3 = vpop.f32.mrf.mxu0 }
 0x3d7   :  { %v2188_v54 = vadd.f32 %v2165_v3, %v2078_v62  ;;  %v2262_v49 = vpop.f32.mrf.mxu1 }
 0x3d9   :  { %v3112_v56 = vpop.eup %3111  ;;  %v2285_v34 = vadd.f32 %v2262_v49, %v2188_v54 }
 0x3da   :  { %2862 = vmatmul.msk.f32.gmra.mxu2 %vm2313_vm0, %v3112_v56 }
 0x3db   :  { %3113 = vtanh.f32 %v2285_v34  ;;  %v2080_v12 = vpop.f32.mrf.mxu3 }
 0x3dc   :  { %v2081_v25 = vadd.f32 %v4375_v43, %v2080_v12 }
 0x3de   :  { %v2168_v18 = vpop.f32.mrf.mxu0 }
 0x3df   :  { %v2189_v57 = vadd.f32 %v2168_v18, %v2081_v25  ;;  %v2265_v55 = vpop.f32.mrf.mxu1 }
 0x3e1   :  { %v3114_v53 = vpop.eup %3113  ;;  %v2286_v58 = vadd.f32 %v2265_v55, %v2189_v57 }
 0x3e2   :  { %2863 = vmatmul.msk.f32.gmra.mxu2 %vm2313_vm0, %v3114_v53 }
 0x3e3   :  { %3115 = vtanh.f32 %v2286_v58  ;;  %v2083_v59 = vpop.f32.mrf.mxu3 }
 0x3e4   :  { %v2084_v6 = vadd.f32 %v4375_v43, %v2083_v59 }
 0x3e6   :  { %v2171_v1 = vpop.f32.mrf.mxu0 }
 0x3e7   :  { %v2190_v2 = vadd.f32 %v2171_v1, %v2084_v6  ;;  %v2268_v15 = vpop.f32.mrf.mxu1 }
 0x3e9   :  { %v3116_v20 = vpop.eup %3115  ;;  %v2287_v5 = vadd.f32 %v2268_v15, %v2190_v2 }
 0x3ea   :  { %2864 = vmatmul.msk.f32.gmra.mxu2 %vm2313_vm0, %v3116_v20 }
 0x3eb   :  { %3117 = vtanh.f32 %v2287_v5  ;;  %v2086_v8 = vpop.f32.mrf.mxu3 }
 0x3ec   :  { %v2087_v16 = vadd.f32 %v4375_v43, %v2086_v8 }
 0x3ee   :  { %v2174_v4 = vpop.f32.mrf.mxu0 }
 0x3ef   :  { %v2191_v22 = vadd.f32 %v2174_v4, %v2087_v16  ;;  %v2271_v7 = vpop.f32.mrf.mxu1 }
 0x3f1   :  { %v3118_v9 = vpop.eup %3117  ;;  %v2288_v10 = vadd.f32 %v2271_v7, %v2191_v22 }
 0x3f2   :  { %2865 = vmatmul.msk.f32.gmra.mxu2 %vm2313_vm0, %v3118_v9 }
 0x3f3   :  { %3119 = vtanh.f32 %v2288_v10  ;;  %v2089_v11 = vpop.f32.mrf.mxu3 }
 0x3f4   :  { %v2090_v31 = vadd.f32 %v4375_v43, %v2089_v11 }
 0x3f6   :  { %v2177_v13 = vpop.f32.mrf.mxu0 }
 0x3f7   :  { %v2192_v14 = vadd.f32 %v2177_v13, %v2090_v31  ;;  %v2274_v19 = vpop.f32.mrf.mxu1 }
 0x3f9   :  { %v3120_v21 = vpop.eup %3119  ;;  %v2289_v23 = vadd.f32 %v2274_v19, %v2192_v14 }
 0x3fa   :  { %2866 = vmatmul.msk.f32.gmra.mxu2 %vm2313_vm0, %v3120_v21 }
 0x3fb   :  { %3121 = vtanh.f32 %v2289_v23  ;;  %v2092_v24 = vpop.f32.mrf.mxu3 }
 0x3fc   :  { %v2093_v26 = vadd.f32 %v4375_v43, %v2092_v24 }
 0x3fe   :  { %v2180_v60 = vpop.f32.mrf.mxu0 }
 0x3ff   :  { %v2193_v27 = vadd.f32 %v2180_v60, %v2093_v26  ;;  %v2277_v44 = vpop.f32.mrf.mxu1 }
 0x401   :  { %v3122_v48 = vpop.eup %3121  ;;  %v2290_v29 = vadd.f32 %v2277_v44, %v2193_v27 }
 0x402   :  { %2867 = vmatmul.msk.f32.gmra.mxu2 %vm2313_vm0, %v3122_v48 }
 0x403   :  { %3123 = vtanh.f32 %v2290_v29  ;;  %v2095_v33 = vpop.f32.mrf.mxu3 }
 0x404   :  { %v2096_v36 = vadd.f32 %v4375_v43, %v2095_v33 }
 0x406   :  { %v2183_v38 = vpop.f32.mrf.mxu0 }
 0x407   :  { %v2194_v39 = vadd.f32 %v2183_v38, %v2096_v36  ;;  %v2280_v40 = vpop.f32.mrf.mxu1 }
 0x409   :  { %v3124_v30 = vpop.eup %3123  ;;  %v2291_v42 = vadd.f32 %v2280_v40, %v2194_v39 }
 0x40a   :  { %2868 = vmatmul.msk.f32.gmra.mxu2 %vm2313_vm0, %v3124_v30 }
 0x40b   :  { %3125 = vtanh.f32 %v2291_v42 }
 0x411   :  { %v3126_v47 = vpop.eup %3125 }
 0x412   :  { %2869 = vmatmul.msk.f32.gmra.mxu2 %vm2313_vm0, %v3126_v47 }
 0x455   :  { %v2358_v63 = vpop.f32.mrf.mxu2 }
 0x456   :  { %v2359_v37 = vadd.f32 %v2358_v63, %v4096_v17 }
 0x458   :  { %v2385_v32 = vsub.f32 0.0, %v2359_v37 }
 0x45a   :  { %v2394_v28 = vmul.f32 1.442695, %v2385_v32 }
 0x45c   :  { %3127 = vpow2.f32 %v2394_v28 }
 0x45d   :  { %v2361_v45 = vpop.f32.mrf.mxu2 }
 0x45e   :  { %v2362_v43 = vadd.f32 %v2361_v45, %v4096_v17 }
 0x460   :  { %v2386_v50 = vsub.f32 0.0, %v2362_v43 }
 0x462   :  { %v3128_v61 = vpop.eup %3127  ;;  %v2396_v41 = vmul.f32 1.442695, %v2386_v50 }
 0x463   :  { %v2412_v52 = vadd.f32 1.0, %v3128_v61 }
 0x464   :  { %3129 = vpow2.f32 %v2396_v41 }
 0x465   :  { %3131 = vrcp.f32 %v2412_v52  ;;  %v2364_v35 = vpop.f32.mrf.mxu2 }
 0x466   :  { %v2365_v0 = vadd.f32 %v2364_v35, %v4096_v17 }
 0x468   :  { %v2387_v51 = vsub.f32 0.0, %v2365_v0 }
 0x46a   :  { %v3130_v46 = vpop.eup %3129  ;;  %v2398_v62 = vmul.f32 1.442695, %v2387_v51 }
 0x46b   :  { %v4398_v3 = vpop.eup %3131  ;;  %v2413_v54 = vadd.f32 1.0, %v3130_v46 }
 0x46c   :  { %3133 = vpow2.f32 %v2398_v62  ;;  %v2431_v49 = vsel %vm2430_vm1, %v4398_v3, 0.0 }
 0x46d   :  { %3135 = vrcp.f32 %v2413_v54  ;;  %v2367_v56 = vpop.f32.mrf.mxu2  ;;  %2432 = vadd.xlane.f32.xlu2 %v2431_v49 }
 0x46e   :  { %v2368_v34 = vadd.f32 %v2367_v56, %v4096_v17 }
 0x470   :  { %v2388_v12 = vsub.f32 0.0, %v2368_v34 }
 0x472   :  { %v3134_v25 = vpop.eup %3133  ;;  %v2400_v18 = vmul.f32 1.442695, %v2388_v12 }
 0x473   :  { %v4403_v57 = vpop.eup %3135  ;;  %v2414_v55 = vadd.f32 1.0, %v3134_v25 }
 0x474   :  { %3137 = vpow2.f32 %v2400_v18  ;;  %v2447_v53 = vrot.slane %v4403_v57, 1 }
 0x475   :  { %3139 = vrcp.f32 %v2414_v55  ;;  %v2370_v58 = vpop.f32.mrf.mxu2 }
 0x476   :  { %v2371_v59 = vadd.f32 %v2370_v58, %v4096_v17  ;;  %v2449_v6 = vsel %vm2430_vm1, %v2447_v53, 0.0 }
 0x477   :  { %2450 = vadd.xlane.f32.xlu1 %v2449_v6 }
 0x478   :  { %v2389_v1 = vsub.f32 0.0, %v2371_v59 }
 0x47a   :  { %v3138_v2 = vpop.eup %3137  ;;  %v2402_v15 = vmul.f32 1.442695, %v2389_v1 }
 0x47b   :  { %v4408_v20 = vpop.eup %3139  ;;  %v2415_v5 = vadd.f32 1.0, %v3138_v2 }
 0x47c   :  { %v2466_v8 = vrot.slane %v4408_v20, 2 }
 0x47d   :  { %3141 = vrcp.f32 %v2415_v5  ;;  %v2373_v16 = vpop.f32.mrf.mxu2 }
 0x47e   :  { %3143 = vpow2.f32 %v2402_v15  ;;  %v2374_v4 = vadd.f32 %v2373_v16, %v4096_v17  ;;  %v2468_v22 = vsel %vm2430_vm1, %v2466_v8, 0.0 }
 0x47f   :  { %2469 = vadd.xlane.f32.xlu2 %v2468_v22 }
 0x480   :  { %v2390_v7 = vsub.f32 0.0, %v2374_v4 }
 0x482   :  { %v2404_v9 = vmul.f32 1.442695, %v2390_v7 }
 0x483   :  { %v4413_v10 = vpop.eup %3141 }
 0x484   :  { %v3144_v11 = vpop.eup %3143  ;;  %3145 = vpow2.f32 %v2404_v9  ;;  %v2485_v31 = vrot.slane %v4413_v10, 3 }
 0x485   :  { %v2376_v13 = vpop.f32.mrf.mxu2  ;;  %v2416_v21 = vadd.f32 1.0, %v3144_v11 }
 0x486   :  { %v2377_v14 = vadd.f32 %v2376_v13, %v4096_v17  ;;  %v2487_v19 = vsel %vm2430_vm1, %v2485_v31, 0.0 }
 0x487   :  { %2488 = vadd.xlane.f32.xlu1 %v2487_v19  ;;  %3147 = vrcp.f32 %v2416_v21 }
 0x488   :  { %v2391_v23 = vsub.f32 0.0, %v2377_v14 }
 0x48a   :  { %v3146_v24 = vpop.eup %3145  ;;  %v2406_v26 = vmul.f32 1.442695, %v2391_v23 }
 0x48b   :  { %v2417_v60 = vadd.f32 1.0, %v3146_v24 }
 0x48c   :  { %3149 = vpow2.f32 %v2406_v26 }
 0x48d   :  { %3151 = vrcp.f32 %v2417_v60  ;;  %v2379_v27 = vpop.f32.mrf.mxu2  ;;  %v4419_v29 = vpop.eup %3147 }
 0x48e   :  { %v2380_v44 = vadd.f32 %v2379_v27, %v4096_v17  ;;  %v2505_v40 = vrot.slane %v4419_v29, 4 }
 0x490   :  { %v2392_v48 = vsub.f32 0.0, %v2380_v44 }
 0x492   :  { %v3150_v33 = vpop.eup %3149  ;;  %v2408_v36 = vmul.f32 1.442695, %v2392_v48 }
 0x493   :  { %v4421_v38 = vpop.eup %3151  ;;  %v2418_v39 = vadd.f32 1.0, %v3150_v33 }
 0x494   :  { %3153 = vpow2.f32 %v2408_v36  ;;  %v2506_v30 = vrot.slane %v4421_v38, 4  ;;  %v2530_v61 = vrot.slane %v4421_v38, 5 }
 0x495   :  { %3155 = vrcp.f32 %v2418_v39  ;;  %v2382_v42 = vpop.f32.mrf.mxu2 }
 0x496   :  { %v2383_v47 = vadd.f32 %v2382_v42, %v4096_v17  ;;  %v2507_v63 = vsel %vm1388_vm5, %v2505_v40, %v2506_v30  ;;  %vm2482_vm5 = vcmask 38914  }
 0x497   :  { %v2509_v37 = vsel %vm2430_vm1, %v2507_v63, 0.0 }
 0x498   :  { %v2393_v32 = vsub.f32 0.0, %v2383_v47  ;;  %2510 = vadd.xlane.f32.xlu2 %v2509_v37 }
 0x49a   :  { %v3154_v28 = vpop.eup %3153  ;;  %v2410_v45 = vmul.f32 1.442695, %v2393_v32 }
 0x49b   :  { %v4428_v43 = vpop.eup %3155  ;;  %v2419_v50 = vadd.f32 1.0, %v3154_v28 }
 0x49c   :  { %3157 = vpow2.f32 %v2410_v45  ;;  %v2531_v41 = vrot.slane %v4428_v43, 5  ;;  %v2554_v46 = vrot.slane %v4428_v43, 6 }
 0x49d   :  { %3159 = vrcp.f32 %v2419_v50 }
 0x49e   :  { %v2532_v52 = vsel %vm2529_vm2, %v2530_v61, %v2531_v41 }
 0x49f   :  { %v2534_v17 = vsel %vm2430_vm1, %v2532_v52, 0.0 }
 0x4a0   :  { %2535 = vadd.xlane.f32.xlu1 %v2534_v17 }
 0x4a2   :  { %v3158_v35 = vpop.eup %3157 }
 0x4a3   :  { %v4433_v0 = vpop.eup %3159  ;;  %v2420_v51 = vadd.f32 1.0, %v3158_v35 }
 0x4a4   :  { %v2555_v62 = vrot.slane %v4433_v0, 6  ;;  %v2579_v34 = vrot.slane %v4433_v0, 7 }
 0x4a5   :  { %3161 = vrcp.f32 %v2420_v51 }
 0x4a6   :  { %v2556_v54 = vsel %vm1421_vm8, %v2554_v46, %v2555_v62  ;;  %vm2526_vm8 = vcmask 32768  }
 0x4a7   :  { %v2558_v49 = vsel %vm2430_vm1, %v2556_v54, 0.0 }
 0x4a8   :  { %2559 = vadd.xlane.f32.xlu2 %v2558_v49 }
 0x4ab   :  { %v4439_v56 = vpop.eup %3161 }
 0x4ac   :  { %v2580_v12 = vrot.slane %v4439_v56, 7 }
 0x4ae   :  { %v2581_v25 = vsel %vm2578_vm3, %v2579_v34, %v2580_v12 }
 0x4af   :  { %v2583_v18 = vsel %vm2430_vm1, %v2581_v25, 0.0 }
 0x4b0   :  { %2584 = vadd.xlane.f32.xlu1 %v2583_v18 }
 0x4e0   :  { %v2433_v55 = vpop.xlane.xlu2 %2432 }
 0x4e1   :  { %v2434_v53 = vrot.slane %v2433_v55, 4 }
 0x4e3   :  { %v2435_v58 = vadd.f32 %v2434_v53, %v2433_v55 }
 0x4e5   :  { %v2436_v59 = vrot.slane %v2435_v58, 2 }
 0x4e7   :  { %v2437_v6 = vadd.f32 %v2436_v59, %v2435_v58 }
 0x4e9   :  { %v2438_v1 = vrot.slane %v2437_v6, 1 }
 0x4ea   :  { %v2451_v2 = vpop.xlane.xlu1 %2450 }
 0x4eb   :  { %v2452_v15 = vrot.slane %v2451_v2, 4  ;;  %v2439_v5 = vadd.f32 %v2438_v1, %v2437_v6 }
 0x4ed   :  { %v2453_v8 = vadd.f32 %v2452_v15, %v2451_v2  ;;  %2907 = vpush %v2439_v5 }
 0x4ef   :  { %v2454_v16 = vrot.slane %v2453_v8, 2 }
 0x4f1   :  { %v2455_v4 = vadd.f32 %v2454_v16, %v2453_v8 }
 0x4f2   :  { %v2470_v22 = vpop.xlane.xlu2 %2469 }
 0x4f3   :  { %v2471_v7 = vrot.slane %v2470_v22, 4  ;;  %v2456_v9 = vrot.slane %v2455_v4, 1 }
 0x4f5   :  { %v2472_v11 = vadd.f32 %v2471_v7, %v2470_v22  ;;  %v2457_v31 = vadd.f32 %v2456_v9, %v2455_v4 }
 0x4f7   :  { %v2473_v13 = vrot.slane %v2472_v11, 2  ;;  %2909 = vpush %v2457_v31 }
 0x4f9   :  { %v2474_v14 = vadd.f32 %v2473_v13, %v2472_v11 }
 0x4fa   :  { %v2489_v19 = vpop.xlane.xlu1 %2488 }
 0x4fb   :  { %v2490_v21 = vrot.slane %v2489_v19, 4  ;;  %v2475_v23 = vrot.slane %v2474_v14, 1 }
 0x4fd   :  { %v2491_v24 = vadd.f32 %v2490_v21, %v2489_v19  ;;  %v2476_v26 = vadd.f32 %v2475_v23, %v2474_v14 }
 0x4ff   :  { %v2492_v60 = vrot.slane %v2491_v24, 2  ;;  %2911 = vpush %v2476_v26 }
 0x501   :  { %v2493_v27 = vadd.f32 %v2492_v60, %v2491_v24 }
 0x503   :  { %v2494_v44 = vrot.slane %v2493_v27, 1 }
 0x505   :  { %v2495_v48 = vadd.f32 %v2494_v44, %v2493_v27 }
 0x507   :  { %2913 = vpush %v2495_v48 }
 0x50b   :  { %v2511_v33 = vpop.xlane.xlu2 %2510 }
 0x50c   :  { %v2512_v36 = vrot.slane %v2511_v33, 4 }
 0x50e   :  { %v2513_v39 = vadd.f32 %v2512_v36, %v2511_v33 }
 0x510   :  { %v2514_v40 = vrot.slane %v2513_v39, 2 }
 0x512   :  { %v2515_v30 = vadd.f32 %v2514_v40, %v2513_v39 }
 0x513   :  { %v2536_v42 = vpop.xlane.xlu1 %2535 }
 0x514   :  { %v2537_v47 = vrot.slane %v2536_v42, 4  ;;  %v2516_v63 = vrot.slane %v2515_v30, 1 }
 0x516   :  { %v2538_v37 = vadd.f32 %v2537_v47, %v2536_v42  ;;  %v2517_v32 = vadd.f32 %v2516_v63, %v2515_v30 }
 0x518   :  { %v2539_v28 = vrot.slane %v2538_v37, 2  ;;  %2915 = vpush %v2517_v32 }
 0x51a   :  { %v2540_v45 = vadd.f32 %v2539_v28, %v2538_v37 }
 0x51b   :  { %v2560_v50 = vpop.xlane.xlu2 %2559 }
 0x51c   :  { %v2561_v61 = vrot.slane %v2560_v50, 4  ;;  %v2541_v41 = vrot.slane %v2540_v45, 1 }
 0x51e   :  { %v2562_v52 = vadd.f32 %v2561_v61, %v2560_v50  ;;  %s2908_s11 = spop %2907  ;;  %v2542_v17 = vadd.f32 %v2541_v41, %v2540_v45 }
 0x51f   :  { %v2441_v35 = vstv %s2908_s11 }
 0x520   :  { %v2563_v51 = vrot.slane %v2562_v52, 2  ;;  %3163 = vrcp.f32 %v2441_v35  ;;  %2917 = vpush %v2542_v17 }
 0x522   :  { %v2564_v46 = vadd.f32 %v2563_v51, %v2562_v52 }
 0x523   :  { %v2585_v62 = vpop.xlane.xlu1 %2584 }
 0x524   :  { %v2586_v54 = vrot.slane %v2585_v62, 4  ;;  %v2565_v49 = vrot.slane %v2564_v46, 1 }
 0x526   :  { %v3164_v34 = vpop.eup %3163  ;;  %v2587_v12 = vadd.f32 %v2586_v54, %v2585_v62  ;;  %v2566_v25 = vadd.f32 %v2565_v49, %v2564_v46 }
 0x527   :  { %v2443_v18 = vmul.f32 12.5, %v3164_v34 }
 0x528   :  { %v2588_v55 = vrot.slane %v2587_v12, 2  ;;  %s2910_s12 = spop %2909  ;;  %2919 = vpush %v2566_v25 }
 0x529   :  { %v2444_v53 = vmul.f32 %v4398_v3, %v2443_v18  ;;  %v2459_v58 = vstv %s2910_s12 }
 0x52a   :  { %v2589_v59 = vadd.f32 %v2588_v55, %v2587_v12  ;;  %3165 = vrcp.f32 %v2459_v58 }
 0x52b   :  { %2445 = vst.msk [vmem:[%s4508_s15] sm:$0x1f] %vm2430_vm1, %v2444_v53 }
 0x52c   :  { %v2590_v6 = vrot.slane %v2589_v59, 1 }
 0x52e   :  { %v2591_v1 = vadd.f32 %v2590_v6, %v2589_v59 }
 0x530   :  { %v3166_v2 = vpop.eup %3165  ;;  %s2912_s30 = spop %2911  ;;  %2921 = vpush %v2591_v1 }
 0x531   :  { %v2461_v15 = vmul.f32 12.5, %v3166_v2  ;;  %v2478_v5 = vstv %s2912_s30 }
 0x532   :  { %3167 = vrcp.f32 %v2478_v5 }
 0x533   :  { %v2462_v8 = vmul.f32 %v4403_v57, %v2461_v15 }
 0x535   :  { %2464 = vst.msk [vmem:[%s4508_s15 + $0x4] sm:$0x3e] %vm2463_vm4, %v2462_v8 }
 0x538   :  { %v3168_v3 = vpop.eup %3167  ;;  %s2914_s18 = spop %2913 }
 0x539   :  { %v2480_v16 = vmul.f32 12.5, %v3168_v3  ;;  %v2497_v4 = vstv %s2914_s18 }
 0x53a   :  { %3169 = vrcp.f32 %v2497_v4 }
 0x53b   :  { %v2481_v22 = vmul.f32 %v4408_v20, %v2480_v16 }
 0x53d   :  { %2483 = vst.msk [vmem:[%s4508_s15 + $0x8] sm:$0x7c] %vm2482_vm5, %v2481_v22 }
 0x540   :  { %v3170_v7 = vpop.eup %3169 }
 0x541   :  { %v2499_v9 = vmul.f32 12.5, %v3170_v7 }
 0x543   :  { %v2500_v57 = vmul.f32 %v4413_v10, %v2499_v9 }
 0x545   :  { %2502 = vst.msk [vmem:[%s4508_s15 + $0xc] sm:$0xf8] %vm2501_vm6, %v2500_v57 }
 0x549   :  { %s2916_s1 = spop %2915 }
 0x54a   :  { %v2519_v11 = vstv %s2916_s1 }
 0x54b   :  { %3171 = vrcp.f32 %v2519_v11 }
 0x551   :  { %v3172_v31 = vpop.eup %3171  ;;  %s2918_s21 = spop %2917 }
 0x552   :  { %v2521_v13 = vmul.f32 12.5, %v3172_v31  ;;  %v2544_v20 = vstv %s2918_s21 }
 0x553   :  { %3173 = vrcp.f32 %v2544_v20 }
 0x554   :  { %v2522_v14 = vmul.f32 %v4419_v29, %v2521_v13  ;;  %v2523_v19 = vmul.f32 %v4421_v38, %v2521_v13 }
 0x556   :  { %2525 = vst.msk [vmem:[%s4508_s15 + $0x10] sm:$0xf0] %vm2524_vm7, %v2522_v14 }
 0x557   :  { %2527 = vst.msk [vmem:[%s4508_s15 + $0x18] sm:$0x1] %vm2526_vm8, %v2523_v19 }
 0x559   :  { %v3174_v10 = vpop.eup %3173  ;;  %s2920_s9 = spop %2919 }
 0x55a   :  { %v2546_v21 = vmul.f32 12.5, %v3174_v10  ;;  %v2568_v23 = vstv %s2920_s9 }
 0x55b   :  { %3175 = vrcp.f32 %v2568_v23 }
 0x55c   :  { %v2547_v24 = vmul.f32 %v4421_v38, %v2546_v21  ;;  %v2548_v29 = vmul.f32 %v4428_v43, %v2546_v21 }
 0x55e   :  { %2550 = vst.msk [vmem:[%s4508_s15 + $0x14] sm:$0xe0] %vm2549_vm9, %v2547_v24 }
 0x55f   :  { %2552 = vst.msk [vmem:[%s4508_s15 + $0x1c] sm:$0x3] %vm2551_vm10, %v2548_v29 }
 0x561   :  { %v3176_v26 = vpop.eup %3175  ;;  %s2922_s26 = spop %2921 }
 0x562   :  { %v2570_v60 = vmul.f32 12.5, %v3176_v26  ;;  %v2593_v27 = vstv %s2922_s26 }
 0x563   :  { %3177 = vrcp.f32 %v2593_v27 }
 0x564   :  { %v2571_v44 = vmul.f32 %v4428_v43, %v2570_v60  ;;  %v2572_v38 = vmul.f32 %v4433_v0, %v2570_v60 }
 0x566   :  { %2574 = vst.msk [vmem:[%s4508_s15 + $0x18] sm:$0xc0] %vm2573_vm11, %v2571_v44 }
 0x567   :  { %2576 = vst.msk [vmem:[%s4508_s15 + $0x20] sm:$0x7] %vm2575_vm12, %v2572_v38 }
 0x569   :  { %v3178_v48 = vpop.eup %3177 }
 0x56a   :  { %v2595_v33 = vmul.f32 12.5, %v3178_v48 }
 0x56c   :  { %v2596_v36 = vmul.f32 %v4433_v0, %v2595_v33  ;;  %v2597_v39 = vmul.f32 %v4439_v56, %v2595_v33 }
 0x56e   :  { %2599 = vst.msk [vmem:[%s4508_s15 + $0x1c] sm:$0x80] %vm2598_vm13, %v2596_v36 }
 0x56f   :  { %2601 = vst.msk [vmem:[%s4508_s15 + $0x24] sm:$0xf] %vm2600_vm14, %v2597_v39 }

</bundles_post_ra>
